<compile_context>
chip_gen: v6e
topology: v6e:2x2x1
jax: 0.10.0
libtpu: 0.0.40
codegen_flags: <defaults>
</compile_context>

<pallas_src>
import functools

import numpy as np
import jax
import jax.numpy as jnp
from jax.experimental import pallas as pl
from jax.experimental.pallas import tpu as pltpu


LANES = 128      # all channel dims are zero-padded to the full 128-lane width
CIN0_PAD = 8     # first-layer Cin is padded 3 -> 8 (sublane-friendly K)


def _round_up(x, m):
    return (x + m - 1) // m * m


def _pool_selector(h, w, rows_out, dst_stride, dst_off):
    """One-hot selector implementing the 2x2/stride-2 max-pool bookkeeping.

    Input rows index the 'wide' conv output laid out flat as r*(w+2)+c for
    r in [0,h), c in [0,w+2) (the 2 extra columns per row are garbage and are
    never selected).  Output row k*rows_out + d picks pool-window position
    k = 2*dy+dx for destination d = (dst_off+pr)*dst_stride + (dst_off+pc);
    all-zero rows produce the zero border padding of the next stage.
    """
    wpad = w + 2
    hn, wn = h // 2, w // 2
    sel = np.zeros((4, rows_out, h * wpad), np.float32)
    for dy in range(2):
        for dx in range(2):
            k = 2 * dy + dx
            for pr in range(hn):
                for pc in range(wn):
                    dst = (dst_off + pr) * dst_stride + (dst_off + pc)
                    src = (2 * pr + dy) * wpad + (2 * pc + dx)
                    sel[k, dst, src] = 1.0
    return sel.reshape(4 * rows_out, h * wpad)


def _encoder_kernel(x_ref, w1, b1, s1, w2, b2, s2, w3, b3, s3,
                    o_ref, a2_scr, a3_scr, *, dims):
    """Fused (Conv3x3 pad=1 -> bias -> ReLU -> MaxPool 2x2) x 3 for one image."""

    def stage(a_ref, w_ref, b_ref, s_ref, h, wpad, cinp, rows_out):
        rows = h * wpad
        acc = jnp.zeros((rows, LANES), jnp.float32)
        # 3x3 conv as 9 shifted (rows, cinp) @ (cinp, 128) MXU matmuls,
        # accumulated in f32.  Slices are contiguous static windows of the
        # flat padded activation (no im2col materialization anywhere).
        for k in range(9):
            kh, kw = divmod(k, 3)
            patch = a_ref[pl.ds(kh * wpad + kw, rows), :].astype(jnp.bfloat16)
            wk = w_ref[pl.ds(k * cinp, cinp), :]
            acc = acc + jnp.dot(patch, wk, preferred_element_type=jnp.float32)
        y = jnp.maximum(acc + b_ref[...], 0.0).astype(jnp.bfloat16)  # bias+ReLU
        # pool + re-pad for the next stage: one big selection matmul, then a
        # VPU max over the 4 pool-window positions (leading axis -> free).
        z = jnp.dot(s_ref[...], y, preferred_element_type=jnp.float32)
        return jnp.max(z.reshape(4, rows_out, LANES), axis=0)

    (h1, wp1, c1, r1), (h2, wp2, c2, r2), (h3, wp3, c3, r3) = dims
    a2_scr[...] = stage(x_ref, w1, b1, s1, h1, wp1, c1, r1).astype(a2_scr.dtype)
    a3_scr[...] = stage(a2_scr, w2, b2, s2, h2, wp2, c2, r2).astype(a3_scr.dtype)
    o_ref[...] = stage(a3_scr, w3, b3, s3, h3, wp3, c3, r3).astype(o_ref.dtype)


def convolution_forward(x_nchw, params):
    """Forward pass matching the PyTorch `convolution` module (NCHW in/out)."""
    n, cin0, h, w = x_nchw.shape
    assert h % 8 == 0 and w % 8 == 0, "three 2x2 max-pools need H, W % 8 == 0"

    # static per-stage geometry (spatial size halves after every stage)
    hs = [h, h // 2, h // 4]
    ws = [w, w // 2, w // 4]
    hf, wf = h // 8, w // 8
    cinps = [CIN0_PAD, LANES, LANES]
    lpads = [_round_up((hh + 2) * (ww + 2) + 2, 8) for hh, ww in zip(hs, ws)]
    out_rows = _round_up(hf * wf, 8)
    cout_final = params[-1][0].shape[0]

    # ---- input: NCHW -> NHWC, pad channels 3->8, zero-pad spatial by 1,
    #      flatten to the padded flat layout the kernel consumes ----
    x = jnp.transpose(x_nchw, (0, 2, 3, 1))
    x = jnp.pad(x, ((0, 0), (1, 1), (1, 1), (0, CIN0_PAD - cin0)))
    x = x.reshape(n, (h + 2) * (w + 2), CIN0_PAD)
    x = jnp.pad(x, ((0, 0), (0, lpads[0] - (h + 2) * (w + 2)), (0, 0)))
    x = x.astype(jnp.float32)

    # ---- weights OIHW -> (9*CinP, 128) zero-padded bf16, bias -> (1,128) f32
    def prep_wb(wb, cinp):
        wt, bias = wb
        cout, cin = wt.shape[0], wt.shape[1]
        wk = jnp.transpose(wt, (2, 3, 1, 0))                     # (3,3,Cin,Cout)
        wk = jnp.pad(wk, ((0, 0), (0, 0), (0, cinp - cin), (0, LANES - cout)))
        wk = wk.reshape(9 * cinp, LANES).astype(jnp.bfloat16)
        bp = jnp.pad(bias, (0, LANES - cout)).reshape(1, LANES).astype(jnp.float32)
        return wk, bp

    (w1, b1), (w2, b2), (w3, b3) = [prep_wb(p, c) for p, c in zip(params, cinps)]

    # ---- pooling selectors (tiny constants; also produce next stage's pad) --
    s1 = jnp.asarray(_pool_selector(hs[0], ws[0], lpads[1], ws[1] + 2, 1),
                     jnp.bfloat16)
    s2 = jnp.asarray(_pool_selector(hs[1], ws[1], lpads[2], ws[2] + 2, 1),
                     jnp.bfloat16)
    s3 = jnp.asarray(_pool_selector(hs[2], ws[2], out_rows, wf, 0),
                     jnp.bfloat16)

    dims = tuple((hs[i], ws[i] + 2, cinps[i],
                  (lpads[1], lpads[2], out_rows)[i]) for i in range(3))
    kernel = functools.partial(_encoder_kernel, dims=dims)

    out = pl.pallas_call(
        kernel,
        out_shape=jax.ShapeDtypeStruct((n, out_rows, LANES), jnp.float32),
        grid=(n,),
        in_specs=[
            pl.BlockSpec((None, lpads[0], CIN0_PAD), lambda i: (i, 0, 0)),
            pl.BlockSpec(w1.shape, lambda i: (0, 0)),
            pl.BlockSpec(b1.shape, lambda i: (0, 0)),
            pl.BlockSpec(s1.shape, lambda i: (0, 0)),
            pl.BlockSpec(w2.shape, lambda i: (0, 0)),
            pl.BlockSpec(b2.shape, lambda i: (0, 0)),
            pl.BlockSpec(s2.shape, lambda i: (0, 0)),
            pl.BlockSpec(w3.shape, lambda i: (0, 0)),
            pl.BlockSpec(b3.shape, lambda i: (0, 0)),
            pl.BlockSpec(s3.shape, lambda i: (0, 0)),
        ],
        out_specs=pl.BlockSpec((None, out_rows, LANES), lambda i: (i, 0, 0)),
        scratch_shapes=[pltpu.VMEM((lpads[1], LANES), jnp.float32),
                        pltpu.VMEM((lpads[2], LANES), jnp.float32)],
        compiler_params=pltpu.CompilerParams(
            dimension_semantics=("parallel",)),
    )(x, w1, b1, s1, w2, b2, s2, w3, b3, s3)

    out = out[:, :hf * wf, :cout_final].reshape(n, hf, wf, cout_final)
    return jnp.transpose(out, (0, 3, 1, 2))                      # NHWC -> NCHW


def init_params(key):
    """Deterministic PyTorch-style init: U(-1/sqrt(fan_in), 1/sqrt(fan_in))."""
    layer_shapes = [(16, 3), (32, 16), (64, 32)]                 # (Cout, Cin), 3x3
    params = []
    for (cout, cin) in layer_shapes:
        key, kw, kb = jax.random.split(key, 3)
        bound = 1.0 / (cin * 9) ** 0.5
        w = jax.random.uniform(kw, (cout, cin, 3, 3), jnp.float32, -bound, bound)
        b = jax.random.uniform(kb, (cout,), jnp.float32, -bound, bound)
        params.append((w, b))
    return params


def reference_forward(x_nchw, params):
    """Pure-JAX f32 reference (lax.conv + reduce_window) for correctness."""
    x = jnp.transpose(x_nchw, (0, 2, 3, 1))
    for (w, b) in params:
        w_hwio = jnp.transpose(w, (2, 3, 1, 0))
        y = jax.lax.conv_general_dilated(
            x, w_hwio, window_strides=(1, 1), padding=((1, 1), (1, 1)),
            dimension_numbers=("NHWC", "HWIO", "NHWC"))
        y = jnp.maximum(y + b, 0.0)
        x = jax.lax.reduce_window(y, -jnp.inf, jax.lax.max,
                                  (1, 2, 2, 1), (1, 2, 2, 1), "VALID")
    return jnp.transpose(x, (0, 3, 1, 2))


if __name__ == "__main__":
    key = jax.random.PRNGKey(0)
    pkey, xkey = jax.random.split(key)
    params = init_params(pkey)

    # Small NCHW input consistent with the module (3 input channels).
    x = jax.random.normal(xkey, (2, 3, 16, 16), jnp.float32)

    fwd = jax.jit(convolution_forward)
    out = jax.block_until_ready(fwd(x, params))

    # Sanity check against a pure-JAX f32 reference (bf16 matmul tolerance).
    ref = reference_forward(x, params)
    assert out.shape == (2, 64, 2, 2), out.shape
    assert jnp.allclose(out, ref, atol=3e-2, rtol=3e-2), \
        float(jnp.max(jnp.abs(out - ref)))

    print("KERNEL_OK")
</pallas_src>

<mosaic_0001>
module attributes {stable_mosaic.version = 11 : i64} {
  func.func @_encoder_kernel(%arg0: i32, %arg1: memref<1x328x8xf32, #tpu.memory_space<vmem>>, %arg2: memref<72x128xbf16, #tpu.memory_space<vmem>>, %arg3: memref<1x128xf32, #tpu.memory_space<vmem>>, %arg4: memref<416x288xbf16, #tpu.memory_space<vmem>>, %arg5: memref<1152x128xbf16, #tpu.memory_space<vmem>>, %arg6: memref<1x128xf32, #tpu.memory_space<vmem>>, %arg7: memref<160x80xbf16, #tpu.memory_space<vmem>>, %arg8: memref<1152x128xbf16, #tpu.memory_space<vmem>>, %arg9: memref<1x128xf32, #tpu.memory_space<vmem>>, %arg10: memref<32x24xbf16, #tpu.memory_space<vmem>>, %arg11: memref<1x8x128xf32, #tpu.memory_space<vmem>>, %arg12: memref<104x128xf32, #tpu.memory_space<vmem>>, %arg13: memref<40x128xf32, #tpu.memory_space<vmem>>) attributes {dimension_semantics = [#tpu.dimension_semantics<parallel>], iteration_bounds = array<i64: 2>, scalar_prefetch = 0 : i64, scratch_operands = 2 : i64, tpu.core_type = #tpu.core_type<tc>, window_params = [{transform_indices = @transform_0, window_bounds = array<i64: 1, 328, 8>}, {pipeline_mode = #tpu.pipeline_mode<synchronous>, transform_indices = @transform_1, window_bounds = array<i64: 72, 128>}, {pipeline_mode = #tpu.pipeline_mode<synchronous>, transform_indices = @transform_2, window_bounds = array<i64: 1, 128>}, {pipeline_mode = #tpu.pipeline_mode<synchronous>, transform_indices = @transform_3, window_bounds = array<i64: 416, 288>}, {pipeline_mode = #tpu.pipeline_mode<synchronous>, transform_indices = @transform_4, window_bounds = array<i64: 1152, 128>}, {pipeline_mode = #tpu.pipeline_mode<synchronous>, transform_indices = @transform_5, window_bounds = array<i64: 1, 128>}, {pipeline_mode = #tpu.pipeline_mode<synchronous>, transform_indices = @transform_6, window_bounds = array<i64: 160, 80>}, {pipeline_mode = #tpu.pipeline_mode<synchronous>, transform_indices = @transform_7, window_bounds = array<i64: 1152, 128>}, {pipeline_mode = #tpu.pipeline_mode<synchronous>, transform_indices = @transform_8, window_bounds = array<i64: 1, 128>}, {pipeline_mode = #tpu.pipeline_mode<synchronous>, transform_indices = @transform_9, window_bounds = array<i64: 32, 24>}, {transform_indices = @transform_10, window_bounds = array<i64: 1, 8, 128>}]} {
    %cst = arith.constant 0.000000e+00 : f32
    %0 = vector.broadcast %cst : f32 to vector<288x128xf32>
    %c0 = arith.constant 0 : index
    %c0_0 = arith.constant 0 : index
    %c0_1 = arith.constant 0 : index
    %1 = vector.load %arg1[%c0, %c0_0, %c0_1] : memref<1x328x8xf32, #tpu.memory_space<vmem>>, vector<1x288x8xf32>
    %2 = vector.shape_cast %1 : vector<1x288x8xf32> to vector<288x8xf32>
    %3 = arith.truncf %2 : vector<288x8xf32> to vector<288x8xbf16>
    %c0_2 = arith.constant 0 : index
    %c0_3 = arith.constant 0 : index
    %4 = vector.load %arg2[%c0_2, %c0_3] : memref<72x128xbf16, #tpu.memory_space<vmem>>, vector<8x128xbf16>
    %cst_4 = arith.constant dense<0.000000e+00> : vector<288x128xf32>
    %5 = tpu.matmul %3, %4, %cst_4 {dimension_numbers = #tpu.dot_dimension_numbers<[1], [0], [0], [1], [0, 0, 1, 1], [], []>} : vector<288x8xbf16>, vector<8x128xbf16>, vector<288x128xf32> -> vector<288x128xf32>
    %6 = arith.addf %0, %5 : vector<288x128xf32>
    %c0_5 = arith.constant 0 : index
    %c1 = arith.constant 1 : index
    %c0_6 = arith.constant 0 : index
    %7 = vector.load %arg1[%c0_5, %c1, %c0_6] : memref<1x328x8xf32, #tpu.memory_space<vmem>>, vector<1x288x8xf32>
    %8 = vector.shape_cast %7 : vector<1x288x8xf32> to vector<288x8xf32>
    %9 = arith.truncf %8 : vector<288x8xf32> to vector<288x8xbf16>
    %c8 = arith.constant 8 : index
    %c0_7 = arith.constant 0 : index
    %10 = vector.load %arg2[%c8, %c0_7] : memref<72x128xbf16, #tpu.memory_space<vmem>>, vector<8x128xbf16>
    %cst_8 = arith.constant dense<0.000000e+00> : vector<288x128xf32>
    %11 = tpu.matmul %9, %10, %cst_8 {dimension_numbers = #tpu.dot_dimension_numbers<[1], [0], [0], [1], [0, 0, 1, 1], [], []>} : vector<288x8xbf16>, vector<8x128xbf16>, vector<288x128xf32> -> vector<288x128xf32>
    %12 = arith.addf %6, %11 : vector<288x128xf32>
    %c0_9 = arith.constant 0 : index
    %c2 = arith.constant 2 : index
    %c0_10 = arith.constant 0 : index
    %13 = vector.load %arg1[%c0_9, %c2, %c0_10] : memref<1x328x8xf32, #tpu.memory_space<vmem>>, vector<1x288x8xf32>
    %14 = vector.shape_cast %13 : vector<1x288x8xf32> to vector<288x8xf32>
    %15 = arith.truncf %14 : vector<288x8xf32> to vector<288x8xbf16>
    %c16 = arith.constant 16 : index
    %c0_11 = arith.constant 0 : index
    %16 = vector.load %arg2[%c16, %c0_11] : memref<72x128xbf16, #tpu.memory_space<vmem>>, vector<8x128xbf16>
    %cst_12 = arith.constant dense<0.000000e+00> : vector<288x128xf32>
    %17 = tpu.matmul %15, %16, %cst_12 {dimension_numbers = #tpu.dot_dimension_numbers<[1], [0], [0], [1], [0, 0, 1, 1], [], []>} : vector<288x8xbf16>, vector<8x128xbf16>, vector<288x128xf32> -> vector<288x128xf32>
    %18 = arith.addf %12, %17 : vector<288x128xf32>
    %c0_13 = arith.constant 0 : index
    %c18 = arith.constant 18 : index
    %c0_14 = arith.constant 0 : index
    %19 = vector.load %arg1[%c0_13, %c18, %c0_14] : memref<1x328x8xf32, #tpu.memory_space<vmem>>, vector<1x288x8xf32>
    %20 = vector.shape_cast %19 : vector<1x288x8xf32> to vector<288x8xf32>
    %21 = arith.truncf %20 : vector<288x8xf32> to vector<288x8xbf16>
    %c24 = arith.constant 24 : index
    %c0_15 = arith.constant 0 : index
    %22 = vector.load %arg2[%c24, %c0_15] : memref<72x128xbf16, #tpu.memory_space<vmem>>, vector<8x128xbf16>
    %cst_16 = arith.constant dense<0.000000e+00> : vector<288x128xf32>
    %23 = tpu.matmul %21, %22, %cst_16 {dimension_numbers = #tpu.dot_dimension_numbers<[1], [0], [0], [1], [0, 0, 1, 1], [], []>} : vector<288x8xbf16>, vector<8x128xbf16>, vector<288x128xf32> -> vector<288x128xf32>
    %24 = arith.addf %18, %23 : vector<288x128xf32>
    %c0_17 = arith.constant 0 : index
    %c19 = arith.constant 19 : index
    %c0_18 = arith.constant 0 : index
    %25 = vector.load %arg1[%c0_17, %c19, %c0_18] : memref<1x328x8xf32, #tpu.memory_space<vmem>>, vector<1x288x8xf32>
    %26 = vector.shape_cast %25 : vector<1x288x8xf32> to vector<288x8xf32>
    %27 = arith.truncf %26 : vector<288x8xf32> to vector<288x8xbf16>
    %c32 = arith.constant 32 : index
    %c0_19 = arith.constant 0 : index
    %28 = vector.load %arg2[%c32, %c0_19] : memref<72x128xbf16, #tpu.memory_space<vmem>>, vector<8x128xbf16>
    %cst_20 = arith.constant dense<0.000000e+00> : vector<288x128xf32>
    %29 = tpu.matmul %27, %28, %cst_20 {dimension_numbers = #tpu.dot_dimension_numbers<[1], [0], [0], [1], [0, 0, 1, 1], [], []>} : vector<288x8xbf16>, vector<8x128xbf16>, vector<288x128xf32> -> vector<288x128xf32>
    %30 = arith.addf %24, %29 : vector<288x128xf32>
    %c0_21 = arith.constant 0 : index
    %c20 = arith.constant 20 : index
    %c0_22 = arith.constant 0 : index
    %31 = vector.load %arg1[%c0_21, %c20, %c0_22] : memref<1x328x8xf32, #tpu.memory_space<vmem>>, vector<1x288x8xf32>
    %32 = vector.shape_cast %31 : vector<1x288x8xf32> to vector<288x8xf32>
    %33 = arith.truncf %32 : vector<288x8xf32> to vector<288x8xbf16>
    %c40 = arith.constant 40 : index
    %c0_23 = arith.constant 0 : index
    %34 = vector.load %arg2[%c40, %c0_23] : memref<72x128xbf16, #tpu.memory_space<vmem>>, vector<8x128xbf16>
    %cst_24 = arith.constant dense<0.000000e+00> : vector<288x128xf32>
    %35 = tpu.matmul %33, %34, %cst_24 {dimension_numbers = #tpu.dot_dimension_numbers<[1], [0], [0], [1], [0, 0, 1, 1], [], []>} : vector<288x8xbf16>, vector<8x128xbf16>, vector<288x128xf32> -> vector<288x128xf32>
    %36 = arith.addf %30, %35 : vector<288x128xf32>
    %c0_25 = arith.constant 0 : index
    %c36 = arith.constant 36 : index
    %c0_26 = arith.constant 0 : index
    %37 = vector.load %arg1[%c0_25, %c36, %c0_26] : memref<1x328x8xf32, #tpu.memory_space<vmem>>, vector<1x288x8xf32>
    %38 = vector.shape_cast %37 : vector<1x288x8xf32> to vector<288x8xf32>
    %39 = arith.truncf %38 : vector<288x8xf32> to vector<288x8xbf16>
    %c48 = arith.constant 48 : index
    %c0_27 = arith.constant 0 : index
    %40 = vector.load %arg2[%c48, %c0_27] : memref<72x128xbf16, #tpu.memory_space<vmem>>, vector<8x128xbf16>
    %cst_28 = arith.constant dense<0.000000e+00> : vector<288x128xf32>
    %41 = tpu.matmul %39, %40, %cst_28 {dimension_numbers = #tpu.dot_dimension_numbers<[1], [0], [0], [1], [0, 0, 1, 1], [], []>} : vector<288x8xbf16>, vector<8x128xbf16>, vector<288x128xf32> -> vector<288x128xf32>
    %42 = arith.addf %36, %41 : vector<288x128xf32>
    %c0_29 = arith.constant 0 : index
    %c37 = arith.constant 37 : index
    %c0_30 = arith.constant 0 : index
    %43 = vector.load %arg1[%c0_29, %c37, %c0_30] : memref<1x328x8xf32, #tpu.memory_space<vmem>>, vector<1x288x8xf32>
    %44 = vector.shape_cast %43 : vector<1x288x8xf32> to vector<288x8xf32>
    %45 = arith.truncf %44 : vector<288x8xf32> to vector<288x8xbf16>
    %c56 = arith.constant 56 : index
    %c0_31 = arith.constant 0 : index
    %46 = vector.load %arg2[%c56, %c0_31] : memref<72x128xbf16, #tpu.memory_space<vmem>>, vector<8x128xbf16>
    %cst_32 = arith.constant dense<0.000000e+00> : vector<288x128xf32>
    %47 = tpu.matmul %45, %46, %cst_32 {dimension_numbers = #tpu.dot_dimension_numbers<[1], [0], [0], [1], [0, 0, 1, 1], [], []>} : vector<288x8xbf16>, vector<8x128xbf16>, vector<288x128xf32> -> vector<288x128xf32>
    %48 = arith.addf %42, %47 : vector<288x128xf32>
    %c0_33 = arith.constant 0 : index
    %c38 = arith.constant 38 : index
    %c0_34 = arith.constant 0 : index
    %49 = vector.load %arg1[%c0_33, %c38, %c0_34] : memref<1x328x8xf32, #tpu.memory_space<vmem>>, vector<1x288x8xf32>
    %50 = vector.shape_cast %49 : vector<1x288x8xf32> to vector<288x8xf32>
    %51 = arith.truncf %50 : vector<288x8xf32> to vector<288x8xbf16>
    %c64 = arith.constant 64 : index
    %c0_35 = arith.constant 0 : index
    %52 = vector.load %arg2[%c64, %c0_35] : memref<72x128xbf16, #tpu.memory_space<vmem>>, vector<8x128xbf16>
    %cst_36 = arith.constant dense<0.000000e+00> : vector<288x128xf32>
    %53 = tpu.matmul %51, %52, %cst_36 {dimension_numbers = #tpu.dot_dimension_numbers<[1], [0], [0], [1], [0, 0, 1, 1], [], []>} : vector<288x8xbf16>, vector<8x128xbf16>, vector<288x128xf32> -> vector<288x128xf32>
    %54 = arith.addf %48, %53 : vector<288x128xf32>
    %c0_37 = arith.constant 0 : index
    %c0_38 = arith.constant 0 : index
    %55 = vector.load %arg3[%c0_37, %c0_38] : memref<1x128xf32, #tpu.memory_space<vmem>>, vector<1x128xf32>
    %56 = vector.broadcast %55 : vector<1x128xf32> to vector<288x128xf32>
    %57 = arith.addf %54, %56 : vector<288x128xf32>
    %cst_39 = arith.constant 0.000000e+00 : f32
    %58 = vector.broadcast %cst_39 : f32 to vector<288x128xf32>
    %59 = arith.maximumf %57, %58 : vector<288x128xf32>
    %60 = arith.truncf %59 : vector<288x128xf32> to vector<288x128xbf16>
    %c0_40 = arith.constant 0 : index
    %c0_41 = arith.constant 0 : index
    %61 = vector.load %arg4[%c0_40, %c0_41] : memref<416x288xbf16, #tpu.memory_space<vmem>>, vector<416x288xbf16>
    %cst_42 = arith.constant dense<0.000000e+00> : vector<416x128xf32>
    %62 = tpu.matmul %61, %60, %cst_42 {dimension_numbers = #tpu.dot_dimension_numbers<[1], [0], [0], [1], [0, 0, 1, 1], [], []>} : vector<416x288xbf16>, vector<288x128xbf16>, vector<416x128xf32> -> vector<416x128xf32>
    %63 = vector.shape_cast %62 : vector<416x128xf32> to vector<4x104x128xf32>
    %cst_43 = arith.constant dense<0xFF800000> : vector<104x128xf32>
    %64 = vector.multi_reduction <maximumf>, %63, %cst_43 [0] : vector<4x104x128xf32> to vector<104x128xf32>
    %c0_44 = arith.constant 0 : index
    %c0_45 = arith.constant 0 : index
    %65 = vector.load %arg12[%c0_44, %c0_45] : memref<104x128xf32, #tpu.memory_space<vmem>>, vector<104x128xf32>
    tpu.vector_store %arg12[%c0_44, %c0_45], %64 {strides = array<i32>} : memref<104x128xf32, #tpu.memory_space<vmem>>, vector<104x128xf32>,
    %cst_46 = arith.constant 0.000000e+00 : f32
    %66 = vector.broadcast %cst_46 : f32 to vector<80x128xf32>
    %c0_47 = arith.constant 0 : index
    %c0_48 = arith.constant 0 : index
    %67 = vector.load %arg12[%c0_47, %c0_48] : memref<104x128xf32, #tpu.memory_space<vmem>>, vector<80x128xf32>
    %68 = arith.truncf %67 : vector<80x128xf32> to vector<80x128xbf16>
    %c0_49 = arith.constant 0 : index
    %c0_50 = arith.constant 0 : index
    %69 = vector.load %arg5[%c0_49, %c0_50] : memref<1152x128xbf16, #tpu.memory_space<vmem>>, vector<128x128xbf16>
    %cst_51 = arith.constant dense<0.000000e+00> : vector<80x128xf32>
    %70 = tpu.matmul %68, %69, %cst_51 {dimension_numbers = #tpu.dot_dimension_numbers<[1], [0], [0], [1], [0, 0, 1, 1], [], []>} : vector<80x128xbf16>, vector<128x128xbf16>, vector<80x128xf32> -> vector<80x128xf32>
    %71 = arith.addf %66, %70 : vector<80x128xf32>
    %c1_52 = arith.constant 1 : index
    %c0_53 = arith.constant 0 : index
    %72 = vector.load %arg12[%c1_52, %c0_53] : memref<104x128xf32, #tpu.memory_space<vmem>>, vector<80x128xf32>
    %73 = arith.truncf %72 : vector<80x128xf32> to vector<80x128xbf16>
    %c128 = arith.constant 128 : index
    %c0_54 = arith.constant 0 : index
    %74 = vector.load %arg5[%c128, %c0_54] : memref<1152x128xbf16, #tpu.memory_space<vmem>>, vector<128x128xbf16>
    %cst_55 = arith.constant dense<0.000000e+00> : vector<80x128xf32>
    %75 = tpu.matmul %73, %74, %cst_55 {dimension_numbers = #tpu.dot_dimension_numbers<[1], [0], [0], [1], [0, 0, 1, 1], [], []>} : vector<80x128xbf16>, vector<128x128xbf16>, vector<80x128xf32> -> vector<80x128xf32>
    %76 = arith.addf %71, %75 : vector<80x128xf32>
    %c2_56 = arith.constant 2 : index
    %c0_57 = arith.constant 0 : index
    %77 = vector.load %arg12[%c2_56, %c0_57] : memref<104x128xf32, #tpu.memory_space<vmem>>, vector<80x128xf32>
    %78 = arith.truncf %77 : vector<80x128xf32> to vector<80x128xbf16>
    %c256 = arith.constant 256 : index
    %c0_58 = arith.constant 0 : index
    %79 = vector.load %arg5[%c256, %c0_58] : memref<1152x128xbf16, #tpu.memory_space<vmem>>, vector<128x128xbf16>
    %cst_59 = arith.constant dense<0.000000e+00> : vector<80x128xf32>
    %80 = tpu.matmul %78, %79, %cst_59 {dimension_numbers = #tpu.dot_dimension_numbers<[1], [0], [0], [1], [0, 0, 1, 1], [], []>} : vector<80x128xbf16>, vector<128x128xbf16>, vector<80x128xf32> -> vector<80x128xf32>
    %81 = arith.addf %76, %80 : vector<80x128xf32>
    %c10 = arith.constant 10 : index
    %c0_60 = arith.constant 0 : index
    %82 = vector.load %arg12[%c10, %c0_60] : memref<104x128xf32, #tpu.memory_space<vmem>>, vector<80x128xf32>
    %83 = arith.truncf %82 : vector<80x128xf32> to vector<80x128xbf16>
    %c384 = arith.constant 384 : index
    %c0_61 = arith.constant 0 : index
    %84 = vector.load %arg5[%c384, %c0_61] : memref<1152x128xbf16, #tpu.memory_space<vmem>>, vector<128x128xbf16>
    %cst_62 = arith.constant dense<0.000000e+00> : vector<80x128xf32>
    %85 = tpu.matmul %83, %84, %cst_62 {dimension_numbers = #tpu.dot_dimension_numbers<[1], [0], [0], [1], [0, 0, 1, 1], [], []>} : vector<80x128xbf16>, vector<128x128xbf16>, vector<80x128xf32> -> vector<80x128xf32>
    %86 = arith.addf %81, %85 : vector<80x128xf32>
    %c11 = arith.constant 11 : index
    %c0_63 = arith.constant 0 : index
    %87 = vector.load %arg12[%c11, %c0_63] : memref<104x128xf32, #tpu.memory_space<vmem>>, vector<80x128xf32>
    %88 = arith.truncf %87 : vector<80x128xf32> to vector<80x128xbf16>
    %c512 = arith.constant 512 : index
    %c0_64 = arith.constant 0 : index
    %89 = vector.load %arg5[%c512, %c0_64] : memref<1152x128xbf16, #tpu.memory_space<vmem>>, vector<128x128xbf16>
    %cst_65 = arith.constant dense<0.000000e+00> : vector<80x128xf32>
    %90 = tpu.matmul %88, %89, %cst_65 {dimension_numbers = #tpu.dot_dimension_numbers<[1], [0], [0], [1], [0, 0, 1, 1], [], []>} : vector<80x128xbf16>, vector<128x128xbf16>, vector<80x128xf32> -> vector<80x128xf32>
    %91 = arith.addf %86, %90 : vector<80x128xf32>
    %c12 = arith.constant 12 : index
    %c0_66 = arith.constant 0 : index
    %92 = vector.load %arg12[%c12, %c0_66] : memref<104x128xf32, #tpu.memory_space<vmem>>, vector<80x128xf32>
    %93 = arith.truncf %92 : vector<80x128xf32> to vector<80x128xbf16>
    %c640 = arith.constant 640 : index
    %c0_67 = arith.constant 0 : index
    %94 = vector.load %arg5[%c640, %c0_67] : memref<1152x128xbf16, #tpu.memory_space<vmem>>, vector<128x128xbf16>
    %cst_68 = arith.constant dense<0.000000e+00> : vector<80x128xf32>
    %95 = tpu.matmul %93, %94, %cst_68 {dimension_numbers = #tpu.dot_dimension_numbers<[1], [0], [0], [1], [0, 0, 1, 1], [], []>} : vector<80x128xbf16>, vector<128x128xbf16>, vector<80x128xf32> -> vector<80x128xf32>
    %96 = arith.addf %91, %95 : vector<80x128xf32>
    %c20_69 = arith.constant 20 : index
    %c0_70 = arith.constant 0 : index
    %97 = vector.load %arg12[%c20_69, %c0_70] : memref<104x128xf32, #tpu.memory_space<vmem>>, vector<80x128xf32>
    %98 = arith.truncf %97 : vector<80x128xf32> to vector<80x128xbf16>
    %c768 = arith.constant 768 : index
    %c0_71 = arith.constant 0 : index
    %99 = vector.load %arg5[%c768, %c0_71] : memref<1152x128xbf16, #tpu.memory_space<vmem>>, vector<128x128xbf16>
    %cst_72 = arith.constant dense<0.000000e+00> : vector<80x128xf32>
    %100 = tpu.matmul %98, %99, %cst_72 {dimension_numbers = #tpu.dot_dimension_numbers<[1], [0], [0], [1], [0, 0, 1, 1], [], []>} : vector<80x128xbf16>, vector<128x128xbf16>, vector<80x128xf32> -> vector<80x128xf32>
    %101 = arith.addf %96, %100 : vector<80x128xf32>
    %c21 = arith.constant 21 : index
    %c0_73 = arith.constant 0 : index
    %102 = vector.load %arg12[%c21, %c0_73] : memref<104x128xf32, #tpu.memory_space<vmem>>, vector<80x128xf32>
    %103 = arith.truncf %102 : vector<80x128xf32> to vector<80x128xbf16>
    %c896 = arith.constant 896 : index
    %c0_74 = arith.constant 0 : index
    %104 = vector.load %arg5[%c896, %c0_74] : memref<1152x128xbf16, #tpu.memory_space<vmem>>, vector<128x128xbf16>
    %cst_75 = arith.constant dense<0.000000e+00> : vector<80x128xf32>
    %105 = tpu.matmul %103, %104, %cst_75 {dimension_numbers = #tpu.dot_dimension_numbers<[1], [0], [0], [1], [0, 0, 1, 1], [], []>} : vector<80x128xbf16>, vector<128x128xbf16>, vector<80x128xf32> -> vector<80x128xf32>
    %106 = arith.addf %101, %105 : vector<80x128xf32>
    %c22 = arith.constant 22 : index
    %c0_76 = arith.constant 0 : index
    %107 = vector.load %arg12[%c22, %c0_76] : memref<104x128xf32, #tpu.memory_space<vmem>>, vector<80x128xf32>
    %108 = arith.truncf %107 : vector<80x128xf32> to vector<80x128xbf16>
    %c1024 = arith.constant 1024 : index
    %c0_77 = arith.constant 0 : index
    %109 = vector.load %arg5[%c1024, %c0_77] : memref<1152x128xbf16, #tpu.memory_space<vmem>>, vector<128x128xbf16>
    %cst_78 = arith.constant dense<0.000000e+00> : vector<80x128xf32>
    %110 = tpu.matmul %108, %109, %cst_78 {dimension_numbers = #tpu.dot_dimension_numbers<[1], [0], [0], [1], [0, 0, 1, 1], [], []>} : vector<80x128xbf16>, vector<128x128xbf16>, vector<80x128xf32> -> vector<80x128xf32>
    %111 = arith.addf %106, %110 : vector<80x128xf32>
    %c0_79 = arith.constant 0 : index
    %c0_80 = arith.constant 0 : index
    %112 = vector.load %arg6[%c0_79, %c0_80] : memref<1x128xf32, #tpu.memory_space<vmem>>, vector<1x128xf32>
    %113 = vector.broadcast %112 : vector<1x128xf32> to vector<80x128xf32>
    %114 = arith.addf %111, %113 : vector<80x128xf32>
    %cst_81 = arith.constant 0.000000e+00 : f32
    %115 = vector.broadcast %cst_81 : f32 to vector<80x128xf32>
    %116 = arith.maximumf %114, %115 : vector<80x128xf32>
    %117 = arith.truncf %116 : vector<80x128xf32> to vector<80x128xbf16>
    %c0_82 = arith.constant 0 : index
    %c0_83 = arith.constant 0 : index
    %118 = vector.load %arg7[%c0_82, %c0_83] : memref<160x80xbf16, #tpu.memory_space<vmem>>, vector<160x80xbf16>
    %cst_84 = arith.constant dense<0.000000e+00> : vector<160x128xf32>
    %119 = tpu.matmul %118, %117, %cst_84 {dimension_numbers = #tpu.dot_dimension_numbers<[1], [0], [0], [1], [0, 0, 1, 1], [], []>} : vector<160x80xbf16>, vector<80x128xbf16>, vector<160x128xf32> -> vector<160x128xf32>
    %120 = vector.shape_cast %119 : vector<160x128xf32> to vector<4x40x128xf32>
    %cst_85 = arith.constant dense<0xFF800000> : vector<40x128xf32>
    %121 = vector.multi_reduction <maximumf>, %120, %cst_85 [0] : vector<4x40x128xf32> to vector<40x128xf32>
    %c0_86 = arith.constant 0 : index
    %c0_87 = arith.constant 0 : index
    %122 = vector.load %arg13[%c0_86, %c0_87] : memref<40x128xf32, #tpu.memory_space<vmem>>, vector<40x128xf32>
    tpu.vector_store %arg13[%c0_86, %c0_87], %121 {strides = array<i32>} : memref<40x128xf32, #tpu.memory_space<vmem>>, vector<40x128xf32>,
    %cst_88 = arith.constant 0.000000e+00 : f32
    %123 = vector.broadcast %cst_88 : f32 to vector<24x128xf32>
    %c0_89 = arith.constant 0 : index
    %c0_90 = arith.constant 0 : index
    %124 = vector.load %arg13[%c0_89, %c0_90] : memref<40x128xf32, #tpu.memory_space<vmem>>, vector<24x128xf32>
    %125 = arith.truncf %124 : vector<24x128xf32> to vector<24x128xbf16>
    %c0_91 = arith.constant 0 : index
    %c0_92 = arith.constant 0 : index
    %126 = vector.load %arg8[%c0_91, %c0_92] : memref<1152x128xbf16, #tpu.memory_space<vmem>>, vector<128x128xbf16>
    %cst_93 = arith.constant dense<0.000000e+00> : vector<24x128xf32>
    %127 = tpu.matmul %125, %126, %cst_93 {dimension_numbers = #tpu.dot_dimension_numbers<[1], [0], [0], [1], [0, 0, 1, 1], [], []>} : vector<24x128xbf16>, vector<128x128xbf16>, vector<24x128xf32> -> vector<24x128xf32>
    %128 = arith.addf %123, %127 : vector<24x128xf32>
    %c1_94 = arith.constant 1 : index
    %c0_95 = arith.constant 0 : index
    %129 = vector.load %arg13[%c1_94, %c0_95] : memref<40x128xf32, #tpu.memory_space<vmem>>, vector<24x128xf32>
    %130 = arith.truncf %129 : vector<24x128xf32> to vector<24x128xbf16>
    %c128_96 = arith.constant 128 : index
    %c0_97 = arith.constant 0 : index
    %131 = vector.load %arg8[%c128_96, %c0_97] : memref<1152x128xbf16, #tpu.memory_space<vmem>>, vector<128x128xbf16>
    %cst_98 = arith.constant dense<0.000000e+00> : vector<24x128xf32>
    %132 = tpu.matmul %130, %131, %cst_98 {dimension_numbers = #tpu.dot_dimension_numbers<[1], [0], [0], [1], [0, 0, 1, 1], [], []>} : vector<24x128xbf16>, vector<128x128xbf16>, vector<24x128xf32> -> vector<24x128xf32>
    %133 = arith.addf %128, %132 : vector<24x128xf32>
    %c2_99 = arith.constant 2 : index
    %c0_100 = arith.constant 0 : index
    %134 = vector.load %arg13[%c2_99, %c0_100] : memref<40x128xf32, #tpu.memory_space<vmem>>, vector<24x128xf32>
    %135 = arith.truncf %134 : vector<24x128xf32> to vector<24x128xbf16>
    %c256_101 = arith.constant 256 : index
    %c0_102 = arith.constant 0 : index
    %136 = vector.load %arg8[%c256_101, %c0_102] : memref<1152x128xbf16, #tpu.memory_space<vmem>>, vector<128x128xbf16>
    %cst_103 = arith.constant dense<0.000000e+00> : vector<24x128xf32>
    %137 = tpu.matmul %135, %136, %cst_103 {dimension_numbers = #tpu.dot_dimension_numbers<[1], [0], [0], [1], [0, 0, 1, 1], [], []>} : vector<24x128xbf16>, vector<128x128xbf16>, vector<24x128xf32> -> vector<24x128xf32>
    %138 = arith.addf %133, %137 : vector<24x128xf32>
    %c6 = arith.constant 6 : index
    %c0_104 = arith.constant 0 : index
    %139 = vector.load %arg13[%c6, %c0_104] : memref<40x128xf32, #tpu.memory_space<vmem>>, vector<24x128xf32>
    %140 = arith.truncf %139 : vector<24x128xf32> to vector<24x128xbf16>
    %c384_105 = arith.constant 384 : index
    %c0_106 = arith.constant 0 : index
    %141 = vector.load %arg8[%c384_105, %c0_106] : memref<1152x128xbf16, #tpu.memory_space<vmem>>, vector<128x128xbf16>
    %cst_107 = arith.constant dense<0.000000e+00> : vector<24x128xf32>
    %142 = tpu.matmul %140, %141, %cst_107 {dimension_numbers = #tpu.dot_dimension_numbers<[1], [0], [0], [1], [0, 0, 1, 1], [], []>} : vector<24x128xbf16>, vector<128x128xbf16>, vector<24x128xf32> -> vector<24x128xf32>
    %143 = arith.addf %138, %142 : vector<24x128xf32>
    %c7 = arith.constant 7 : index
    %c0_108 = arith.constant 0 : index
    %144 = vector.load %arg13[%c7, %c0_108] : memref<40x128xf32, #tpu.memory_space<vmem>>, vector<24x128xf32>
    %145 = arith.truncf %144 : vector<24x128xf32> to vector<24x128xbf16>
    %c512_109 = arith.constant 512 : index
    %c0_110 = arith.constant 0 : index
    %146 = vector.load %arg8[%c512_109, %c0_110] : memref<1152x128xbf16, #tpu.memory_space<vmem>>, vector<128x128xbf16>
    %cst_111 = arith.constant dense<0.000000e+00> : vector<24x128xf32>
    %147 = tpu.matmul %145, %146, %cst_111 {dimension_numbers = #tpu.dot_dimension_numbers<[1], [0], [0], [1], [0, 0, 1, 1], [], []>} : vector<24x128xbf16>, vector<128x128xbf16>, vector<24x128xf32> -> vector<24x128xf32>
    %148 = arith.addf %143, %147 : vector<24x128xf32>
    %c8_112 = arith.constant 8 : index
    %c0_113 = arith.constant 0 : index
    %149 = vector.load %arg13[%c8_112, %c0_113] : memref<40x128xf32, #tpu.memory_space<vmem>>, vector<24x128xf32>
    %150 = arith.truncf %149 : vector<24x128xf32> to vector<24x128xbf16>
    %c640_114 = arith.constant 640 : index
    %c0_115 = arith.constant 0 : index
    %151 = vector.load %arg8[%c640_114, %c0_115] : memref<1152x128xbf16, #tpu.memory_space<vmem>>, vector<128x128xbf16>
    %cst_116 = arith.constant dense<0.000000e+00> : vector<24x128xf32>
    %152 = tpu.matmul %150, %151, %cst_116 {dimension_numbers = #tpu.dot_dimension_numbers<[1], [0], [0], [1], [0, 0, 1, 1], [], []>} : vector<24x128xbf16>, vector<128x128xbf16>, vector<24x128xf32> -> vector<24x128xf32>
    %153 = arith.addf %148, %152 : vector<24x128xf32>
    %c12_117 = arith.constant 12 : index
    %c0_118 = arith.constant 0 : index
    %154 = vector.load %arg13[%c12_117, %c0_118] : memref<40x128xf32, #tpu.memory_space<vmem>>, vector<24x128xf32>
    %155 = arith.truncf %154 : vector<24x128xf32> to vector<24x128xbf16>
    %c768_119 = arith.constant 768 : index
    %c0_120 = arith.constant 0 : index
    %156 = vector.load %arg8[%c768_119, %c0_120] : memref<1152x128xbf16, #tpu.memory_space<vmem>>, vector<128x128xbf16>
    %cst_121 = arith.constant dense<0.000000e+00> : vector<24x128xf32>
    %157 = tpu.matmul %155, %156, %cst_121 {dimension_numbers = #tpu.dot_dimension_numbers<[1], [0], [0], [1], [0, 0, 1, 1], [], []>} : vector<24x128xbf16>, vector<128x128xbf16>, vector<24x128xf32> -> vector<24x128xf32>
    %158 = arith.addf %153, %157 : vector<24x128xf32>
    %c13 = arith.constant 13 : index
    %c0_122 = arith.constant 0 : index
    %159 = vector.load %arg13[%c13, %c0_122] : memref<40x128xf32, #tpu.memory_space<vmem>>, vector<24x128xf32>
    %160 = arith.truncf %159 : vector<24x128xf32> to vector<24x128xbf16>
    %c896_123 = arith.constant 896 : index
    %c0_124 = arith.constant 0 : index
    %161 = vector.load %arg8[%c896_123, %c0_124] : memref<1152x128xbf16, #tpu.memory_space<vmem>>, vector<128x128xbf16>
    %cst_125 = arith.constant dense<0.000000e+00> : vector<24x128xf32>
    %162 = tpu.matmul %160, %161, %cst_125 {dimension_numbers = #tpu.dot_dimension_numbers<[1], [0], [0], [1], [0, 0, 1, 1], [], []>} : vector<24x128xbf16>, vector<128x128xbf16>, vector<24x128xf32> -> vector<24x128xf32>
    %163 = arith.addf %158, %162 : vector<24x128xf32>
    %c14 = arith.constant 14 : index
    %c0_126 = arith.constant 0 : index
    %164 = vector.load %arg13[%c14, %c0_126] : memref<40x128xf32, #tpu.memory_space<vmem>>, vector<24x128xf32>
    %165 = arith.truncf %164 : vector<24x128xf32> to vector<24x128xbf16>
    %c1024_127 = arith.constant 1024 : index
    %c0_128 = arith.constant 0 : index
    %166 = vector.load %arg8[%c1024_127, %c0_128] : memref<1152x128xbf16, #tpu.memory_space<vmem>>, vector<128x128xbf16>
    %cst_129 = arith.constant dense<0.000000e+00> : vector<24x128xf32>
    %167 = tpu.matmul %165, %166, %cst_129 {dimension_numbers = #tpu.dot_dimension_numbers<[1], [0], [0], [1], [0, 0, 1, 1], [], []>} : vector<24x128xbf16>, vector<128x128xbf16>, vector<24x128xf32> -> vector<24x128xf32>
    %168 = arith.addf %163, %167 : vector<24x128xf32>
    %c0_130 = arith.constant 0 : index
    %c0_131 = arith.constant 0 : index
    %169 = vector.load %arg9[%c0_130, %c0_131] : memref<1x128xf32, #tpu.memory_space<vmem>>, vector<1x128xf32>
    %170 = vector.broadcast %169 : vector<1x128xf32> to vector<24x128xf32>
    %171 = arith.addf %168, %170 : vector<24x128xf32>
    %cst_132 = arith.constant 0.000000e+00 : f32
    %172 = vector.broadcast %cst_132 : f32 to vector<24x128xf32>
    %173 = arith.maximumf %171, %172 : vector<24x128xf32>
    %174 = arith.truncf %173 : vector<24x128xf32> to vector<24x128xbf16>
    %c0_133 = arith.constant 0 : index
    %c0_134 = arith.constant 0 : index
    %175 = vector.load %arg10[%c0_133, %c0_134] : memref<32x24xbf16, #tpu.memory_space<vmem>>, vector<32x24xbf16>
    %cst_135 = arith.constant dense<0.000000e+00> : vector<32x128xf32>
    %176 = tpu.matmul %175, %174, %cst_135 {dimension_numbers = #tpu.dot_dimension_numbers<[1], [0], [0], [1], [0, 0, 1, 1], [], []>} : vector<32x24xbf16>, vector<24x128xbf16>, vector<32x128xf32> -> vector<32x128xf32>
    %177 = vector.shape_cast %176 : vector<32x128xf32> to vector<4x8x128xf32>
    %cst_136 = arith.constant dense<0xFF800000> : vector<8x128xf32>
    %178 = vector.multi_reduction <maximumf>, %177, %cst_136 [0] : vector<4x8x128xf32> to vector<8x128xf32>
    %c0_137 = arith.constant 0 : index
    %c0_138 = arith.constant 0 : index
    %c0_139 = arith.constant 0 : index
    %179 = vector.load %arg11[%c0_137, %c0_138, %c0_139] : memref<1x8x128xf32, #tpu.memory_space<vmem>>, vector<1x8x128xf32>
    %180 = vector.shape_cast %179 : vector<1x8x128xf32> to vector<8x128xf32>
    %181 = vector.shape_cast %178 : vector<8x128xf32> to vector<1x8x128xf32>
    tpu.vector_store %arg11[%c0_137, %c0_138, %c0_139], %181 {strides = array<i32>} : memref<1x8x128xf32, #tpu.memory_space<vmem>>, vector<1x8x128xf32>,
    return
  }
  func.func @transform_0(%arg0: i32) -> (i32, i32, i32) {
    %c0_i32 = arith.constant 0 : i32
    %c0_i32_0 = arith.constant 0 : i32
    %c0_i32_1 = arith.constant 0 : i32
    return %arg0, %c0_i32, %c0_i32_0 : i32, i32, i32
  }
  func.func @transform_1(%arg0: i32) -> (i32, i32) {
    %c0_i32 = arith.constant 0 : i32
    %c0_i32_0 = arith.constant 0 : i32
    %c0_i32_1 = arith.constant 0 : i32
    return %c0_i32, %c0_i32_0 : i32, i32
  }
  func.func @transform_2(%arg0: i32) -> (i32, i32) {
    %c0_i32 = arith.constant 0 : i32
    %c0_i32_0 = arith.constant 0 : i32
    %c0_i32_1 = arith.constant 0 : i32
    return %c0_i32, %c0_i32_0 : i32, i32
  }
  func.func @transform_3(%arg0: i32) -> (i32, i32) {
    %c0_i32 = arith.constant 0 : i32
    %c0_i32_0 = arith.constant 0 : i32
    %c0_i32_1 = arith.constant 0 : i32
    return %c0_i32, %c0_i32_0 : i32, i32
  }
  func.func @transform_4(%arg0: i32) -> (i32, i32) {
    %c0_i32 = arith.constant 0 : i32
    %c0_i32_0 = arith.constant 0 : i32
    %c0_i32_1 = arith.constant 0 : i32
    return %c0_i32, %c0_i32_0 : i32, i32
  }
  func.func @transform_5(%arg0: i32) -> (i32, i32) {
    %c0_i32 = arith.constant 0 : i32
    %c0_i32_0 = arith.constant 0 : i32
    %c0_i32_1 = arith.constant 0 : i32
    return %c0_i32, %c0_i32_0 : i32, i32
  }
  func.func @transform_6(%arg0: i32) -> (i32, i32) {
    %c0_i32 = arith.constant 0 : i32
    %c0_i32_0 = arith.constant 0 : i32
    %c0_i32_1 = arith.constant 0 : i32
    return %c0_i32, %c0_i32_0 : i32, i32
  }
  func.func @transform_7(%arg0: i32) -> (i32, i32) {
    %c0_i32 = arith.constant 0 : i32
    %c0_i32_0 = arith.constant 0 : i32
    %c0_i32_1 = arith.constant 0 : i32
    return %c0_i32, %c0_i32_0 : i32, i32
  }
  func.func @transform_8(%arg0: i32) -> (i32, i32) {
    %c0_i32 = arith.constant 0 : i32
    %c0_i32_0 = arith.constant 0 : i32
    %c0_i32_1 = arith.constant 0 : i32
    return %c0_i32, %c0_i32_0 : i32, i32
  }
  func.func @transform_9(%arg0: i32) -> (i32, i32) {
    %c0_i32 = arith.constant 0 : i32
    %c0_i32_0 = arith.constant 0 : i32
    %c0_i32_1 = arith.constant 0 : i32
    return %c0_i32, %c0_i32_0 : i32, i32
  }
  func.func @transform_10(%arg0: i32) -> (i32, i32, i32) {
    %c0_i32 = arith.constant 0 : i32
    %c0_i32_0 = arith.constant 0 : i32
    %c0_i32_1 = arith.constant 0 : i32
    return %arg0, %c0_i32, %c0_i32_0 : i32, i32, i32
  }
}

</mosaic_0001>

<bundles_post_ra>
// kernel: convolution_forward.1
= control target key start
LH: loop header
LB: loop body
LE: loop exit
PB: predicated region body
PF: predicated region fallthrough
CT: control target
= control target key end

     0   :  { %s9500_s13 = smov 0   ;;  %s11925_s0 = inlined_call_operand.vmem [shape: f32[2,328,8], index: 0, kind: input, shape index: {}]   ;;  %s11926_s1 = inlined_call_operand.vmem [shape: bf16[72,128], index: 1, kind: input, shape index: {}]   ;;  %s11927_s2 = inlined_call_operand.vmem [shape: f32[1,128], index: 2, kind: input, shape index: {}]   ;;  %s11928_s3 = inlined_call_operand.vmem [shape: bf16[416,288], index: 3, kind: input, shape index: {}]   ;;  %s11929_s4 = inlined_call_operand.vmem [shape: bf16[1152,128], index: 4, kind: input, shape index: {}]   ;;  %s11930_s5 = inlined_call_operand.vmem [shape: f32[1,128], index: 5, kind: input, shape index: {}]   ;;  %s11931_s6 = inlined_call_operand.vmem [shape: bf16[160,80], index: 6, kind: input, shape index: {}]   ;;  %s11932_s7 = inlined_call_operand.vmem [shape: bf16[1152,128], index: 7, kind: input, shape index: {}]   ;;  %s11933_s8 = inlined_call_operand.vmem [shape: f32[1,128], index: 8, kind: input, shape index: {}]   ;;  %s11934_s9 = inlined_call_operand.vmem [shape: bf16[32,24], index: 9, kind: input, shape index: {}]   ;;  %s11935_s10 = inlined_call_operand.vmem [shape: f32[2,8,128], index: 10, kind: output, shape index: {}]  }
   0x1 LB: > { %s7341_s14 = sadd.s32 4294967295, %s9440_s13   ;;  %p7345_p0 = scmp.ge.s32.totalorder %s9440_s13, 1  ;;  %s9440_s13 = sphi %s9500_s13, %s20_s13  }
   0x2   : > { %p312_p1 = scmp.lt.s32.totalorder %s9440_s13, 3 }
   0x4   : > { %p313_p2 = pnand %p7345_p0, %p312_p1 }
   0x6   : > { %316 = sbr.rel (%p313_p2) target bundleno = 2179 (0x883), region = 60 }
   0xb   : > { %v468_v0 = vld [vmem:[%s11926_s1 + $0x4] sm:$0xf]  ;;  %vm524_vm0 = vcmask 1043456   ;;  %v413_v1 = vld [vmem:[%s11926_s1] sm:$0xf]  ;;  %p349_p3 = scmp.lt.s32.totalorder %s7341_s14, 1 }
   0xc   : > { %9152 = vmatprep.subr.msk.bf16.mxu0 %vm524_vm0, %v468_v0  ;;  %9153 = vmatprep.subr.msk.bf16.mxu1 %vm524_vm0, %v413_v1  ;;  %v526_v2 = vsel %vm524_vm0, %v468_v0, 0  ;;  %v760_v3 = vsel %vm524_vm0, %v413_v1, 0  ;;  %v993_v4 = vld [vmem:[%s11926_s1 + $0x8] sm:$0xf]  ;;  %v1318_v5 = vld [vmem:[%s11926_s1 + $0xc] sm:$0xf] }
   0xd   : > { %8213 = vmatpush3.bf16.msra.mxu0 %v526_v2  ;;  %8251 = vmatpush3.bf16.msra.mxu1 %v760_v3  ;;  %s12047_s14 = smov (!%p349_p3, %s7341_s14), 1  ;;  %vm469_vm1 = vcmask 64512   ;;  %v1049_v18 = vsel %vm524_vm0, %v993_v4, 0  ;;  %v1374_v25 = vsel %vm524_vm0, %v1318_v5, 0  ;;  %v9554_v26 = vld [vmem:[%s11926_s1 + $0x10] sm:$0xf] }
   0xe   : > { %9154 = vmatprep.subr.msk.bf16.mxu0 %vm524_vm0, %v993_v4  ;;  %9155 = vmatprep.subr.msk.bf16.mxu1 %vm524_vm0, %v1318_v5  ;;  %s9162_s23 = smul.u32 328, %s12047_s14  ;;  %vm3805_vm2 = vcmask 261120   ;;  %vm9444_vm3 = vmmov 0   ;;  %vm5958_vm4 = vcmask 654336   ;;  %vm7225_vm5 = vcmask 195584   ;;  %s7347_s25 = sshll.u32 %s12047_s14, 3 }
   0xf   : > { %s357_s28 = scalar_lea.vmem %s11935_s10, %s7347_s25 }
  0x10   : > { %s9532_s26 = scalar_lea.vmem %s11925_s0, %s9162_s23 }
  0x11   : > { %v414_v6 = vld [vmem:[%s9532_s26 + $0x1] sm:$0xff]  ;;  %v415_v7 = vld [vmem:[%s9532_s26 + $0x9] sm:$0xff]  ;;  %v416_v11 = vld [vmem:[%s9532_s26 + $0x11] sm:$0xff] }
  0x12   : > { %v359_v8 = vld [vmem:[%s9532_s26] sm:$0xff]  ;;  %v450_v9 = vpack.c.bf16 %v415_v7, %v414_v6  ;;  %v360_v10 = vld [vmem:[%s9532_s26 + $0x8] sm:$0xff]  ;;  %v361_v15 = vld [vmem:[%s9532_s26 + $0x10] sm:$0xff] }
  0x13   : > { %v417_v12 = vld [vmem:[%s9532_s26 + $0x19] sm:$0xff]  ;;  %v395_v13 = vpack.c.bf16 %v360_v10, %v359_v8  ;;  %v418_v17 = vld [vmem:[%s9532_s26 + $0x21] sm:$0xff]  ;;  %v419_v20 = vld [vmem:[%s9532_s26 + $0x29] sm:$0xff] }
  0x14   : > { %v451_v14 = vpack.c.bf16 %v417_v12, %v416_v11  ;;  %v362_v16 = vld [vmem:[%s9532_s26 + $0x18] sm:$0xff]  ;;  %8214 = vmatprep.mubr.msk.bf16.mxu0 %vm469_vm1, %v450_v9  ;;  %v363_v21 = vld [vmem:[%s9532_s26 + $0x20] sm:$0xff]  ;;  %v364_v22 = vld [vmem:[%s9532_s26 + $0x28] sm:$0xff]  ;;  %v452_v23 = vpack.c.bf16 %v419_v20, %v418_v17 }
  0x15   : > { %v396_v19 = vpack.c.bf16 %v362_v16, %v361_v15  ;;  %8252 = vmatprep.mubr.msk.bf16.mxu1 %vm469_vm1, %v395_v13  ;;  %v397_v24 = vpack.c.bf16 %v364_v22, %v363_v21  ;;  %v420_v27 = vld [vmem:[%s9532_s26 + $0x31] sm:$0xff]  ;;  %v421_v28 = vld [vmem:[%s9532_s26 + $0x39] sm:$0xff]  ;;  %v422_v31 = vld [vmem:[%s9532_s26 + $0x41] sm:$0xff] }
  0x16   : > { %8215 = vmatmul.mubr.msk.bf16.vlgmr.msra.gmra.mxu0 %vm469_vm1, %v451_v14  ;;  %v365_v29 = vld [vmem:[%s9532_s26 + $0x30] sm:$0xff]  ;;  %v366_v30 = vld [vmem:[%s9532_s26 + $0x38] sm:$0xff]  ;;  %v367_v33 = vld [vmem:[%s9532_s26 + $0x40] sm:$0xff]  ;;  %v453_v35 = vpack.c.bf16 %v421_v28, %v420_v27 }
  0x17   : > { %8253 = vmatmul.mubr.msk.bf16.vlgmr.msra.gmra.mxu1 %vm469_vm1, %v396_v19  ;;  %8289 = vmatpush3.bf16.msra.mxu0 %v1049_v18  ;;  %v423_v32 = vld [vmem:[%s9532_s26 + $0x49] sm:$0xff]  ;;  %v398_v36 = vpack.c.bf16 %v366_v30, %v365_v29  ;;  %v424_v39 = vld [vmem:[%s9532_s26 + $0x51] sm:$0xff]  ;;  %v425_v40 = vld [vmem:[%s9532_s26 + $0x59] sm:$0xff] }
  0x18   : > { %8218 = vmatprep.mubr.msk.bf16.mxu0 %vm469_vm1, %v452_v23  ;;  %8256 = vmatprep.mubr.msk.bf16.mxu1 %vm469_vm1, %v397_v24  ;;  %v368_v34 = vld [vmem:[%s9532_s26 + $0x48] sm:$0xff]  ;;  %v454_v37 = vpack.c.bf16 %v423_v32, %v422_v31  ;;  %v369_v41 = vld [vmem:[%s9532_s26 + $0x50] sm:$0xff]  ;;  %v370_v42 = vld [vmem:[%s9532_s26 + $0x58] sm:$0xff]  ;;  %v455_v47 = vpack.c.bf16 %v425_v40, %v424_v39 }
  0x19   : > { %8327 = vmatpush3.bf16.msra.mxu1 %v1374_v25  ;;  %9156 = vmatprep.subr.msk.bf16.mxu0 %vm524_vm0, %v9554_v26  ;;  %v399_v38 = vpack.c.bf16 %v368_v34, %v367_v33  ;;  %v426_v43 = vld [vmem:[%s9532_s26 + $0x61] sm:$0xff]  ;;  %v427_v44 = vld [vmem:[%s9532_s26 + $0x69] sm:$0xff]  ;;  %v400_v48 = vpack.c.bf16 %v370_v42, %v369_v41  ;;  %v428_v51 = vld [vmem:[%s9532_s26 + $0x71] sm:$0xff] }
  0x1a   : > { %v371_v45 = vld [vmem:[%s9532_s26 + $0x60] sm:$0xff]  ;;  %v372_v46 = vld [vmem:[%s9532_s26 + $0x68] sm:$0xff]  ;;  %v456_v49 = vpack.c.bf16 %v427_v44, %v426_v43  ;;  %v373_v53 = vld [vmem:[%s9532_s26 + $0x70] sm:$0xff] }
  0x1b   : > { %v401_v50 = vpack.c.bf16 %v372_v46, %v371_v45  ;;  %v429_v52 = vld [vmem:[%s9532_s26 + $0x79] sm:$0xff]  ;;  %v430_v55 = vld [vmem:[%s9532_s26 + $0x81] sm:$0xff]  ;;  %v431_v56 = vld [vmem:[%s9532_s26 + $0x89] sm:$0xff] }
  0x1c   : > { %v374_v54 = vld [vmem:[%s9532_s26 + $0x78] sm:$0xff]  ;;  %v375_v57 = vld [vmem:[%s9532_s26 + $0x80] sm:$0xff]  ;;  %v376_v58 = vld [vmem:[%s9532_s26 + $0x88] sm:$0xff]  ;;  %v457_v59 = vpack.c.bf16 %v429_v52, %v428_v51  ;;  %v458_v61 = vpack.c.bf16 %v431_v56, %v430_v55 }
  0x1d   : > { %v402_v60 = vpack.c.bf16 %v374_v54, %v373_v53  ;;  %v403_v62 = vpack.c.bf16 %v376_v58, %v375_v57  ;;  %v432_v63 = vld [vmem:[%s9532_s26 + $0x91] sm:$0xff]  ;;  %v433_v0 = vld [vmem:[%s9532_s26 + $0x99] sm:$0xff]  ;;  %v434_v3 = vld [vmem:[%s9532_s26 + $0xa1] sm:$0xff] }
  0x1e   : > { %8219 = vmatmul.mubr.msk.bf16.gmra.mxu0 %vm469_vm1, %v453_v35  ;;  %v377_v1 = vld [vmem:[%s9532_s26 + $0x90] sm:$0xff]  ;;  %v378_v2 = vld [vmem:[%s9532_s26 + $0x98] sm:$0xff]  ;;  %v379_v5 = vld [vmem:[%s9532_s26 + $0xa0] sm:$0xff]  ;;  %v459_v7 = vpack.c.bf16 %v433_v0, %v432_v63 }
  0x1f   : > { %8257 = vmatmul.mubr.msk.bf16.gmra.mxu1 %vm469_vm1, %v398_v36  ;;  %8222 = vmatprep.mubr.msk.bf16.mxu0 %vm469_vm1, %v454_v37  ;;  %v435_v4 = vld [vmem:[%s9532_s26 + $0xa9] sm:$0xff]  ;;  %v404_v8 = vpack.c.bf16 %v378_v2, %v377_v1  ;;  %v9609_v11 = vld [vmem:[%s11926_s1 + $0x14] sm:$0xf]  ;;  %v437_v13 = vld [vmem:[%s9532_s26 + $0xb9] sm:$0xff] }
  0x20   : > { %8260 = vmatprep.mubr.msk.bf16.mxu1 %vm469_vm1, %v399_v38  ;;  %v380_v6 = vld [vmem:[%s9532_s26 + $0xa8] sm:$0xff]  ;;  %v460_v9 = vpack.c.bf16 %v435_v4, %v434_v3  ;;  %v436_v12 = vld [vmem:[%s9532_s26 + $0xb1] sm:$0xff]  ;;  %9157 = vmatprep.subr.msk.bf16.mxu1 %vm524_vm0, %v9609_v11  ;;  %v383_v18 = vld [vmem:[%s9532_s26 + $0xc0] sm:$0xff]  ;;  %v1699_v3 = vsel %vm524_vm0, %v9554_v26, 0 }
  0x21   : > { %v405_v10 = vpack.c.bf16 %v380_v6, %v379_v5  ;;  %v381_v14 = vld [vmem:[%s9532_s26 + $0xb0] sm:$0xff]  ;;  %v382_v15 = vld [vmem:[%s9532_s26 + $0xb8] sm:$0xff]  ;;  %v438_v16 = vld [vmem:[%s9532_s26 + $0xc1] sm:$0xff]  ;;  %v461_v20 = vpack.c.bf16 %v437_v13, %v436_v12  ;;  %v2024_v6 = vsel %vm524_vm0, %v9609_v11, 0 }
  0x22   : > { %v439_v17 = vld [vmem:[%s9532_s26 + $0xc9] sm:$0xff]  ;;  %v406_v21 = vpack.c.bf16 %v382_v15, %v381_v14  ;;  %v440_v24 = vld [vmem:[%s9532_s26 + $0xd1] sm:$0xff]  ;;  %v441_v25 = vld [vmem:[%s9532_s26 + $0xd9] sm:$0xff] }
  0x23   : > { %v384_v19 = vld [vmem:[%s9532_s26 + $0xc8] sm:$0xff]  ;;  %v462_v22 = vpack.c.bf16 %v439_v17, %v438_v16  ;;  %v385_v27 = vld [vmem:[%s9532_s26 + $0xd0] sm:$0xff]  ;;  %v386_v28 = vld [vmem:[%s9532_s26 + $0xd8] sm:$0xff]  ;;  %v463_v33 = vpack.c.bf16 %v441_v25, %v440_v24 }
  0x24   : > { %v407_v23 = vpack.c.bf16 %v384_v19, %v383_v18  ;;  %v442_v29 = vld [vmem:[%s9532_s26 + $0xe1] sm:$0xff]  ;;  %v443_v30 = vld [vmem:[%s9532_s26 + $0xe9] sm:$0xff]  ;;  %v408_v34 = vpack.c.bf16 %v386_v28, %v385_v27  ;;  %v444_v37 = vld [vmem:[%s9532_s26 + $0xf1] sm:$0xff] }
  0x25   : > { %v387_v31 = vld [vmem:[%s9532_s26 + $0xe0] sm:$0xff]  ;;  %v388_v32 = vld [vmem:[%s9532_s26 + $0xe8] sm:$0xff]  ;;  %v464_v35 = vpack.c.bf16 %v443_v30, %v442_v29  ;;  %v389_v39 = vld [vmem:[%s9532_s26 + $0xf0] sm:$0xff] }
  0x26   : > { %8223 = vmatmul.mubr.msk.bf16.gmra.mxu0 %vm469_vm1, %v455_v47  ;;  %v409_v36 = vpack.c.bf16 %v388_v32, %v387_v31  ;;  %v445_v38 = vld [vmem:[%s9532_s26 + $0xf9] sm:$0xff]  ;;  %v446_v41 = vld [vmem:[%s9532_s26 + $0x101] sm:$0xff]  ;;  %v447_v42 = vld [vmem:[%s9532_s26 + $0x109] sm:$0xff] }
  0x27   : > { %8261 = vmatmul.mubr.msk.bf16.gmra.mxu1 %vm469_vm1, %v400_v48  ;;  %8226 = vmatprep.mubr.msk.bf16.mxu0 %vm469_vm1, %v456_v49  ;;  %v390_v40 = vld [vmem:[%s9532_s26 + $0xf8] sm:$0xff]  ;;  %v391_v43 = vld [vmem:[%s9532_s26 + $0x100] sm:$0xff]  ;;  %v392_v44 = vld [vmem:[%s9532_s26 + $0x108] sm:$0xff]  ;;  %v465_v45 = vpack.c.bf16 %v445_v38, %v444_v37  ;;  %v466_v47 = vpack.c.bf16 %v447_v42, %v446_v41 }
  0x28   : > { %8264 = vmatprep.mubr.msk.bf16.mxu1 %vm469_vm1, %v401_v50  ;;  %v410_v46 = vpack.c.bf16 %v390_v40, %v389_v39  ;;  %v411_v48 = vpack.c.bf16 %v392_v44, %v391_v43  ;;  %v448_v49 = vld [vmem:[%s9532_s26 + $0x111] sm:$0xff]  ;;  %v449_v50 = vld [vmem:[%s9532_s26 + $0x119] sm:$0xff]  ;;  %v939_v53 = vld [vmem:[%s9532_s26 + $0x2] sm:$0xff] }
  0x29   : > { %v393_v51 = vld [vmem:[%s9532_s26 + $0x110] sm:$0xff]  ;;  %v394_v52 = vld [vmem:[%s9532_s26 + $0x118] sm:$0xff]  ;;  %v467_v57 = vpack.c.bf16 %v449_v50, %v448_v49  ;;  %v1270_v4 = vld [vmem:[%s9532_s26 + $0x42] sm:$0xff] }
  0x2a   : > { %v940_v54 = vld [vmem:[%s9532_s26 + $0xa] sm:$0xff]  ;;  %v941_v55 = vld [vmem:[%s9532_s26 + $0x12] sm:$0xff]  ;;  %v942_v56 = vld [vmem:[%s9532_s26 + $0x1a] sm:$0xff]  ;;  %v412_v58 = vpack.c.bf16 %v394_v52, %v393_v51 }
  0x2b   : > { %v945_v63 = vld [vmem:[%s9532_s26 + $0x32] sm:$0xff]  ;;  %v946_v0 = vld [vmem:[%s9532_s26 + $0x3a] sm:$0xff]  ;;  %v1271_v5 = vld [vmem:[%s9532_s26 + $0x4a] sm:$0xff] }
  0x2c   : > { %v978_v2 = vpack.c.bf16 %v946_v0, %v945_v63  ;;  %v949_v26 = vld [vmem:[%s9532_s26 + $0x52] sm:$0xff]  ;;  %v1274_v11 = vld [vmem:[%s9532_s26 + $0x62] sm:$0xff]  ;;  %v1275_v12 = vld [vmem:[%s9532_s26 + $0x6a] sm:$0xff] }
  0x2d   : > { %v953_v13 = vld [vmem:[%s9532_s26 + $0x72] sm:$0xff]  ;;  %v954_v14 = vld [vmem:[%s9532_s26 + $0x7a] sm:$0xff]  ;;  %v1305_v15 = vpack.c.bf16 %v1275_v12, %v1274_v11  ;;  %v1278_v18 = vld [vmem:[%s9532_s26 + $0x82] sm:$0xff] }
  0x2e   : > { %8227 = vmatmul.mubr.msk.bf16.gmra.mxu0 %vm469_vm1, %v457_v59  ;;  %v975_v59 = vpack.c.bf16 %v940_v54, %v939_v53  ;;  %v982_v16 = vpack.c.bf16 %v954_v14, %v953_v13  ;;  %v9698_v17 = vld [vmem:[%s11926_s1 + $0x1c] sm:$0xf]  ;;  %v1279_v19 = vld [vmem:[%s9532_s26 + $0x8a] sm:$0xff]  ;;  %v1282_v24 = vld [vmem:[%s9532_s26 + $0xa2] sm:$0xff] }
  0x2f   : > { %8265 = vmatmul.mubr.msk.bf16.gmra.mxu1 %vm469_vm1, %v402_v60  ;;  %8230 = vmatprep.mubr.msk.bf16.mxu0 %vm469_vm1, %v458_v61  ;;  %v976_v60 = vpack.c.bf16 %v942_v56, %v941_v55  ;;  %v1266_v61 = vld [vmem:[%s9532_s26 + $0x22] sm:$0xff]  ;;  %v1283_v25 = vld [vmem:[%s9532_s26 + $0xaa] sm:$0xff]  ;;  %v961_v27 = vld [vmem:[%s9532_s26 + $0xb2] sm:$0xff]  ;;  %v2674_v13 = vsel %vm524_vm0, %v9698_v17, 0 }
  0x30   : > { %8268 = vmatprep.mubr.msk.bf16.mxu1 %vm469_vm1, %v403_v62  ;;  %v1267_v62 = vld [vmem:[%s9532_s26 + $0x2a] sm:$0xff]  ;;  %v962_v28 = vld [vmem:[%s9532_s26 + $0xba] sm:$0xff]  ;;  %v1309_v29 = vpack.c.bf16 %v1283_v25, %v1282_v24  ;;  %v1286_v31 = vld [vmem:[%s9532_s26 + $0xc2] sm:$0xff] }
  0x31   : > { %v1301_v1 = vpack.c.bf16 %v1267_v62, %v1266_v61  ;;  %v986_v30 = vpack.c.bf16 %v962_v28, %v961_v27  ;;  %v1287_v32 = vld [vmem:[%s9532_s26 + $0xca] sm:$0xff]  ;;  %v1290_v37 = vld [vmem:[%s9532_s26 + $0xe2] sm:$0xff]  ;;  %v969_v39 = vld [vmem:[%s9532_s26 + $0xf2] sm:$0xff] }
  0x32   : > { %v1291_v38 = vld [vmem:[%s9532_s26 + $0xea] sm:$0xff]  ;;  %v970_v40 = vld [vmem:[%s9532_s26 + $0xfa] sm:$0xff]  ;;  %v1294_v43 = vld [vmem:[%s9532_s26 + $0x102] sm:$0xff] }
  0x33   : > { %v1313_v41 = vpack.c.bf16 %v1291_v38, %v1290_v37  ;;  %v990_v42 = vpack.c.bf16 %v970_v40, %v969_v39  ;;  %v1295_v44 = vld [vmem:[%s9532_s26 + $0x10a] sm:$0xff]  ;;  %v1298_v49 = vld [vmem:[%s9532_s26 + $0x122] sm:$0xff]  ;;  %v1589_v51 = vld [vmem:[%s9532_s26 + $0x13] sm:$0xff] }
  0x34   : > { %v1299_v50 = vld [vmem:[%s9532_s26 + $0x12a] sm:$0xff]  ;;  %v1590_v52 = vld [vmem:[%s9532_s26 + $0x1b] sm:$0xff]  ;;  %v1593_v62 = vld [vmem:[%s9532_s26 + $0x33] sm:$0xff] }
  0x35   : > { %v1914_v53 = vld [vmem:[%s9532_s26 + $0x14] sm:$0xff]  ;;  %v1915_v54 = vld [vmem:[%s9532_s26 + $0x1c] sm:$0xff]  ;;  %v1317_v55 = vpack.c.bf16 %v1299_v50, %v1298_v49  ;;  %v1625_v56 = vpack.c.bf16 %v1590_v52, %v1589_v51  ;;  %v1917_v61 = vld [vmem:[%s9532_s26 + $0x2c] sm:$0xff] }
  0x36   : > { %8231 = vmatmul.mubr.msk.bf16.gmra.mxu0 %vm469_vm1, %v459_v7  ;;  %v9678_v7 = vld [vmem:[%s11926_s1 + $0x18] sm:$0xf]  ;;  %v9782_v14 = vld [vmem:[%s11926_s1 + $0x20] sm:$0xf] }
  0x37   : > { %8269 = vmatmul.mubr.msk.bf16.gmra.mxu1 %vm469_vm1, %v404_v8  ;;  %8234 = vmatprep.mubr.msk.bf16.mxu0 %vm469_vm1, %v460_v9  ;;  %v950_v8 = vld [vmem:[%s9532_s26 + $0x5a] sm:$0xff]  ;;  %v1303_v9 = vpack.c.bf16 %v1271_v5, %v1270_v4 }
  0x38   : > { %8272 = vmatprep.mubr.msk.bf16.mxu1 %vm469_vm1, %v405_v10  ;;  %v980_v10 = vpack.c.bf16 %v950_v8, %v949_v26  ;;  %v1594_v63 = vld [vmem:[%s9532_s26 + $0x3b] sm:$0xff]  ;;  %v1596_v26 = vld [vmem:[%s9532_s26 + $0x4b] sm:$0xff]  ;;  %v2349_v8 = vsel %vm524_vm0, %v9678_v7, 0  ;;  %v1597_v11 = vld [vmem:[%s9532_s26 + $0x53] sm:$0xff] }
  0x39   : > { %v1918_v0 = vld [vmem:[%s9532_s26 + $0x34] sm:$0xff]  ;;  %v1627_v4 = vpack.c.bf16 %v1594_v63, %v1593_v62  ;;  %v1927_v28 = vld [vmem:[%s9532_s26 + $0x7c] sm:$0xff] }
  0x3a   : > { %v1598_v12 = vld [vmem:[%s9532_s26 + $0x5b] sm:$0xff]  ;;  %v1601_v24 = vld [vmem:[%s9532_s26 + $0x73] sm:$0xff] }
  0x3b   : > { %v1602_v25 = vld [vmem:[%s9532_s26 + $0x7b] sm:$0xff]  ;;  %v1605_v37 = vld [vmem:[%s9532_s26 + $0x93] sm:$0xff] }
  0x3c   : > { %v1926_v27 = vld [vmem:[%s9532_s26 + $0x74] sm:$0xff]  ;;  %v1931_v40 = vld [vmem:[%s9532_s26 + $0x9c] sm:$0xff] }
  0x3d   : > { %v1606_v38 = vld [vmem:[%s9532_s26 + $0x9b] sm:$0xff]  ;;  %v1609_v49 = vld [vmem:[%s9532_s26 + $0xb3] sm:$0xff] }
  0x3e   : > { %8235 = vmatmul.mubr.msk.bf16.gmra.mxu0 %vm469_vm1, %v461_v20  ;;  %v957_v20 = vld [vmem:[%s9532_s26 + $0x92] sm:$0xff]  ;;  %v1610_v50 = vld [vmem:[%s9532_s26 + $0xbb] sm:$0xff] }
  0x3f   : > { %8273 = vmatmul.mubr.msk.bf16.gmra.mxu1 %vm469_vm1, %v406_v21  ;;  %8238 = vmatprep.mubr.msk.bf16.mxu0 %vm469_vm1, %v462_v22  ;;  %v958_v21 = vld [vmem:[%s9532_s26 + $0x9a] sm:$0xff]  ;;  %v1307_v22 = vpack.c.bf16 %v1279_v19, %v1278_v18  ;;  %v1629_v18 = vpack.c.bf16 %v1598_v12, %v1597_v11 }
  0x40   : > { %8276 = vmatprep.mubr.msk.bf16.mxu1 %vm469_vm1, %v407_v23  ;;  %v984_v23 = vpack.c.bf16 %v958_v21, %v957_v20  ;;  %v1599_v20 = vld [vmem:[%s9532_s26 + $0x63] sm:$0xff]  ;;  %v1600_v21 = vld [vmem:[%s9532_s26 + $0x6b] sm:$0xff]  ;;  %v1930_v39 = vld [vmem:[%s9532_s26 + $0x94] sm:$0xff] }
  0x41   : > { %v1934_v51 = vld [vmem:[%s9532_s26 + $0xb4] sm:$0xff]  ;;  %v1935_v52 = vld [vmem:[%s9532_s26 + $0xbc] sm:$0xff] }
  0x42   : > { %v1614_v62 = vld [vmem:[%s9532_s26 + $0xdb] sm:$0xff]  ;;  %v1617_v11 = vld [vmem:[%s9532_s26 + $0xf3] sm:$0xff] }
  0x43   : > { %v1938_v63 = vld [vmem:[%s9532_s26 + $0xd4] sm:$0xff] }
  0x44   : > { %v1618_v12 = vld [vmem:[%s9532_s26 + $0xfb] sm:$0xff] }
  0x46   : > { %8239 = vmatmul.mubr.msk.bf16.gmra.mxu0 %vm469_vm1, %v463_v33  ;;  %v965_v33 = vld [vmem:[%s9532_s26 + $0xd2] sm:$0xff] }
  0x47   : > { %8277 = vmatmul.mubr.msk.bf16.gmra.mxu1 %vm469_vm1, %v408_v34  ;;  %8242 = vmatprep.mubr.msk.bf16.mxu0 %vm469_vm1, %v464_v35  ;;  %v966_v34 = vld [vmem:[%s9532_s26 + $0xda] sm:$0xff]  ;;  %v1311_v35 = vpack.c.bf16 %v1287_v32, %v1286_v31  ;;  %v1631_v31 = vpack.c.bf16 %v1602_v25, %v1601_v24  ;;  %v9813_v32 = vpack.c.bf16 %v1927_v28, %v1926_v27  ;;  %v1944_v24 = vld [vmem:[%s9532_s26 + $0x104] sm:$0xff]  ;;  %v1945_v25 = vld [vmem:[%s9532_s26 + $0x10c] sm:$0xff] }
  0x48   : > { %8280 = vmatprep.mubr.msk.bf16.mxu1 %vm469_vm1, %v409_v36  ;;  %v988_v36 = vpack.c.bf16 %v966_v34, %v965_v33  ;;  %v1603_v33 = vld [vmem:[%s9532_s26 + $0x83] sm:$0xff]  ;;  %v1604_v34 = vld [vmem:[%s9532_s26 + $0x8b] sm:$0xff]  ;;  %v1621_v27 = vld [vmem:[%s9532_s26 + $0x113] sm:$0xff] }
  0x49   : > { %v1622_v28 = vld [vmem:[%s9532_s26 + $0x11b] sm:$0xff] }
  0x4e   : > { %8243 = vmatmul.mubr.msk.bf16.gmra.mxu0 %vm469_vm1, %v465_v45  ;;  %v973_v45 = vld [vmem:[%s9532_s26 + $0x112] sm:$0xff] }
  0x4f   : > { %8281 = vmatmul.mubr.msk.bf16.gmra.mxu1 %vm469_vm1, %v410_v46  ;;  %8246 = vmatprep.mubr.msk.bf16.mxu0 %vm469_vm1, %v466_v47  ;;  %v974_v46 = vld [vmem:[%s9532_s26 + $0x11a] sm:$0xff]  ;;  %v1315_v47 = vpack.c.bf16 %v1295_v44, %v1294_v43  ;;  %v1633_v43 = vpack.c.bf16 %v1606_v38, %v1605_v37  ;;  %v9831_v44 = vpack.c.bf16 %v1931_v40, %v1930_v39 }
  0x50   : > { %8284 = vmatprep.mubr.msk.bf16.mxu1 %vm469_vm1, %v411_v48  ;;  %v992_v48 = vpack.c.bf16 %v974_v46, %v973_v45  ;;  %v1607_v45 = vld [vmem:[%s9532_s26 + $0xa3] sm:$0xff]  ;;  %v1608_v46 = vld [vmem:[%s9532_s26 + $0xab] sm:$0xff] }
  0x56   : > { %8247 = vmatmul.mubr.msk.bf16.gmra.mxu0 %vm469_vm1, %v467_v57  ;;  %v1950_v57 = vpack.c.bf16 %v1915_v54, %v1914_v53  ;;  %v1634_v53 = vpack.c.bf16 %v1608_v46, %v1607_v45 }
  0x57   : > { %8285 = vmatmul.mubr.msk.bf16.gmra.mxu1 %vm469_vm1, %v412_v58  ;;  %8290 = vmatprep.mubr.msk.bf16.mxu0 %vm469_vm1, %v975_v59  ;;  %v1591_v58 = vld [vmem:[%s9532_s26 + $0x23] sm:$0xff]  ;;  %v1592_v59 = vld [vmem:[%s9532_s26 + $0x2b] sm:$0xff] }
  0x58   : > { %8328 = vmatprep.mubr.msk.bf16.mxu1 %vm469_vm1, %v976_v60 }
  0x5e   : > { %8291 = vmatmul.mubr.msk.bf16.vlgmr.msra.gmra.mxu0 %vm469_vm1, %v976_v60  ;;  %v1916_v60 = vld [vmem:[%s9532_s26 + $0x24] sm:$0xff] }
  0x5f   : > { %8329 = vmatmul.mubr.msk.bf16.vlgmr.msra.gmra.mxu1 %vm469_vm1, %v1301_v1  ;;  %8294 = vmatprep.mubr.msk.bf16.mxu0 %vm469_vm1, %v1301_v1  ;;  %v1919_v1 = vld [vmem:[%s9532_s26 + $0x3c] sm:$0xff] }
  0x60   : > { %8332 = vmatprep.mubr.msk.bf16.mxu1 %vm469_vm1, %v978_v2  ;;  %8365 = vmatpush3.bf16.msra.mxu0 %v1699_v3  ;;  %v9764_v3 = vpack.c.bf16 %v1917_v61, %v1916_v60  ;;  %v9766_v5 = vpack.c.bf16 %v1919_v1, %v1918_v0  ;;  %v1937_v60 = vld [vmem:[%s9532_s26 + $0xcc] sm:$0xff]  ;;  %v1939_v0 = vld [vmem:[%s9532_s26 + $0xdc] sm:$0xff] }
  0x61   : > { %8403 = vmatpush3.bf16.msra.mxu1 %v2024_v6  ;;  %9158 = vmatprep.subr.msk.bf16.mxu0 %vm524_vm0, %v9678_v7  ;;  %v1595_v6 = vld [vmem:[%s9532_s26 + $0x43] sm:$0xff]  ;;  %v1922_v7 = vld [vmem:[%s9532_s26 + $0x54] sm:$0xff] }
  0x62   : > { %9159 = vmatprep.subr.msk.bf16.mxu1 %vm524_vm0, %v9698_v17  ;;  %v1613_v61 = vld [vmem:[%s9532_s26 + $0xd3] sm:$0xff] }
  0x66   : > { %8295 = vmatmul.mubr.msk.bf16.gmra.mxu0 %vm469_vm1, %v978_v2  ;;  %v1626_v2 = vpack.c.bf16 %v1592_v59, %v1591_v58  ;;  %v1612_v58 = vld [vmem:[%s9532_s26 + $0xcb] sm:$0xff] }
  0x67   : > { %8333 = vmatmul.mubr.msk.bf16.gmra.mxu1 %vm469_vm1, %v1303_v9  ;;  %8298 = vmatprep.mubr.msk.bf16.mxu0 %vm469_vm1, %v1303_v9  ;;  %v1920_v9 = vld [vmem:[%s9532_s26 + $0x44] sm:$0xff] }
  0x68   : > { %8336 = vmatprep.mubr.msk.bf16.mxu1 %vm469_vm1, %v980_v10  ;;  %v1936_v59 = vld [vmem:[%s9532_s26 + $0xc4] sm:$0xff] }
  0x6e   : > { %8299 = vmatmul.mubr.msk.bf16.gmra.mxu0 %vm469_vm1, %v980_v10  ;;  %v1921_v10 = vld [vmem:[%s9532_s26 + $0x4c] sm:$0xff] }
  0x6f   : > { %8337 = vmatmul.mubr.msk.bf16.gmra.mxu1 %vm469_vm1, %v1305_v15  ;;  %8302 = vmatprep.mubr.msk.bf16.mxu0 %vm469_vm1, %v1305_v15  ;;  %v1923_v15 = vld [vmem:[%s9532_s26 + $0x5c] sm:$0xff]  ;;  %v9793_v17 = vpack.c.bf16 %v1921_v10, %v1920_v9  ;;  %v1940_v9 = vld [vmem:[%s9532_s26 + $0xe4] sm:$0xff]  ;;  %v1941_v10 = vld [vmem:[%s9532_s26 + $0xec] sm:$0xff] }
  0x70   : > { %8340 = vmatprep.mubr.msk.bf16.mxu1 %vm469_vm1, %v982_v16  ;;  %v9795_v19 = vpack.c.bf16 %v1923_v15, %v1922_v7  ;;  %v1943_v7 = vld [vmem:[%s9532_s26 + $0xfc] sm:$0xff] }
  0x76   : > { %8303 = vmatmul.mubr.msk.bf16.gmra.mxu0 %vm469_vm1, %v982_v16  ;;  %v1628_v16 = vpack.c.bf16 %v1596_v26, %v1595_v6  ;;  %v9867_v6 = vpack.c.bf16 %v1939_v0, %v1938_v63  ;;  %v1615_v26 = vld [vmem:[%s9532_s26 + $0xe3] sm:$0xff] }
  0x77   : > { %8341 = vmatmul.mubr.msk.bf16.gmra.mxu1 %vm469_vm1, %v1307_v22  ;;  %8306 = vmatprep.mubr.msk.bf16.mxu0 %vm469_vm1, %v1307_v22  ;;  %v1924_v22 = vld [vmem:[%s9532_s26 + $0x64] sm:$0xff] }
  0x78   : > { %8344 = vmatprep.mubr.msk.bf16.mxu1 %vm469_vm1, %v984_v23 }
  0x7e   : > { %8307 = vmatmul.mubr.msk.bf16.gmra.mxu0 %vm469_vm1, %v984_v23  ;;  %v1925_v23 = vld [vmem:[%s9532_s26 + $0x6c] sm:$0xff] }
  0x7f   : > { %8345 = vmatmul.mubr.msk.bf16.gmra.mxu1 %vm469_vm1, %v1309_v29  ;;  %8310 = vmatprep.mubr.msk.bf16.mxu0 %vm469_vm1, %v1309_v29  ;;  %v1630_v29 = vpack.c.bf16 %v1600_v21, %v1599_v20  ;;  %v1619_v21 = vld [vmem:[%s9532_s26 + $0x103] sm:$0xff] }
  0x80   : > { %8348 = vmatprep.mubr.msk.bf16.mxu1 %vm469_vm1, %v986_v30 }
  0x86   : > { %8311 = vmatmul.mubr.msk.bf16.gmra.mxu0 %vm469_vm1, %v986_v30  ;;  %v9811_v30 = vpack.c.bf16 %v1925_v23, %v1924_v22  ;;  %v1620_v22 = vld [vmem:[%s9532_s26 + $0x10b] sm:$0xff] }
  0x87   : > { %8349 = vmatmul.mubr.msk.bf16.gmra.mxu1 %vm469_vm1, %v1311_v35  ;;  %8314 = vmatprep.mubr.msk.bf16.mxu0 %vm469_vm1, %v1311_v35  ;;  %v1928_v35 = vld [vmem:[%s9532_s26 + $0x84] sm:$0xff]  ;;  %v1640_v39 = vpack.c.bf16 %v1620_v22, %v1619_v21  ;;  %v2569_v22 = vld [vmem:[%s9532_s26 + $0x4d] sm:$0xff] }
  0x88   : > { %8352 = vmatprep.mubr.msk.bf16.mxu1 %vm469_vm1, %v988_v36  ;;  %v2568_v21 = vld [vmem:[%s9532_s26 + $0x45] sm:$0xff] }
  0x8e   : > { %8315 = vmatmul.mubr.msk.bf16.gmra.mxu0 %vm469_vm1, %v988_v36  ;;  %v1929_v36 = vld [vmem:[%s9532_s26 + $0x8c] sm:$0xff] }
  0x8f   : > { %8353 = vmatmul.mubr.msk.bf16.gmra.mxu1 %vm469_vm1, %v1313_v41  ;;  %8318 = vmatprep.mubr.msk.bf16.mxu0 %vm469_vm1, %v1313_v41  ;;  %v1632_v41 = vpack.c.bf16 %v1604_v34, %v1603_v33  ;;  %v1947_v33 = vld [vmem:[%s9532_s26 + $0x11c] sm:$0xff] }
  0x90   : > { %8356 = vmatprep.mubr.msk.bf16.mxu1 %vm469_vm1, %v990_v42 }
  0x96   : > { %8319 = vmatmul.mubr.msk.bf16.gmra.mxu0 %vm469_vm1, %v990_v42  ;;  %v9829_v42 = vpack.c.bf16 %v1929_v36, %v1928_v35 }
  0x97   : > { %8357 = vmatmul.mubr.msk.bf16.gmra.mxu1 %vm469_vm1, %v1315_v47  ;;  %8322 = vmatprep.mubr.msk.bf16.mxu0 %vm469_vm1, %v1315_v47  ;;  %v1932_v47 = vld [vmem:[%s9532_s26 + $0xa4] sm:$0xff] }
  0x98   : > { %8360 = vmatprep.mubr.msk.bf16.mxu1 %vm469_vm1, %v992_v48 }
  0x9e   : > { %8323 = vmatmul.mubr.msk.bf16.gmra.mxu0 %vm469_vm1, %v992_v48  ;;  %v1933_v48 = vld [vmem:[%s9532_s26 + $0xac] sm:$0xff] }
  0x9f   : > { %8361 = vmatmul.mubr.msk.bf16.gmra.mxu1 %vm469_vm1, %v1317_v55  ;;  %8366 = vmatprep.mubr.msk.bf16.mxu0 %vm469_vm1, %v1625_v56  ;;  %v9847_v54 = vpack.c.bf16 %v1933_v48, %v1932_v47  ;;  %v1635_v55 = vpack.c.bf16 %v1610_v50, %v1609_v49  ;;  %v9849_v56 = vpack.c.bf16 %v1935_v52, %v1934_v51  ;;  %v1623_v49 = vld [vmem:[%s9532_s26 + $0x123] sm:$0xff]  ;;  %v1624_v50 = vld [vmem:[%s9532_s26 + $0x12b] sm:$0xff] }
  0xa0   : > { %8404 = vmatprep.mubr.msk.bf16.mxu1 %vm469_vm1, %v1950_v57  ;;  %v1611_v57 = vld [vmem:[%s9532_s26 + $0xc3] sm:$0xff] }
  0xa1   : > { %v1636_v1 = vpack.c.bf16 %v1612_v58, %v1611_v57  ;;  %v2564_v58 = vld [vmem:[%s9532_s26 + $0x25] sm:$0xff] }
  0xa6   : > { %8367 = vmatmul.mubr.msk.bf16.vlgmr.msra.gmra.mxu0 %vm469_vm1, %v1626_v2  ;;  %v9865_v2 = vpack.c.bf16 %v1937_v60, %v1936_v59  ;;  %v2565_v59 = vld [vmem:[%s9532_s26 + $0x2d] sm:$0xff] }
  0xa7   : > { %8405 = vmatmul.mubr.msk.bf16.vlgmr.msra.gmra.mxu1 %vm469_vm1, %v9764_v3  ;;  %8370 = vmatprep.mubr.msk.bf16.mxu0 %vm469_vm1, %v1627_v4  ;;  %v1637_v4 = vpack.c.bf16 %v1614_v62, %v1613_v61 }
  0xa8   : > { %8408 = vmatprep.mubr.msk.bf16.mxu1 %vm469_vm1, %v9766_v5  ;;  %8441 = vmatpush3.bf16.msra.mxu0 %v2349_v8  ;;  %v1616_v8 = vld [vmem:[%s9532_s26 + $0xeb] sm:$0xff] }
  0xa9   : > { %8479 = vmatpush3.bf16.msra.mxu1 %v2674_v13  ;;  %9160 = vmatprep.subr.msk.bf16.mxu0 %vm524_vm0, %v9782_v14  ;;  %v1942_v13 = vld [vmem:[%s9532_s26 + $0xf4] sm:$0xff]  ;;  %v1638_v15 = vpack.c.bf16 %v1616_v8, %v1615_v26 }
  0xaa   : > { %v9885_v20 = vpack.c.bf16 %v1943_v7, %v1942_v13  ;;  %v2566_v7 = vld [vmem:[%s9532_s26 + $0x35] sm:$0xff] }
  0xae   : > { %8371 = vmatmul.mubr.msk.bf16.gmra.mxu0 %vm469_vm1, %v1628_v16  ;;  %v9883_v16 = vpack.c.bf16 %v1941_v10, %v1940_v9  ;;  %v2600_v10 = vpack.c.bf16 %v2565_v59, %v2564_v58 }
  0xaf   : > { %8409 = vmatmul.mubr.msk.bf16.gmra.mxu1 %vm469_vm1, %v9793_v17  ;;  %8374 = vmatprep.mubr.msk.bf16.mxu0 %vm469_vm1, %v1629_v18  ;;  %v1639_v18 = vpack.c.bf16 %v1618_v12, %v1617_v11 }
  0xb0   : > { %8412 = vmatprep.mubr.msk.bf16.mxu1 %vm469_vm1, %v9795_v19 }
  0xb6   : > { %8375 = vmatmul.mubr.msk.bf16.gmra.mxu0 %vm469_vm1, %v1630_v29 }
  0xb7   : > { %8413 = vmatmul.mubr.msk.bf16.gmra.mxu1 %vm469_vm1, %v9811_v30  ;;  %8378 = vmatprep.mubr.msk.bf16.mxu0 %vm469_vm1, %v1631_v31  ;;  %v1946_v31 = vld [vmem:[%s9532_s26 + $0x114] sm:$0xff] }
  0xb8   : > { %8416 = vmatprep.mubr.msk.bf16.mxu1 %vm469_vm1, %v9813_v32  ;;  %v9909_v47 = vpack.c.bf16 %v1947_v33, %v1946_v31 }
  0xbe   : > { %8379 = vmatmul.mubr.msk.bf16.gmra.mxu0 %vm469_vm1, %v1632_v41  ;;  %v9905_v41 = vpack.c.bf16 %v1945_v25, %v1944_v24 }
  0xbf   : > { %8417 = vmatmul.mubr.msk.bf16.gmra.mxu1 %vm469_vm1, %v9829_v42  ;;  %8382 = vmatprep.mubr.msk.bf16.mxu0 %vm469_vm1, %v1633_v43  ;;  %v1641_v43 = vpack.c.bf16 %v1622_v28, %v1621_v27 }
  0xc0   : > { %8420 = vmatprep.mubr.msk.bf16.mxu1 %vm469_vm1, %v9831_v44 }
  0xc6   : > { %8383 = vmatmul.mubr.msk.bf16.gmra.mxu0 %vm469_vm1, %v1634_v53  ;;  %v1948_v53 = vld [vmem:[%s9532_s26 + $0x124] sm:$0xff] }
  0xc7   : > { %8421 = vmatmul.mubr.msk.bf16.gmra.mxu1 %vm469_vm1, %v9847_v54  ;;  %8386 = vmatprep.mubr.msk.bf16.mxu0 %vm469_vm1, %v1635_v55  ;;  %v1949_v55 = vld [vmem:[%s9532_s26 + $0x12c] sm:$0xff] }
  0xc8   : > { %8424 = vmatprep.mubr.msk.bf16.mxu1 %vm469_vm1, %v9849_v56  ;;  %v9929_v26 = vpack.c.bf16 %v1949_v55, %v1948_v53  ;;  %v2573_v53 = vld [vmem:[%s9532_s26 + $0x6d] sm:$0xff] }
  0xce   : > { %8387 = vmatmul.mubr.msk.bf16.gmra.mxu0 %vm469_vm1, %v1636_v1  ;;  %v1642_v1 = vpack.c.bf16 %v1624_v50, %v1623_v49  ;;  %v2571_v49 = vld [vmem:[%s9532_s26 + $0x5d] sm:$0xff] }
  0xcf   : > { %8425 = vmatmul.mubr.msk.bf16.gmra.mxu1 %vm469_vm1, %v9865_v2  ;;  %8390 = vmatprep.mubr.msk.bf16.mxu0 %vm469_vm1, %v1637_v4 }
  0xd0   : > { %8428 = vmatprep.mubr.msk.bf16.mxu1 %vm469_vm1, %v9867_v6 }
  0xd6   : > { %v8216_v23 = vpop.f32.mrf.mxu0  ;;  %8391 = vmatmul.mubr.msk.bf16.gmra.mxu0 %vm469_vm1, %v1638_v15  ;;  %v2567_v15 = vld [vmem:[%s9532_s26 + $0x3d] sm:$0xff] }
  0xd7   : > { %v8254_v29 = vpop.f32.mrf.mxu1  ;;  %8429 = vmatmul.mubr.msk.bf16.gmra.mxu1 %vm469_vm1, %v9883_v16  ;;  %8394 = vmatprep.mubr.msk.bf16.mxu0 %vm469_vm1, %v1639_v18  ;;  %v2601_v31 = vpack.c.bf16 %v2567_v15, %v2566_v7  ;;  %v2576_v15 = vld [vmem:[%s9532_s26 + $0x85] sm:$0xff] }
  0xd8   : > { %v9899_v34 = vadd.f32 %v8254_v29, %v8216_v23  ;;  %v562_v35 = vpop.f32.mrf.mxu0  ;;  %8432 = vmatprep.mubr.msk.bf16.mxu1 %vm469_vm1, %v9885_v20 }
  0xd9   : > { %v796_v36 = vpop.f32.mrf.mxu1 }
  0xda   : > { %v9903_v37 = vadd.f32 %v796_v36, %v562_v35  ;;  %v8217_v38 = vpop.f32.mrf.mxu0  ;;  %v2602_v36 = vpack.c.bf16 %v2569_v22, %v2568_v21 }
  0xdb   : > { %v8255_v40 = vpop.f32.mrf.mxu1 }
  0xdc   : > { %v9907_v45 = vadd.f32 %v8255_v40, %v8217_v38  ;;  %v565_v46 = vpop.f32.mrf.mxu0 }
  0xdd   : > { %v799_v48 = vpop.f32.mrf.mxu1 }
  0xde   : > { %v9913_v51 = vadd.f32 %v799_v48, %v565_v46  ;;  %v8220_v52 = vpop.f32.mrf.mxu0  ;;  %8395 = vmatmul.mubr.msk.bf16.gmra.mxu0 %vm469_vm1, %v1640_v39 }
  0xdf   : > { %v8258_v57 = vpop.f32.mrf.mxu1  ;;  %8433 = vmatmul.mubr.msk.bf16.gmra.mxu1 %vm469_vm1, %v9905_v41  ;;  %8398 = vmatprep.mubr.msk.bf16.mxu0 %vm469_vm1, %v1641_v43 }
  0xe0   : > { %v9923_v60 = vadd.f32 %v8258_v57, %v8220_v52  ;;  %v578_v61 = vpop.f32.mrf.mxu0  ;;  %8436 = vmatprep.mubr.msk.bf16.mxu1 %vm469_vm1, %v9909_v47  ;;  %v2572_v52 = vld [vmem:[%s9532_s26 + $0x65] sm:$0xff] }
  0xe1   : > { %v812_v62 = vpop.f32.mrf.mxu1 }
  0xe2   : > { %v9927_v63 = vadd.f32 %v812_v62, %v578_v61  ;;  %v8221_v0 = vpop.f32.mrf.mxu0  ;;  %v2604_v61 = vpack.c.bf16 %v2573_v53, %v2572_v52 }
  0xe3   : > { %v8259_v4 = vpop.f32.mrf.mxu1 }
  0xe4   : > { %v9931_v8 = vadd.f32 %v8259_v4, %v8221_v0  ;;  %v581_v9 = vpop.f32.mrf.mxu0 }
  0xe5   : > { %v815_v11 = vpop.f32.mrf.mxu1 }
  0xe6   : > { %v9933_v12 = vadd.f32 %v815_v11, %v581_v9  ;;  %v8224_v13 = vpop.f32.mrf.mxu0  ;;  %8399 = vmatmul.mubr.msk.bf16.gmra.mxu0 %vm469_vm1, %v1642_v1  ;;  %v2574_v11 = vld [vmem:[%s9532_s26 + $0x75] sm:$0xff] }
  0xe7   : > { %v8262_v18 = vpop.f32.mrf.mxu1  ;;  %8437 = vmatmul.mubr.msk.bf16.gmra.mxu1 %vm469_vm1, %v9929_v26  ;;  %8442 = vmatprep.mubr.msk.bf16.mxu0 %vm469_vm1, %v9764_v3  ;;  %v2999_v3 = vsel %vm524_vm0, %v9782_v14, 0  ;;  %v2570_v14 = vld [vmem:[%s9532_s26 + $0x55] sm:$0xff] }
  0xe8   : > { %v9944_v23 = vadd.f32 %v8262_v18, %v8224_v13  ;;  %v594_v24 = vpop.f32.mrf.mxu0  ;;  %8480 = vmatprep.mubr.msk.bf16.mxu1 %vm469_vm1, %v2600_v10  ;;  %v2603_v58 = vpack.c.bf16 %v2571_v49, %v2570_v14  ;;  %v2575_v13 = vld [vmem:[%s9532_s26 + $0x7d] sm:$0xff]  ;;  %v2577_v18 = vld [vmem:[%s9532_s26 + $0x8d] sm:$0xff]  ;;  %v2580_v14 = vld [vmem:[%s9532_s26 + $0xa5] sm:$0xff] }
  0xe9   : > { %v828_v25 = vpop.f32.mrf.mxu1  ;;  %v2581_v49 = vld [vmem:[%s9532_s26 + $0xad] sm:$0xff] }
  0xea   : > { %v9947_v27 = vadd.f32 %v828_v25, %v594_v24  ;;  %v8225_v28 = vpop.f32.mrf.mxu0  ;;  %v2605_v24 = vpack.c.bf16 %v2575_v13, %v2574_v11  ;;  %v2583_v11 = vld [vmem:[%s9532_s26 + $0xbd] sm:$0xff] }
  0xeb   : > { %v8263_v29 = vpop.f32.mrf.mxu1 }
  0xec   : > { %v9949_v33 = vadd.f32 %v8263_v29, %v8225_v28  ;;  %v597_v35 = vpop.f32.mrf.mxu0  ;;  %v2606_v28 = vpack.c.bf16 %v2577_v18, %v2576_v15  ;;  %v2585_v15 = vld [vmem:[%s9532_s26 + $0xcd] sm:$0xff] }
  0xed   : > { %v831_v38 = vpop.f32.mrf.mxu1 }
  0xee   : > { %v9953_v39 = vadd.f32 %v831_v38, %v597_v35  ;;  %v8228_v40 = vpop.f32.mrf.mxu0  ;;  %8443 = vmatmul.mubr.msk.bf16.vlgmr.msra.gmra.mxu0 %vm469_vm1, %v9766_v5 }
  0xef   : > { %v8266_v43 = vpop.f32.mrf.mxu1  ;;  %8481 = vmatmul.mubr.msk.bf16.vlgmr.msra.gmra.mxu1 %vm469_vm1, %v2601_v31  ;;  %8446 = vmatprep.mubr.msk.bf16.mxu0 %vm469_vm1, %v9793_v17 }
  0xf0   : > { %v9960_v46 = vadd.f32 %v8266_v43, %v8228_v40  ;;  %v610_v48 = vpop.f32.mrf.mxu0  ;;  %8484 = vmatprep.mubr.msk.bf16.mxu1 %vm469_vm1, %v2602_v36  ;;  %8517 = vmatpush3.bf16.msra.mxu0 %v2999_v3  ;;  %v2578_v40 = vld [vmem:[%s9532_s26 + $0x95] sm:$0xff]  ;;  %v2579_v43 = vld [vmem:[%s9532_s26 + $0x9d] sm:$0xff] }
  0xf1   : > { %v844_v50 = vpop.f32.mrf.mxu1  ;;  %v2607_v53 = vpack.c.bf16 %v2579_v43, %v2578_v40  ;;  %v2586_v43 = vld [vmem:[%s9532_s26 + $0xd5] sm:$0xff] }
  0xf2   : > { %v9967_v55 = vadd.f32 %v844_v50, %v610_v48  ;;  %v8229_v5 = vpop.f32.mrf.mxu0 }
  0xf3   : > { %v8267_v57 = vpop.f32.mrf.mxu1 }
  0xf4   : > { %v9969_v59 = vadd.f32 %v8267_v57, %v8229_v5  ;;  %v613_v17 = vpop.f32.mrf.mxu0  ;;  %v2608_v57 = vpack.c.bf16 %v2581_v49, %v2580_v14  ;;  %v2588_v49 = vld [vmem:[%s9532_s26 + $0xe5] sm:$0xff] }
  0xf5   : > { %v847_v62 = vpop.f32.mrf.mxu1 }
  0xf6   : > { %v9971_v0 = vadd.f32 %v847_v62, %v613_v17  ;;  %v8232_v1 = vpop.f32.mrf.mxu0  ;;  %8447 = vmatmul.mubr.msk.bf16.gmra.mxu0 %vm469_vm1, %v9795_v19 }
  0xf7   : > { %v8270_v4 = vpop.f32.mrf.mxu1  ;;  %8485 = vmatmul.mubr.msk.bf16.gmra.mxu1 %vm469_vm1, %v2603_v58  ;;  %8450 = vmatprep.mubr.msk.bf16.mxu0 %vm469_vm1, %v9811_v30 }
  0xf8   : > { %v9978_v9 = vadd.f32 %v8270_v4, %v8232_v1  ;;  %v626_v10 = vpop.f32.mrf.mxu0  ;;  %8488 = vmatprep.mubr.msk.bf16.mxu1 %vm469_vm1, %v2604_v61 }
  0xf9   : > { %v860_v7 = vpop.f32.mrf.mxu1 }
  0xfa   : > { %v9985_v21 = vadd.f32 %v860_v7, %v626_v10  ;;  %v8233_v22 = vpop.f32.mrf.mxu0  ;;  %v2582_v10 = vld [vmem:[%s9532_s26 + $0xb5] sm:$0xff]  ;;  %v2584_v7 = vld [vmem:[%s9532_s26 + $0xc5] sm:$0xff] }
  0xfb   : > { %v8271_v19 = vpop.f32.mrf.mxu1 }
  0xfc   : > { %v9987_v25 = vadd.f32 %v8271_v19, %v8233_v22  ;;  %v629_v30 = vpop.f32.mrf.mxu0  ;;  %v2609_v19 = vpack.c.bf16 %v2583_v11, %v2582_v10 }
  0xfd   : > { %v863_v29 = vpop.f32.mrf.mxu1 }
  0xfe   : > { %v9989_v31 = vadd.f32 %v863_v29, %v629_v30  ;;  %v8236_v35 = vpop.f32.mrf.mxu0  ;;  %8451 = vmatmul.mubr.msk.bf16.gmra.mxu0 %vm469_vm1, %v9813_v32  ;;  %v2610_v30 = vpack.c.bf16 %v2585_v15, %v2584_v7  ;;  %v2590_v7 = vld [vmem:[%s9532_s26 + $0xf5] sm:$0xff]  ;;  %v2591_v15 = vld [vmem:[%s9532_s26 + $0xfd] sm:$0xff] }
  0xff   : > { %v8274_v36 = vpop.f32.mrf.mxu1  ;;  %8489 = vmatmul.mubr.msk.bf16.gmra.mxu1 %vm469_vm1, %v2605_v24  ;;  %8454 = vmatprep.mubr.msk.bf16.mxu0 %vm469_vm1, %v9829_v42 }
 0x100   : > { %v9996_v3 = vadd.f32 %v8274_v36, %v8236_v35  ;;  %v642_v38 = vpop.f32.mrf.mxu0  ;;  %8492 = vmatprep.mubr.msk.bf16.mxu1 %vm469_vm1, %v2606_v28 }
 0x101   : > { %v876_v48 = vpop.f32.mrf.mxu1 }
 0x102   : > { %v10003_v50 = vadd.f32 %v876_v48, %v642_v38  ;;  %v8237_v52 = vpop.f32.mrf.mxu0  ;;  %v2587_v48 = vld [vmem:[%s9532_s26 + $0xdd] sm:$0xff] }
 0x103   : > { %v8275_v32 = vpop.f32.mrf.mxu1 }
 0x104   : > { %v10005_v5 = vadd.f32 %v8275_v32, %v8237_v52  ;;  %v645_v42 = vpop.f32.mrf.mxu0  ;;  %v2589_v52 = vld [vmem:[%s9532_s26 + $0xed] sm:$0xff] }
 0x105   : > { %v879_v58 = vpop.f32.mrf.mxu1 }
 0x106   : > { %v10007_v17 = vadd.f32 %v879_v58, %v645_v42  ;;  %v8240_v61 = vpop.f32.mrf.mxu0  ;;  %8455 = vmatmul.mubr.msk.bf16.gmra.mxu0 %vm469_vm1, %v9831_v44  ;;  %v2611_v42 = vpack.c.bf16 %v2587_v48, %v2586_v43  ;;  %v2612_v58 = vpack.c.bf16 %v2589_v52, %v2588_v49  ;;  %v2594_v52 = vld [vmem:[%s9532_s26 + $0x115] sm:$0xff] }
 0x107   : > { %v8278_v62 = vpop.f32.mrf.mxu1  ;;  %8493 = vmatmul.mubr.msk.bf16.gmra.mxu1 %vm469_vm1, %v2607_v53  ;;  %8458 = vmatprep.mubr.msk.bf16.mxu0 %vm469_vm1, %v9847_v54 }
 0x108   : > { %v10014_v1 = vadd.f32 %v8278_v62, %v8240_v61  ;;  %v658_v4 = vpop.f32.mrf.mxu0  ;;  %8496 = vmatprep.mubr.msk.bf16.mxu1 %vm469_vm1, %v2608_v57 }
 0x109   : > { %v892_v13 = vpop.f32.mrf.mxu1 }
 0x10a   : > { %v10021_v18 = vadd.f32 %v892_v13, %v658_v4  ;;  %v8241_v22 = vpop.f32.mrf.mxu0 }
 0x10b   : > { %v8279_v44 = vpop.f32.mrf.mxu1 }
 0x10c   : > { %v10023_v24 = vadd.f32 %v8279_v44, %v8241_v22  ;;  %v661_v54 = vpop.f32.mrf.mxu0  ;;  %v2592_v44 = vld [vmem:[%s9532_s26 + $0x105] sm:$0xff] }
 0x10d   : > { %v895_v28 = vpop.f32.mrf.mxu1 }
 0x10e   : > { %v10025_v29 = vadd.f32 %v895_v28, %v661_v54  ;;  %v8244_v35 = vpop.f32.mrf.mxu0  ;;  %8459 = vmatmul.mubr.msk.bf16.gmra.mxu0 %vm469_vm1, %v9849_v56  ;;  %v2613_v28 = vpack.c.bf16 %v2591_v15, %v2590_v7 }
 0x10f   : > { %v8282_v36 = vpop.f32.mrf.mxu1  ;;  %8497 = vmatmul.mubr.msk.bf16.gmra.mxu1 %vm469_vm1, %v2609_v19  ;;  %8462 = vmatprep.mubr.msk.bf16.mxu0 %vm469_vm1, %v9865_v2  ;;  %v2593_v19 = vld [vmem:[%s9532_s26 + $0x10d] sm:$0xff] }
 0x110   : > { %v10032_v38 = vadd.f32 %v8282_v36, %v8244_v35  ;;  %v674_v40 = vpop.f32.mrf.mxu0  ;;  %8500 = vmatprep.mubr.msk.bf16.mxu1 %vm469_vm1, %v2610_v30  ;;  %v2614_v36 = vpack.c.bf16 %v2593_v19, %v2592_v44 }
 0x111   : > { %v908_v14 = vpop.f32.mrf.mxu1 }
 0x112   : > { %v10039_v32 = vadd.f32 %v908_v14, %v674_v40  ;;  %v8245_v53 = vpop.f32.mrf.mxu0 }
 0x113   : > { %v8283_v56 = vpop.f32.mrf.mxu1 }
 0x114   : > { %v10041_v57 = vadd.f32 %v8283_v56, %v8245_v53  ;;  %v677_v2 = vpop.f32.mrf.mxu0  ;;  %v2595_v53 = vld [vmem:[%s9532_s26 + $0x11d] sm:$0xff] }
 0x115   : > { %v911_v61 = vpop.f32.mrf.mxu1 }
 0x116   : > { %v10043_v62 = vadd.f32 %v911_v61, %v677_v2  ;;  %v8248_v4 = vpop.f32.mrf.mxu0  ;;  %8463 = vmatmul.mubr.msk.bf16.gmra.mxu0 %vm469_vm1, %v9867_v6 }
 0x117   : > { %v8286_v10 = vpop.f32.mrf.mxu1  ;;  %8501 = vmatmul.mubr.msk.bf16.gmra.mxu1 %vm469_vm1, %v2611_v42  ;;  %8466 = vmatprep.mubr.msk.bf16.mxu0 %vm469_vm1, %v9883_v16 }
 0x118   : > { %v10050_v11 = vadd.f32 %v8286_v10, %v8248_v4  ;;  %v690_v13 = vpop.f32.mrf.mxu0  ;;  %8504 = vmatprep.mubr.msk.bf16.mxu1 %vm469_vm1, %v2612_v58  ;;  %v2596_v58 = vld [vmem:[%s9532_s26 + $0x125] sm:$0xff]  ;;  %v2615_v10 = vpack.c.bf16 %v2595_v53, %v2594_v52 }
 0x119   : > { %v924_v22 = vpop.f32.mrf.mxu1 }
 0x11a   : > { %v10057_v54 = vadd.f32 %v924_v22, %v690_v13  ;;  %v8249_v6 = vpop.f32.mrf.mxu0 }
 0x11b   : > { %v8287_v30 = vpop.f32.mrf.mxu1 }
 0x11c   : > { %v10059_v35 = vadd.f32 %v8287_v30, %v8249_v6  ;;  %v10061_v16 = vpop.f32.mrf.mxu0  ;;  %v2273_v6 = vld [vmem:[%s9532_s26 + $0x134] sm:$0xff] }
 0x11d   : > { %11944 = vst [vmem:[#allocation4_spill] sm:$0xff] %v10061_v16  ;;  %v10063_v40 = vpop.f32.mrf.mxu1  ;;  %v2598_v30 = vld [vmem:[%s9532_s26 + $0x135] sm:$0xff] }
 0x11e   : > { %11945 = vst [vmem:[#allocation5_spill] sm:$0xff] %v10063_v40  ;;  %v8292_v43 = vpop.f32.mrf.mxu0  ;;  %8467 = vmatmul.mubr.msk.bf16.gmra.mxu0 %vm469_vm1, %v9885_v20  ;;  %v2597_v20 = vld [vmem:[%s9532_s26 + $0x12d] sm:$0xff] }
 0x11f   : > { %v1230_v48 = vadd.f32 %v8292_v43, %v9899_v34  ;;  %v8330_v14 = vpop.f32.mrf.mxu1  ;;  %8505 = vmatmul.mubr.msk.bf16.gmra.mxu1 %vm469_vm1, %v2613_v28  ;;  %8470 = vmatprep.mubr.msk.bf16.mxu0 %vm469_vm1, %v9905_v41  ;;  %v2616_v7 = vpack.c.bf16 %v2597_v20, %v2596_v58  ;;  %v2889_v43 = vld [vmem:[%s9532_s26 + $0x26] sm:$0xff] }
 0x120   : > { %v1085_v49 = vpop.f32.mrf.mxu0  ;;  %8508 = vmatprep.mubr.msk.bf16.mxu1 %vm469_vm1, %v2614_v36  ;;  %v2599_v36 = vld [vmem:[%s9532_s26 + $0x13d] sm:$0xff] }
 0x121   : > { %v1228_v56 = vadd.f32 %v1085_v49, %v9903_v37  ;;  %v10075_v42 = vadd.f32 %v8330_v14, %v1230_v48  ;;  %v1410_v2 = vpop.f32.mrf.mxu1  ;;  %v2890_v48 = vld [vmem:[%s9532_s26 + $0x2e] sm:$0xff] }
 0x122   : > { %v8293_v61 = vpop.f32.mrf.mxu0  ;;  %v2925_v58 = vpack.c.bf16 %v2890_v48, %v2889_v43 }
 0x123   : > { %v1231_v34 = vadd.f32 %v8293_v61, %v9907_v45  ;;  %v10080_v4 = vadd.f32 %v1410_v2, %v1228_v56  ;;  %v8331_v41 = vpop.f32.mrf.mxu1  ;;  %v2617_v2 = vpack.c.bf16 %v2599_v36, %v2598_v30 }
 0x124   : > { %v1088_v13 = vpop.f32.mrf.mxu0 }
 0x125   : > { %v10083_v37 = vadd.f32 %v1088_v13, %v9913_v51  ;;  %v10085_v15 = vadd.f32 %v8331_v41, %v1231_v34  ;;  %v10087_v22 = vpop.f32.mrf.mxu1  ;;  %v2274_v51 = vld [vmem:[%s9532_s26 + $0x13c] sm:$0xff] }
 0x126   : > { %v8296_v44 = vpop.f32.mrf.mxu0  ;;  %8471 = vmatmul.mubr.msk.bf16.gmra.mxu0 %vm469_vm1, %v9909_v47  ;;  %v2292_v52 = vpack.c.bf16 %v2274_v51, %v2273_v6  ;;  %v2891_v13 = vld [vmem:[%s9532_s26 + $0x36] sm:$0xff] }
 0x127   : > { %v1234_v45 = vadd.f32 %v8296_v44, %v9923_v60  ;;  %v8334_v19 = vpop.f32.mrf.mxu1  ;;  %8509 = vmatmul.mubr.msk.bf16.gmra.mxu1 %vm469_vm1, %v2615_v10  ;;  %8474 = vmatprep.mubr.msk.bf16.mxu0 %vm469_vm1, %v9929_v26 }
 0x128   : > { %v1101_v28 = vpop.f32.mrf.mxu0  ;;  %8512 = vmatprep.mubr.msk.bf16.mxu1 %vm469_vm1, %v2616_v7  ;;  %v2892_v7 = vld [vmem:[%s9532_s26 + $0x3e] sm:$0xff] }
 0x129   : > { %v1232_v14 = vadd.f32 %v1101_v28, %v9927_v63  ;;  %v10103_v47 = vadd.f32 %v8334_v19, %v1234_v45  ;;  %v1426_v60 = vpop.f32.mrf.mxu1  ;;  %v2893_v45 = vld [vmem:[%s9532_s26 + $0x46] sm:$0xff]  ;;  %v2926_v28 = vpack.c.bf16 %v2892_v7, %v2891_v13 }
 0x12a   : > { %v8297_v49 = vpop.f32.mrf.mxu0 }
 0x12b   : > { %v1235_v53 = vadd.f32 %v8297_v49, %v9931_v8  ;;  %v10106_v26 = vadd.f32 %v1426_v60, %v1232_v14  ;;  %v8335_v56 = vpop.f32.mrf.mxu1 }
 0x12c   : > { %v1104_v20 = vpop.f32.mrf.mxu0 }
 0x12d   : > { %v10109_v61 = vadd.f32 %v1104_v20, %v9933_v12  ;;  %v10111_v63 = vadd.f32 %v8335_v56, %v1235_v53  ;;  %v10113_v34 = vpop.f32.mrf.mxu1  ;;  %v2894_v12 = vld [vmem:[%s9532_s26 + $0x4e] sm:$0xff]  ;;  %v2895_v56 = vld [vmem:[%s9532_s26 + $0x56] sm:$0xff]  ;;  %v2897_v20 = vld [vmem:[%s9532_s26 + $0x66] sm:$0xff] }
 0x12e   : > { %v8300_v41 = vpop.f32.mrf.mxu0  ;;  %8475 = vmatmul.mubr.msk.bf16.gmra.mxu0 %vm469_vm1, %v2292_v52  ;;  %v2927_v48 = vpack.c.bf16 %v2894_v12, %v2893_v45 }
 0x12f   : > { %v1238_v8 = vadd.f32 %v8300_v41, %v9944_v23  ;;  %v8338_v10 = vpop.f32.mrf.mxu1  ;;  %8513 = vmatmul.mubr.msk.bf16.gmra.mxu1 %vm469_vm1, %v2617_v2  ;;  %8518 = vmatprep.mubr.msk.bf16.mxu0 %vm469_vm1, %v2925_v58  ;;  %v2896_v2 = vld [vmem:[%s9532_s26 + $0x5e] sm:$0xff]  ;;  %v2898_v41 = vld [vmem:[%s9532_s26 + $0x6e] sm:$0xff] }
 0x130   : > { %v1117_v44 = vpop.f32.mrf.mxu0  ;;  %v2928_v7 = vpack.c.bf16 %v2896_v2, %v2895_v56  ;;  %v2929_v12 = vpack.c.bf16 %v2898_v41, %v2897_v20 }
 0x131   : > { %v1236_v19 = vadd.f32 %v1117_v44, %v9947_v27  ;;  %v10124_v6 = vadd.f32 %v8338_v10, %v1238_v8  ;;  %v1442_v51 = vpop.f32.mrf.mxu1 }
 0x132   : > { %v8301_v30 = vpop.f32.mrf.mxu0 }
 0x133   : > { %v1239_v23 = vadd.f32 %v8301_v30, %v9949_v33  ;;  %v10127_v36 = vadd.f32 %v1442_v51, %v1236_v19  ;;  %v8339_v43 = vpop.f32.mrf.mxu1 }
 0x134   : > { %v1120_v14 = vpop.f32.mrf.mxu0 }
 0x135   : > { %v10130_v60 = vadd.f32 %v1120_v14, %v9953_v39  ;;  %v10132_v27 = vadd.f32 %v8339_v43, %v1239_v23  ;;  %v10134_v49 = vpop.f32.mrf.mxu1  ;;  %v2899_v43 = vld [vmem:[%s9532_s26 + $0x76] sm:$0xff] }
 0x136   : > { %v8304_v52 = vpop.f32.mrf.mxu0  ;;  %8519 = vmatmul.mubr.msk.bf16.vlgmr.msra.gmra.mxu0 %vm469_vm1, %v2926_v28 }
 0x137   : > { %v1242_v53 = vadd.f32 %v8304_v52, %v9960_v46  ;;  %v8342_v33 = vpop.f32.mrf.mxu1  ;;  %8522 = vmatprep.mubr.msk.bf16.mxu0 %vm469_vm1, %v2927_v48  ;;  %v2900_v48 = vld [vmem:[%s9532_s26 + $0x7e] sm:$0xff]  ;;  %v2901_v52 = vld [vmem:[%s9532_s26 + $0x86] sm:$0xff] }
 0x138   : > { %v1133_v58 = vpop.f32.mrf.mxu0 }
 0x139   : > { %v1240_v39 = vadd.f32 %v1133_v58, %v9967_v55  ;;  %v10144_v8 = vadd.f32 %v8342_v33, %v1242_v53  ;;  %v1458_v10 = vpop.f32.mrf.mxu1  ;;  %v2902_v53 = vld [vmem:[%s9532_s26 + $0x8e] sm:$0xff]  ;;  %v2930_v58 = vpack.c.bf16 %v2900_v48, %v2899_v43 }
 0x13a   : > { %v8305_v13 = vpop.f32.mrf.mxu0 }
 0x13b   : > { %v1243_v44 = vadd.f32 %v8305_v13, %v9969_v59  ;;  %v10147_v46 = vadd.f32 %v1458_v10, %v1240_v39  ;;  %v8343_v45 = vpop.f32.mrf.mxu1  ;;  %v2931_v39 = vpack.c.bf16 %v2902_v53, %v2901_v52 }
 0x13c   : > { %v1136_v19 = vpop.f32.mrf.mxu0 }
 0x13d   : > { %v10150_v51 = vadd.f32 %v1136_v19, %v9971_v0  ;;  %v10152_v55 = vadd.f32 %v8343_v45, %v1243_v44  ;;  %v10154_v30 = vpop.f32.mrf.mxu1  ;;  %v2904_v19 = vld [vmem:[%s9532_s26 + $0x9e] sm:$0xff] }
 0x13e   : > { %v8308_v28 = vpop.f32.mrf.mxu0  ;;  %8523 = vmatmul.mubr.msk.bf16.gmra.mxu0 %vm469_vm1, %v2928_v7 }
 0x13f   : > { %v1246_v23 = vadd.f32 %v8308_v28, %v9978_v9  ;;  %v8346_v59 = vpop.f32.mrf.mxu1  ;;  %8526 = vmatprep.mubr.msk.bf16.mxu0 %vm469_vm1, %v2929_v12  ;;  %v2903_v12 = vld [vmem:[%s9532_s26 + $0x96] sm:$0xff] }
 0x140   : > { %v1149_v14 = vpop.f32.mrf.mxu0  ;;  %v2932_v52 = vpack.c.bf16 %v2904_v19, %v2903_v12  ;;  %v2910_v12 = vld [vmem:[%s9532_s26 + $0xce] sm:$0xff] }
 0x141   : > { %v1244_v0 = vadd.f32 %v1149_v14, %v9985_v21  ;;  %v10164_v33 = vadd.f32 %v8346_v59, %v1246_v23  ;;  %v1474_v56 = vpop.f32.mrf.mxu1  ;;  %v2905_v23 = vld [vmem:[%s9532_s26 + $0xa6] sm:$0xff]  ;;  %v2906_v59 = vld [vmem:[%s9532_s26 + $0xae] sm:$0xff] }
 0x142   : > { %v8309_v2 = vpop.f32.mrf.mxu0 }
 0x143   : > { %v1247_v20 = vadd.f32 %v8309_v2, %v9987_v25  ;;  %v10167_v9 = vadd.f32 %v1474_v56, %v1244_v0  ;;  %v8347_v41 = vpop.f32.mrf.mxu1  ;;  %v2933_v56 = vpack.c.bf16 %v2906_v59, %v2905_v23 }
 0x144   : > { %v1152_v10 = vpop.f32.mrf.mxu0 }
 0x145   : > { %v10170_v13 = vadd.f32 %v1152_v10, %v9989_v31  ;;  %v10172_v21 = vadd.f32 %v8347_v41, %v1247_v20  ;;  %v10174_v7 = vpop.f32.mrf.mxu1  ;;  %v2907_v10 = vld [vmem:[%s9532_s26 + $0xb6] sm:$0xff] }
 0x146   : > { %11947 = vst [vmem:[#allocation7_spill] sm:$0xff] %v10174_v7  ;;  %v8312_v44 = vpop.f32.mrf.mxu0  ;;  %8527 = vmatmul.mubr.msk.bf16.gmra.mxu0 %vm469_vm1, %v2930_v58 }
 0x147   : > { %11946 = vst [vmem:[#allocation6_spill] sm:$0xff] %v10170_v13  ;;  %v1250_v45 = vadd.f32 %v8312_v44, %v9996_v3  ;;  %v8350_v25 = vpop.f32.mrf.mxu1  ;;  %8530 = vmatprep.mubr.msk.bf16.mxu0 %vm469_vm1, %v2931_v39  ;;  %v2908_v44 = vld [vmem:[%s9532_s26 + $0xbe] sm:$0xff] }
 0x148   : > { %v1165_v28 = vpop.f32.mrf.mxu0  ;;  %v2934_v59 = vpack.c.bf16 %v2908_v44, %v2907_v10  ;;  %v2913_v10 = vld [vmem:[%s9532_s26 + $0xe6] sm:$0xff]  ;;  %v2914_v44 = vld [vmem:[%s9532_s26 + $0xee] sm:$0xff] }
 0x149   : > { %v1248_v31 = vadd.f32 %v1165_v28, %v10003_v50  ;;  %v10184_v43 = vadd.f32 %v8350_v25, %v1250_v45  ;;  %v1490_v48 = vpop.f32.mrf.mxu1  ;;  %v2909_v25 = vld [vmem:[%s9532_s26 + $0xc6] sm:$0xff] }
 0x14a   : > { %v8313_v14 = vpop.f32.mrf.mxu0 }
 0x14b   : > { %v1251_v53 = vadd.f32 %v8313_v14, %v10005_v5  ;;  %v10187_v3 = vadd.f32 %v1490_v48, %v1248_v31  ;;  %v8351_v0 = vpop.f32.mrf.mxu1  ;;  %v2935_v14 = vpack.c.bf16 %v2910_v12, %v2909_v25 }
 0x14c   : > { %v1168_v2 = vpop.f32.mrf.mxu0 }
 0x14d   : > { %v10190_v58 = vadd.f32 %v1168_v2, %v10007_v17  ;;  %v10192_v50 = vadd.f32 %v8351_v0, %v1251_v53  ;;  %v10194_v20 = vpop.f32.mrf.mxu1 }
 0x14e   : > { %11949 = vst [vmem:[#allocation9_spill] sm:$0xff] %v10194_v20  ;;  %v8316_v41 = vpop.f32.mrf.mxu0  ;;  %8531 = vmatmul.mubr.msk.bf16.gmra.mxu0 %vm469_vm1, %v2932_v52 }
 0x14f   : > { %11948 = vst [vmem:[#allocation8_spill] sm:$0xff] %v10190_v58  ;;  %v1254_v39 = vadd.f32 %v8316_v41, %v10014_v1  ;;  %v8354_v5 = vpop.f32.mrf.mxu1  ;;  %8534 = vmatprep.mubr.msk.bf16.mxu0 %vm469_vm1, %v2933_v56  ;;  %v2911_v41 = vld [vmem:[%s9532_s26 + $0xd6] sm:$0xff] }
 0x150   : > { %v1181_v45 = vpop.f32.mrf.mxu0 }
 0x151   : > { %v1252_v17 = vadd.f32 %v1181_v45, %v10021_v18  ;;  %v10204_v19 = vadd.f32 %v8354_v5, %v1254_v39  ;;  %v1506_v28 = vpop.f32.mrf.mxu1  ;;  %v2912_v39 = vld [vmem:[%s9532_s26 + $0xde] sm:$0xff] }
 0x152   : > { %v8317_v23 = vpop.f32.mrf.mxu0 }
 0x153   : > { %v1255_v31 = vadd.f32 %v8317_v23, %v10023_v24  ;;  %v10207_v1 = vadd.f32 %v1506_v28, %v1252_v17  ;;  %v8355_v48 = vpop.f32.mrf.mxu1  ;;  %v2936_v17 = vpack.c.bf16 %v2912_v39, %v2911_v41  ;;  %v2917_v39 = vld [vmem:[%s9532_s26 + $0x106] sm:$0xff] }
 0x154   : > { %v1184_v52 = vpop.f32.mrf.mxu0 }
 0x155   : > { %v10210_v53 = vadd.f32 %v1184_v52, %v10025_v29  ;;  %v10212_v18 = vadd.f32 %v8355_v48, %v1255_v31  ;;  %v10214_v0 = vpop.f32.mrf.mxu1 }
 0x156   : > { %11951 = vst [vmem:[#allocation11_spill] sm:$0xff] %v10214_v0  ;;  %v8320_v56 = vpop.f32.mrf.mxu0  ;;  %8535 = vmatmul.mubr.msk.bf16.gmra.mxu0 %vm469_vm1, %v2934_v59  ;;  %v2937_v59 = vpack.c.bf16 %v2914_v44, %v2913_v10 }
 0x157   : > { %11950 = vst [vmem:[#allocation10_spill] sm:$0xff] %v10210_v53  ;;  %v1258_v2 = vadd.f32 %v8320_v56, %v10032_v38  ;;  %v8358_v24 = vpop.f32.mrf.mxu1  ;;  %8538 = vmatprep.mubr.msk.bf16.mxu0 %vm469_vm1, %v2935_v14 }
 0x158   : > { %v1197_v5 = vpop.f32.mrf.mxu0 }
 0x159   : > { %v1256_v29 = vadd.f32 %v1197_v5, %v10039_v32  ;;  %v10224_v45 = vadd.f32 %v8358_v24, %v1258_v2  ;;  %v1522_v25 = vpop.f32.mrf.mxu1  ;;  %v2915_v2 = vld [vmem:[%s9532_s26 + $0xf6] sm:$0xff]  ;;  %v2916_v24 = vld [vmem:[%s9532_s26 + $0xfe] sm:$0xff]  ;;  %v2918_v5 = vld [vmem:[%s9532_s26 + $0x10e] sm:$0xff] }
 0x15a   : > { %v8321_v12 = vpop.f32.mrf.mxu0 }
 0x15b   : > { %v1259_v28 = vadd.f32 %v8321_v12, %v10041_v57  ;;  %v10227_v38 = vadd.f32 %v1522_v25, %v1256_v29  ;;  %v8359_v23 = vpop.f32.mrf.mxu1  ;;  %v2938_v25 = vpack.c.bf16 %v2916_v24, %v2915_v2  ;;  %v2921_v24 = vld [vmem:[%s9532_s26 + $0x126] sm:$0xff] }
 0x15c   : > { %v1200_v31 = vpop.f32.mrf.mxu0 }
 0x15d   : > { %v10230_v48 = vadd.f32 %v1200_v31, %v10043_v62  ;;  %v10232_v32 = vadd.f32 %v8359_v23, %v1259_v28  ;;  %v10234_v14 = vpop.f32.mrf.mxu1  ;;  %v2939_v28 = vpack.c.bf16 %v2918_v5, %v2917_v39 }
 0x15e   : > { %11953 = vst [vmem:[#allocation13_spill] sm:$0xff] %v10234_v14  ;;  %v8324_v52 = vpop.f32.mrf.mxu0  ;;  %8539 = vmatmul.mubr.msk.bf16.gmra.mxu0 %vm469_vm1, %v2936_v17 }
 0x15f   : > { %11952 = vst [vmem:[#allocation12_spill] sm:$0xff] %v10230_v48  ;;  %v1262_v56 = vadd.f32 %v8324_v52, %v10050_v11  ;;  %v8362_v57 = vpop.f32.mrf.mxu1  ;;  %8542 = vmatprep.mubr.msk.bf16.mxu0 %vm469_vm1, %v2937_v59 }
 0x160   : > { %v1213_v41 = vpop.f32.mrf.mxu0 }
 0x161   : > { %v1260_v62 = vadd.f32 %v1213_v41, %v10057_v54  ;;  %v10244_v10 = vadd.f32 %v8362_v57, %v1262_v56  ;;  %v1538_v44 = vpop.f32.mrf.mxu1  ;;  %v2920_v57 = vld [vmem:[%s9532_s26 + $0x11e] sm:$0xff]  ;;  %v2922_v41 = vld [vmem:[%s9532_s26 + $0x12e] sm:$0xff] }
 0x162   : > { %v8325_v29 = vpop.f32.mrf.mxu0 }
 0x163   : > { %v1263_v11 = vadd.f32 %v8325_v29, %v10059_v35  ;;  %v10247_v12 = vadd.f32 %v1538_v44, %v1260_v62  ;;  %v8363_v17 = vpop.f32.mrf.mxu1  ;;  %v2919_v35 = vld [vmem:[%s9532_s26 + $0x116] sm:$0xff] }
 0x164   : > { %v10249_v23 = vpop.f32.mrf.mxu0  ;;  %v2940_v29 = vpack.c.bf16 %v2920_v57, %v2919_v35  ;;  %v2923_v35 = vld [vmem:[%s9532_s26 + $0x136] sm:$0xff] }
 0x165   : > { %11954 = vst [vmem:[#allocation14_spill] sm:$0xff] %v10249_v23  ;;  %v10251_v59 = vadd.f32 %v8363_v17, %v1263_v11  ;;  %v10253_v54 = vpop.f32.mrf.mxu1  ;;  %v2941_v17 = vpack.c.bf16 %v2922_v41, %v2921_v24 }
 0x166   : > { %11955 = vst [vmem:[#allocation15_spill] sm:$0xff] %v10253_v54  ;;  %v8368_v31 = vpop.f32.mrf.mxu0  ;;  %8543 = vmatmul.mubr.msk.bf16.gmra.mxu0 %vm469_vm1, %v2938_v25 }
 0x167   : > { %v1880_v52 = vadd.f32 %v8368_v31, %v10075_v42  ;;  %v8406_v56 = vpop.f32.mrf.mxu1  ;;  %8546 = vmatprep.mubr.msk.bf16.mxu0 %vm469_vm1, %v2939_v28 }
 0x168   : > { %v1735_v2 = vpop.f32.mrf.mxu0 }
 0x169   : > { %v1878_v39 = vadd.f32 %v1735_v2, %v10080_v4  ;;  %v10263_v5 = vadd.f32 %v8406_v56, %v1880_v52  ;;  %v2060_v62 = vpop.f32.mrf.mxu1 }
 0x16a   : > { %v8369_v44 = vpop.f32.mrf.mxu0 }
 0x16b   : > { %v1881_v25 = vadd.f32 %v8369_v44, %v10085_v15  ;;  %v10266_v42 = vadd.f32 %v2060_v62, %v1878_v39  ;;  %v8407_v11 = vpop.f32.mrf.mxu1  ;;  %v2924_v15 = vld [vmem:[%s9532_s26 + $0x13e] sm:$0xff] }
 0x16c   : > { %v10268_v28 = vpop.f32.mrf.mxu0  ;;  %v2942_v62 = vpack.c.bf16 %v2924_v15, %v2923_v35 }
 0x16d   : > { %v10270_v31 = vadd.f32 %v8407_v11, %v1881_v25  ;;  %v10272_v54 = vpop.f32.mrf.mxu1 }
 0x16e   : > { %v8372_v4 = vpop.f32.mrf.mxu0  ;;  %8547 = vmatmul.mubr.msk.bf16.gmra.mxu0 %vm469_vm1, %v2940_v29 }
 0x16f   : > { %v1884_v52 = vadd.f32 %v8372_v4, %v10103_v47  ;;  %v8410_v56 = vpop.f32.mrf.mxu1  ;;  %8550 = vmatprep.mubr.msk.bf16.mxu0 %vm469_vm1, %v2941_v17 }
 0x170   : > { %v1751_v57 = vpop.f32.mrf.mxu0 }
 0x171   : > { %v1882_v2 = vadd.f32 %v1751_v57, %v10106_v26  ;;  %v10280_v24 = vadd.f32 %v8410_v56, %v1884_v52  ;;  %v2076_v41 = vpop.f32.mrf.mxu1 }
 0x172   : > { %v8373_v39 = vpop.f32.mrf.mxu0 }
 0x173   : > { %v1885_v44 = vadd.f32 %v8373_v39, %v10111_v63  ;;  %v10283_v25 = vadd.f32 %v2076_v41, %v1882_v2  ;;  %v8411_v29 = vpop.f32.mrf.mxu1 }
 0x174   : > { %v10285_v11 = vpop.f32.mrf.mxu0 }
 0x175   : > { %v10287_v47 = vadd.f32 %v8411_v29, %v1885_v44  ;;  %v10289_v17 = vpop.f32.mrf.mxu1 }
 0x176   : > { %v8376_v4 = vpop.f32.mrf.mxu0  ;;  %8551 = vmatmul.mubr.msk.bf16.gmra.mxu0 %vm469_vm1, %v2942_v62 }
 0x177   : > { %v1888_v26 = vadd.f32 %v8376_v4, %v10124_v6  ;;  %v8414_v52 = vpop.f32.mrf.mxu1 }
 0x178   : > { %v1767_v56 = vpop.f32.mrf.mxu0 }
 0x179   : > { %v1886_v35 = vadd.f32 %v1767_v56, %v10127_v36  ;;  %v10294_v15 = vadd.f32 %v8414_v52, %v1888_v26  ;;  %v2092_v63 = vpop.f32.mrf.mxu1 }
 0x17a   : > { %v8377_v57 = vpop.f32.mrf.mxu0 }
 0x17b   : > { %v1889_v2 = vadd.f32 %v8377_v57, %v10132_v27  ;;  %v10297_v41 = vadd.f32 %v2092_v63, %v1886_v35  ;;  %v8415_v39 = vpop.f32.mrf.mxu1 }
 0x17c   : > { %v10299_v44 = vpop.f32.mrf.mxu0 }
 0x17d   : > { %v10301_v29 = vadd.f32 %v8415_v39, %v1889_v2  ;;  %v10303_v62 = vpop.f32.mrf.mxu1 }
 0x17e   : > { %v8380_v6 = vpop.f32.mrf.mxu0 }
 0x17f   : > { %v1892_v4 = vadd.f32 %v8380_v6, %v10144_v8  ;;  %v8418_v23 = vpop.f32.mrf.mxu1 }
 0x180   : > { %v1783_v36 = vpop.f32.mrf.mxu0 }
 0x181   : > { %v1890_v26 = vadd.f32 %v1783_v36, %v10147_v46  ;;  %v10307_v52 = vadd.f32 %v8418_v23, %v1892_v4  ;;  %v2108_v56 = vpop.f32.mrf.mxu1 }
 0x182   : > { %v8381_v27 = vpop.f32.mrf.mxu0 }
 0x183   : > { %v1893_v35 = vadd.f32 %v8381_v27, %v10152_v55  ;;  %v10310_v63 = vadd.f32 %v2108_v56, %v1890_v26  ;;  %v8419_v57 = vpop.f32.mrf.mxu1 }
 0x184   : > { %v10312_v2 = vpop.f32.mrf.mxu0 }
 0x185   : > { %v10314_v39 = vadd.f32 %v8419_v57, %v1893_v35  ;;  %v10316_v40 = vpop.f32.mrf.mxu1 }
 0x186   : > { %v8384_v8 = vpop.f32.mrf.mxu0 }
 0x187   : > { %v1896_v6 = vadd.f32 %v8384_v8, %v10164_v33  ;;  %v8422_v16 = vpop.f32.mrf.mxu1 }
 0x188   : > { %v1799_v46 = vpop.f32.mrf.mxu0 }
 0x189   : > { %v1894_v23 = vadd.f32 %v1799_v46, %v10167_v9  ;;  %v10320_v4 = vadd.f32 %v8422_v16, %v1896_v6  ;;  %v2124_v36 = vpop.f32.mrf.mxu1 }
 0x18a   : > { %v8385_v55 = vpop.f32.mrf.mxu0 }
 0x18b   : > { %v1897_v26 = vadd.f32 %v8385_v55, %v10172_v21  ;;  %v10323_v56 = vadd.f32 %v2124_v36, %v1894_v23  ;;  %v8423_v27 = vpop.f32.mrf.mxu1 }
 0x18c   : > { %v10325_v35 = vpop.f32.mrf.mxu0 }
 0x18d   : > { %11956 = vst [vmem:[#allocation16_spill] sm:$0xff] %v10325_v35  ;;  %v10327_v57 = vadd.f32 %v8423_v27, %v1897_v26  ;;  %v10329_v14 = vpop.f32.mrf.mxu1 }
 0x18e   : > { %11957 = vst [vmem:[#allocation17_spill] sm:$0xff] %v10329_v14  ;;  %v8388_v33 = vpop.f32.mrf.mxu0 }
 0x18f   : > { %v1900_v8 = vadd.f32 %v8388_v33, %v10184_v43  ;;  %v8426_v48 = vpop.f32.mrf.mxu1 }
 0x190   : > { %v1815_v9 = vpop.f32.mrf.mxu0 }
 0x191   : > { %v1898_v16 = vadd.f32 %v1815_v9, %v10187_v3  ;;  %v10333_v6 = vadd.f32 %v8426_v48, %v1900_v8  ;;  %v2140_v46 = vpop.f32.mrf.mxu1 }
 0x192   : > { %v8389_v21 = vpop.f32.mrf.mxu0 }
 0x193   : > { %v1901_v23 = vadd.f32 %v8389_v21, %v10192_v50  ;;  %v10336_v36 = vadd.f32 %v2140_v46, %v1898_v16  ;;  %v8427_v55 = vpop.f32.mrf.mxu1 }
 0x194   : > { %v10338_v26 = vpop.f32.mrf.mxu0 }
 0x195   : > { %11958 = vst [vmem:[#allocation18_spill] sm:$0xff] %v10338_v26  ;;  %v10340_v27 = vadd.f32 %v8427_v55, %v1901_v23  ;;  %v10342_v0 = vpop.f32.mrf.mxu1  ;;  %v11936_v23 = vmov 0  }
 0x196   : > { %11959 = vst [vmem:[#allocation19_spill] sm:$0xff] %v10342_v0  ;;  %v8392_v43 = vpop.f32.mrf.mxu0  ;;  %3884 = vmatprep.subr.bf16.mxu1 %v11936_v23 }
 0x197   : > { %v1904_v33 = vadd.f32 %v8392_v43, %v10204_v19  ;;  %v8430_v53 = vpop.f32.mrf.mxu1 }
 0x198   : > { %v1831_v3 = vpop.f32.mrf.mxu0 }
 0x199   : > { %v1902_v48 = vadd.f32 %v1831_v3, %v10207_v1  ;;  %v10346_v8 = vadd.f32 %v8430_v53, %v1904_v33  ;;  %v2156_v9 = vpop.f32.mrf.mxu1 }
 0x19a   : > { %v8393_v50 = vpop.f32.mrf.mxu0 }
 0x19b   : > { %v1905_v16 = vadd.f32 %v8393_v50, %v10212_v18  ;;  %v10349_v46 = vadd.f32 %v2156_v9, %v1902_v48  ;;  %v8431_v21 = vpop.f32.mrf.mxu1 }
 0x19c   : > { %v10352_v55 = vpop.f32.mrf.mxu0 }
 0x19d   : > { %11960 = vst [vmem:[#allocation20_spill] sm:$0xff] %v10352_v55  ;;  %v10354_v0 = vadd.f32 %v8431_v21, %v1905_v16  ;;  %v10356_v19 = vpop.f32.mrf.mxu1 }
 0x19e   : > { %11961 = vst [vmem:[#allocation21_spill] sm:$0xff] %v10356_v19  ;;  %v8396_v43 = vpop.f32.mrf.mxu0 }
 0x19f   : > { %v1908_v1 = vadd.f32 %v8396_v43, %v10224_v45  ;;  %v8434_v53 = vpop.f32.mrf.mxu1 }
 0x1a0   : > { %v1847_v33 = vpop.f32.mrf.mxu0 }
 0x1a1   : > { %v1906_v3 = vadd.f32 %v1847_v33, %v10227_v38  ;;  %v10360_v18 = vadd.f32 %v8434_v53, %v1908_v1  ;;  %v2172_v48 = vpop.f32.mrf.mxu1 }
 0x1a2   : > { %v8397_v9 = vpop.f32.mrf.mxu0 }
 0x1a3   : > { %v1909_v50 = vadd.f32 %v8397_v9, %v10232_v32  ;;  %v10363_v23 = vadd.f32 %v2172_v48, %v1906_v3  ;;  %v8435_v55 = vpop.f32.mrf.mxu1 }
 0x1a4   : > { %v10365_v16 = vpop.f32.mrf.mxu0 }
 0x1a5   : > { %11962 = vst [vmem:[#allocation22_spill] sm:$0xff] %v10365_v16  ;;  %v10367_v21 = vadd.f32 %v8435_v55, %v1909_v50  ;;  %v10369_v19 = vpop.f32.mrf.mxu1 }
 0x1a6   : > { %11963 = vst [vmem:[#allocation23_spill] sm:$0xff] %v10369_v19  ;;  %v8400_v45 = vpop.f32.mrf.mxu0 }
 0x1a7   : > { %v1912_v43 = vadd.f32 %v8400_v45, %v10244_v10  ;;  %v8438_v26 = vpop.f32.mrf.mxu1 }
 0x1a8   : > { %v1863_v38 = vpop.f32.mrf.mxu0 }
 0x1a9   : > { %v1910_v1 = vadd.f32 %v1863_v38, %v10247_v12  ;;  %v10373_v53 = vadd.f32 %v8438_v26, %v1912_v43  ;;  %v2188_v33 = vpop.f32.mrf.mxu1 }
 0x1aa   : > { %v8401_v32 = vpop.f32.mrf.mxu0 }
 0x1ab   : > { %v1913_v3 = vadd.f32 %v8401_v32, %v10251_v59  ;;  %v10376_v48 = vadd.f32 %v2188_v33, %v1910_v1  ;;  %v8439_v9 = vpop.f32.mrf.mxu1 }
 0x1ac   : > { %v10378_v55 = vpop.f32.mrf.mxu0 }
 0x1ad   : > { %11964 = vst [vmem:[#allocation24_spill] sm:$0xff] %v10378_v55  ;;  %v10380_v50 = vadd.f32 %v8439_v9, %v1913_v3  ;;  %v10382_v19 = vpop.f32.mrf.mxu1 }
 0x1ae   : > { %11965 = vst [vmem:[#allocation25_spill] sm:$0xff] %v10382_v19  ;;  %v8444_v10 = vpop.f32.mrf.mxu0 }
 0x1af   : > { %v10385_v45 = vadd.f32 %v8444_v10, %v10263_v5  ;;  %v10387_v12 = vpop.f32.mrf.mxu1 }
 0x1b0   : > { %v2385_v26 = vpop.f32.mrf.mxu0 }
 0x1b1   : > { %v10390_v43 = vadd.f32 %v2385_v26, %v10266_v42  ;;  %v10392_v59 = vpop.f32.mrf.mxu1 }
 0x1b2   : > { %v8445_v38 = vpop.f32.mrf.mxu0 }
 0x1b3   : > { %v10395_v1 = vadd.f32 %v8445_v38, %v10270_v31  ;;  %v10399_v32 = vpop.f32.mrf.mxu1 }
 0x1b4   : > { %v10397_v33 = vpop.f32.mrf.mxu0 }
 0x1b5   : > { %v10404_v9 = vpop.f32.mrf.mxu1 }
 0x1b6   : > { %v8448_v3 = vpop.f32.mrf.mxu0 }
 0x1b7   : > { %v10402_v5 = vadd.f32 %v8448_v3, %v10280_v24  ;;  %v10412_v31 = vpop.f32.mrf.mxu1 }
 0x1b8   : > { %v2401_v10 = vpop.f32.mrf.mxu0 }
 0x1b9   : > { %v10407_v42 = vadd.f32 %v2401_v10, %v10283_v25  ;;  %v10419_v24 = vpop.f32.mrf.mxu1 }
 0x1ba   : > { %v8449_v26 = vpop.f32.mrf.mxu0 }
 0x1bb   : > { %v10410_v19 = vadd.f32 %v8449_v26, %v10287_v47  ;;  %v10427_v47 = vpop.f32.mrf.mxu1 }
 0x1bc   : > { %v10414_v38 = vpop.f32.mrf.mxu0 }
 0x1be   : > { %v8452_v55 = vpop.f32.mrf.mxu0 }
 0x1bf   : > { %v10417_v16 = vadd.f32 %v8452_v55, %v10294_v15  ;;  %v10434_v15 = vpop.f32.mrf.mxu1 }
 0x1c0   : > { %v2417_v3 = vpop.f32.mrf.mxu0 }
 0x1c1   : > { %v10422_v20 = vadd.f32 %v2417_v3, %v10297_v41 }
 0x1c2   : > { %v8453_v25 = vpop.f32.mrf.mxu0 }
 0x1c3   : > { %v10425_v10 = vadd.f32 %v8453_v25, %v10301_v29  ;;  %v10442_v29 = vpop.f32.mrf.mxu1 }
 0x1c4   : > { %v10429_v26 = vpop.f32.mrf.mxu0 }
 0x1c6   : > { %v8456_v58 = vpop.f32.mrf.mxu0 }
 0x1c7   : > { %v10432_v14 = vadd.f32 %v8456_v58, %v10307_v52  ;;  %v10449_v58 = vpop.f32.mrf.mxu1 }
 0x1c8   : > { %v2433_v55 = vpop.f32.mrf.mxu0 }
 0x1c9   : > { %11966 = vst [vmem:[#allocation26_spill] sm:$0xff] %v10432_v14  ;;  %v10437_v35 = vadd.f32 %v2433_v55, %v10310_v63 }
 0x1ca   : > { %v8457_v41 = vpop.f32.mrf.mxu0 }
 0x1cb   : > { %v10440_v3 = vadd.f32 %v8457_v41, %v10314_v39  ;;  %v10457_v39 = vpop.f32.mrf.mxu1 }
 0x1cc   : > { %v10444_v25 = vpop.f32.mrf.mxu0 }
 0x1cd   : > { %11967 = vst [vmem:[#allocation27_spill] sm:$0xff] %v10440_v3  ;;  %11968 = vst [vmem:[#allocation28_spill] sm:$0xff] %v10444_v25 }
 0x1ce   : > { %v8460_v7 = vpop.f32.mrf.mxu0 }
 0x1cf   : > { %v10447_v13 = vadd.f32 %v8460_v7, %v10320_v4  ;;  %v9174_v7 = vld [vmem:[%s11928_s3 + $0x8] ss:$12 sps:$4 sm:$0xff]  }
 0x1d0   : > { %v2449_v52 = vpop.f32.mrf.mxu0  ;;  %8558 = vmatprep.mubr.msk.bf16.mxu0 %vm3805_vm2, %v9174_v7 }
 0x1d1   : > { %11969 = vst [vmem:[#allocation29_spill] sm:$0xff] %v10447_v13  ;;  %v10452_v14 = vadd.f32 %v2449_v52, %v10323_v56  ;;  %v10467_v13 = vpop.f32.mrf.mxu1 }
 0x1d2   : > { %v8461_v63 = vpop.f32.mrf.mxu0 }
 0x1d3   : > { %11970 = vst [vmem:[#allocation30_spill] sm:$0xff] %v10452_v14  ;;  %v10455_v55 = vadd.f32 %v8461_v63, %v10327_v57  ;;  %v9178_v57 = vld [vmem:[%s11928_s3 + $0x4] ss:$12 sps:$4 sm:$0xff]  }
 0x1d4   : > { %v10459_v41 = vpop.f32.mrf.mxu0  ;;  %3916 = vmatprep.mubr.bf16.mxu1 %v9178_v57 }
 0x1d5   : > { %11971 = vst [vmem:[#allocation31_spill] sm:$0xff] %v10455_v55  ;;  %11972 = vst [vmem:[#allocation32_spill] sm:$0xff] %v10459_v41 }
 0x1d6   : > { %v8464_v3 = vpop.f32.mrf.mxu0 }
 0x1d7   : > { %v10465_v4 = vadd.f32 %v8464_v3, %v10333_v6  ;;  %v10479_v6 = vpop.f32.mrf.mxu1 }
 0x1d8   : > { %v2465_v56 = vpop.f32.mrf.mxu0 }
 0x1d9   : > { %11973 = vst [vmem:[#allocation33_spill] sm:$0xff] %v10465_v4  ;;  %v10474_v52 = vadd.f32 %v2465_v56, %v10336_v36  ;;  %v10486_v7 = vpop.f32.mrf.mxu1 }
 0x1da   : > { %v8465_v63 = vpop.f32.mrf.mxu0 }
 0x1db   : > { %v10477_v55 = vadd.f32 %v8465_v63, %v10340_v27  ;;  %v10494_v27 = vpop.f32.mrf.mxu1 }
 0x1dc   : > { %v10481_v3 = vpop.f32.mrf.mxu0 }
 0x1dd   : > { %11974 = vst [vmem:[#allocation34_spill] sm:$0xff] %v10477_v55 }
 0x1de   : > { %v8468_v4 = vpop.f32.mrf.mxu0 }
 0x1df   : > { %v10484_v41 = vadd.f32 %v8468_v4, %v10346_v8  ;;  %v10501_v8 = vpop.f32.mrf.mxu1 }
 0x1e0   : > { %v2481_v14 = vpop.f32.mrf.mxu0 }
 0x1e1   : > { %11975 = vst [vmem:[#allocation35_spill] sm:$0xff] %v10484_v41  ;;  %v10489_v25 = vadd.f32 %v2481_v14, %v10349_v46 }
 0x1e2   : > { %v8469_v36 = vpop.f32.mrf.mxu0 }
 0x1e3   : > { %v10492_v56 = vadd.f32 %v8469_v36, %v10354_v0  ;;  %v10509_v0 = vpop.f32.mrf.mxu1 }
 0x1e4   : > { %v10496_v57 = vpop.f32.mrf.mxu0 }
 0x1e5   : > { %11976 = vst [vmem:[#allocation36_spill] sm:$0xff] %v10492_v56  ;;  %11977 = vst [vmem:[#allocation37_spill] sm:$0xff] %v10496_v57  ;;  %v1554_v57 = vadd.f32 %v10087_v22, %v10083_v37  ;;  %v2855_v22 = vadd.f32 %v10387_v12, %v10385_v45 }
 0x1e6   : > { %v8472_v63 = vpop.f32.mrf.mxu0 }
 0x1e7   : > { %v10499_v55 = vadd.f32 %v8472_v63, %v10360_v18  ;;  %v10518_v63 = vpop.f32.mrf.mxu1 }
 0x1e8   : > { %v2497_v4 = vpop.f32.mrf.mxu0 }
 0x1e9   : > { %11978 = vst [vmem:[#allocation38_spill] sm:$0xff] %v10499_v55  ;;  %v10504_v41 = vadd.f32 %v2497_v4, %v10363_v23  ;;  %v1879_v23 = vadd.f32 %v10268_v28, %v1554_v57 }
 0x1ea   : > { %v8473_v14 = vpop.f32.mrf.mxu0 }
 0x1eb   : > { %v10507_v46 = vadd.f32 %v8473_v14, %v10367_v21  ;;  %v2204_v37 = vadd.f32 %v10272_v54, %v1879_v23  ;;  %v10545_v54 = vld [vmem:[%s11927_s2] ss:$0 sm:$0xff] }
 0x1ec   : > { %v10511_v36 = vpop.f32.mrf.mxu0 }
 0x1ed   : > { %11979 = vst [vmem:[#allocation39_spill] sm:$0xff] %v10507_v46  ;;  %11980 = vst [vmem:[#allocation40_spill] sm:$0xff] %v10511_v36  ;;  %v10527_v46 = vpop.f32.mrf.mxu1 }
 0x1ee   : > { %v8476_v56 = vpop.f32.mrf.mxu0 }
 0x1ef   : > { %v10516_v18 = vadd.f32 %v8476_v56, %v10373_v53  ;;  %v1558_v53 = vadd.f32 %v10113_v34, %v10109_v61  ;;  %v10540_v57 = vpop.f32.mrf.mxu1  ;;  %v2856_v61 = vadd.f32 %v10399_v32, %v10395_v1  ;;  %v1562_v32 = vadd.f32 %v10134_v49, %v10130_v60 }
 0x1f0   : > { %v2513_v55 = vpop.f32.mrf.mxu0 }
 0x1f1   : > { %v10522_v4 = vadd.f32 %v2513_v55, %v10376_v48  ;;  %v2853_v48 = vadd.f32 %v10392_v59, %v10390_v43  ;;  %v2529_v55 = vadd.f32 %v10397_v33, %v2204_v37  ;;  %v1883_v56 = vadd.f32 %v10285_v11, %v1558_v53  ;;  %v10552_v23 = vpop.f32.mrf.mxu1 }
 0x1f2   : > { %v8477_v21 = vpop.f32.mrf.mxu0  ;;  %v2859_v37 = vadd.f32 %v10412_v31, %v10402_v5  ;;  %v1887_v5 = vadd.f32 %v10299_v44, %v1562_v32  ;;  %v2860_v31 = vadd.f32 %v10427_v47, %v10410_v19  ;;  %v2863_v47 = vadd.f32 %v10442_v29, %v10417_v16 }
 0x1f3   : > { %v10525_v14 = vadd.f32 %v8477_v21, %v10380_v50  ;;  %v2854_v43 = vadd.f32 %v10404_v9, %v2529_v55  ;;  %v2208_v11 = vadd.f32 %v10289_v17, %v1883_v56  ;;  %v2857_v9 = vadd.f32 %v10419_v24, %v10407_v42 }
 0x1f4   : > { %v10529_v36 = vpop.f32.mrf.mxu0  ;;  %v2212_v44 = vadd.f32 %v10303_v62, %v1887_v5  ;;  %v2864_v29 = vadd.f32 %v10457_v39, %v10425_v10  ;;  %v11981_v39 = vld [vmem:[#allocation26_spill] sm:$0xff] }
 0x1f6   : > { %v8520_v28 = vpop.f32.mrf.mxu0 }
 0x1f7   : > { %v3180_v50 = vadd.f32 %v8520_v28, %v2855_v22  ;;  %v2533_v28 = vadd.f32 %v10414_v38, %v2208_v11 }
 0x1f8   : > { %v3035_v45 = vpop.f32.mrf.mxu0 }
 0x1f9   : > { %v3178_v34 = vadd.f32 %v3035_v45, %v2853_v48  ;;  %v3223_v59 = vadd.f32 %v10545_v54, %v3180_v50  ;;  %v10567_v45 = vpop.f32.mrf.mxu1 }
 0x1fa   : > { %v8521_v12 = vpop.f32.mrf.mxu0 }
 0x1fb   : > { %v3181_v33 = vadd.f32 %v8521_v12, %v2856_v61  ;;  %v3221_v22 = vadd.f32 %v10545_v54, %v3178_v34  ;;  %v3259_v48 = vmax.f32 %v3223_v59, 0.0  ;;  %v2858_v34 = vadd.f32 %v10434_v15, %v2533_v28 }
 0x1fc   : > { %v3038_v21 = vpop.f32.mrf.mxu0  ;;  %v1566_v15 = vadd.f32 %v10154_v30, %v10150_v51 }
 0x1fd   : > { %v3224_v53 = vadd.f32 %v10545_v54, %v3181_v33  ;;  %v3179_v1 = vadd.f32 %v3038_v21, %v2854_v43  ;;  %v3257_v60 = vmax.f32 %v3221_v22, 0.0  ;;  %v10576_v33 = vpop.f32.mrf.mxu1  ;;  %v2861_v22 = vadd.f32 %v10449_v58, %v10422_v20 }
 0x1fe   : > { %v8524_v17 = vpop.f32.mrf.mxu0  ;;  %v1891_v16 = vadd.f32 %v10312_v2, %v1566_v15  ;;  %v11986_v15 = vld [vmem:[#allocation27_spill] sm:$0xff] }
 0x1ff   : > { %v3260_v55 = vmax.f32 %v3224_v53, 0.0  ;;  %v3222_v50 = vadd.f32 %v10545_v54, %v3179_v1  ;;  %v3184_v56 = vadd.f32 %v8524_v17, %v2859_v37  ;;  %v2537_v53 = vadd.f32 %v10429_v26, %v2212_v44  ;;  %v10591_v17 = vpop.f32.mrf.mxu1 }
 0x200   : > { %v3051_v61 = vpop.f32.mrf.mxu0  ;;  %v2216_v2 = vadd.f32 %v10316_v40, %v1891_v16 }
 0x201   : > { %v10569_v49 = vpack.c.bf16 %v3260_v55, %v3259_v48  ;;  %v3258_v42 = vmax.f32 %v3222_v50, 0.0  ;;  %v3182_v24 = vadd.f32 %v3051_v61, %v2857_v9  ;;  %v3227_v43 = vadd.f32 %v10545_v54, %v3184_v56 }
 0x202   : > { %v8525_v38 = vpop.f32.mrf.mxu0  ;;  %v2862_v55 = vadd.f32 %v10467_v13, %v2537_v53  ;;  %v2867_v61 = vadd.f32 %v10479_v6, %v11981_v39  ;;  %v11983_v13 = vld [vmem:[#allocation7_spill] sm:$0xff]  ;;  %v11985_v6 = vld [vmem:[#allocation16_spill] sm:$0xff] }
 0x203   : > { %v10572_v12 = vpack.c.bf16 %v3258_v42, %v3257_v60  ;;  %v3185_v59 = vadd.f32 %v8525_v38, %v2860_v31  ;;  %v3225_v11 = vadd.f32 %v10545_v54, %v3182_v24  ;;  %v3263_v1 = vmax.f32 %v3227_v43, 0.0  ;;  %v10600_v31 = vpop.f32.mrf.mxu1  ;;  %v11982_v38 = vld [vmem:[#allocation6_spill] sm:$0xff] }
 0x204   : > { %v3054_v19 = vpop.f32.mrf.mxu0  ;;  %v2865_v43 = vadd.f32 %v10486_v7, %v10437_v35 }
 0x205   : > { %v3228_v21 = vadd.f32 %v10545_v54, %v3185_v59  ;;  %v3183_v37 = vadd.f32 %v3054_v19, %v2858_v34  ;;  %v3261_v51 = vmax.f32 %v3225_v11, 0.0  ;;  %v1570_v34 = vadd.f32 %v11983_v13, %v11982_v38  ;;  %v11984_v59 = vld [vmem:[#allocation28_spill] sm:$0xff]  ;;  %v10615_v53 = vpop.f32.mrf.mxu1 }
 0x206   : > { %v8528_v62 = vpop.f32.mrf.mxu0  ;;  %v2541_v44 = vadd.f32 %v11984_v59, %v2216_v2 }
 0x207   : > { %v3264_v32 = vmax.f32 %v3228_v21, 0.0  ;;  %v3226_v9 = vadd.f32 %v10545_v54, %v3183_v37  ;;  %v3188_v28 = vadd.f32 %v8528_v62, %v2863_v47  ;;  %v1895_v37 = vadd.f32 %v11985_v6, %v1570_v34 }
 0x208   : > { %v3067_v48 = vpop.f32.mrf.mxu0 }
 0x209   : > { %v10593_v30 = vpack.c.bf16 %v3264_v32, %v3263_v1  ;;  %v3262_v20 = vmax.f32 %v3226_v9, 0.0  ;;  %v3186_v58 = vadd.f32 %v3067_v48, %v2861_v22  ;;  %v3231_v56 = vadd.f32 %v10545_v54, %v3188_v28 }
 0x20a   : > { %v8529_v26 = vpop.f32.mrf.mxu0  ;;  %v2868_v22 = vadd.f32 %v10494_v27, %v11986_v15  ;;  %v2866_v28 = vadd.f32 %v10501_v8, %v2541_v44  ;;  %v11990_v8 = vld [vmem:[#allocation9_spill] sm:$0xff] }
 0x20b   : > { %v10596_v50 = vpack.c.bf16 %v3262_v20, %v3261_v51  ;;  %v3189_v5 = vadd.f32 %v8529_v26, %v2864_v29  ;;  %v3229_v60 = vadd.f32 %v10545_v54, %v3186_v58  ;;  %v3267_v19 = vmax.f32 %v3231_v56, 0.0  ;;  %v11987_v51 = vld [vmem:[#allocation17_spill] sm:$0xff]  ;;  %v10624_v58 = vpop.f32.mrf.mxu1 }
 0x20c   : > { %v3070_v10 = vpop.f32.mrf.mxu0  ;;  %v2220_v20 = vadd.f32 %v11987_v51, %v1895_v37  ;;  %v11988_v26 = vld [vmem:[#allocation29_spill] sm:$0xff] }
 0x20d   : > { %v3232_v42 = vadd.f32 %v10545_v54, %v3189_v5  ;;  %v3187_v24 = vadd.f32 %v3070_v10, %v2862_v55  ;;  %v3265_v1 = vmax.f32 %v3229_v60, 0.0  ;;  %v2871_v55 = vadd.f32 %v10509_v0, %v11988_v26  ;;  %v11989_v10 = vld [vmem:[#allocation8_spill] sm:$0xff]  ;;  %v11993_v0 = vld [vmem:[#allocation18_spill] sm:$0xff] }
 0x20e   : > { %v8532_v40 = vpop.f32.mrf.mxu0  ;;  %v1574_v39 = vadd.f32 %v11990_v8, %v11989_v10  ;;  %v11998_v26 = vld [vmem:[#allocation10_spill] sm:$0xff] }
 0x20f   : > { %v3268_v47 = vmax.f32 %v3232_v42, 0.0  ;;  %v3230_v11 = vadd.f32 %v10545_v54, %v3187_v24  ;;  %v3192_v21 = vadd.f32 %v8532_v40, %v2867_v61  ;;  %v11991_v61 = vld [vmem:[#allocation30_spill] sm:$0xff]  ;;  %v11992_v42 = vld [vmem:[#allocation32_spill] sm:$0xff]  ;;  %v11994_v40 = vld [vmem:[#allocation31_spill] sm:$0xff] }
 0x210   : > { %v3083_v62 = vpop.f32.mrf.mxu0  ;;  %v2869_v60 = vadd.f32 %v10518_v63, %v11991_v61  ;;  %v2545_v24 = vadd.f32 %v11992_v42, %v2220_v20  ;;  %v1899_v44 = vadd.f32 %v11993_v0, %v1574_v39 }
 0x211   : > { %v10617_v32 = vpack.c.bf16 %v3268_v47, %v3267_v19  ;;  %v3266_v35 = vmax.f32 %v3230_v11, 0.0  ;;  %v3190_v7 = vadd.f32 %v3083_v62, %v2865_v43  ;;  %v3235_v29 = vadd.f32 %v10545_v54, %v3192_v21  ;;  %v10639_v47 = vpop.f32.mrf.mxu1 }
 0x212   : > { %v8533_v9 = vpop.f32.mrf.mxu0  ;;  %v2872_v19 = vadd.f32 %v10527_v46, %v11994_v40 }
 0x213   : > { %v10620_v16 = vpack.c.bf16 %v3266_v35, %v3265_v1  ;;  %v3193_v48 = vadd.f32 %v8533_v9, %v2868_v22  ;;  %v3233_v56 = vadd.f32 %v10545_v54, %v3190_v7  ;;  %v3271_v13 = vmax.f32 %v3235_v29, 0.0  ;;  %v11995_v7 = vld [vmem:[#allocation19_spill] sm:$0xff] }
 0x214   : > { %v3086_v27 = vpop.f32.mrf.mxu0  ;;  %v2870_v22 = vadd.f32 %v10540_v57, %v2545_v24  ;;  %v2224_v9 = vadd.f32 %v11995_v7, %v1899_v44  ;;  %v11996_v29 = vmov 0   ;;  %v12001_v24 = vld [vmem:[#allocation34_spill] sm:$0xff]  ;;  %v12006_v7 = vld [vmem:[#allocation37_spill] sm:$0xff] }
 0x215   : > { %v3236_v5 = vadd.f32 %v10545_v54, %v3193_v48  ;;  %v3191_v2 = vadd.f32 %v3086_v27, %v2866_v28  ;;  %v3269_v21 = vmax.f32 %v3233_v56, 0.0  ;;  %v10644_v28 = vpop.f32.mrf.mxu1  ;;  %v11997_v48 = vld [vmem:[#allocation33_spill] sm:$0xff] }
 0x216   : > { %v8536_v38 = vpop.f32.mrf.mxu0  ;;  %v2875_v51 = vadd.f32 %v10552_v23, %v11997_v48  ;;  %v12000_v23 = vld [vmem:[#allocation20_spill] sm:$0xff] }
 0x217   : > { %v3272_v34 = vmax.f32 %v3236_v5, 0.0  ;;  %v3234_v43 = vadd.f32 %v10545_v54, %v3191_v2  ;;  %v3196_v59 = vadd.f32 %v8536_v38, %v2871_v55  ;;  %v11999_v55 = vld [vmem:[#allocation11_spill] sm:$0xff]  ;;  %v2873_v5 = vadd.f32 %v10567_v45, %v10474_v52 }
 0x218   : > { %v3099_v11 = vpop.f32.mrf.mxu0  ;;  %v1578_v56 = vadd.f32 %v11999_v55, %v11998_v26  ;;  %v2549_v2 = vadd.f32 %v10481_v3, %v2224_v9  ;;  %v2876_v38 = vadd.f32 %v10576_v33, %v12001_v24  ;;  %v12002_v33 = vld [vmem:[#allocation21_spill] sm:$0xff]  ;;  %v12009_v55 = vld [vmem:[#allocation22_spill] sm:$0xff] }
 0x219   : > { %v3300_v6 = vpack.c.bf16 %v3272_v34, %v3271_v13  ;;  %v3270_v37 = vmax.f32 %v3234_v43, 0.0  ;;  %v3194_v63 = vadd.f32 %v3099_v11, %v2869_v60  ;;  %v3239_v1 = vadd.f32 %v10545_v54, %v3196_v59  ;;  %v2822_v13 = vpop.f32.mrf.mxu1 }
 0x21a   : > { %v8537_v15 = vpop.f32.mrf.mxu0  ;;  %v1903_v42 = vadd.f32 %v12000_v23, %v1578_v56  ;;  %v2874_v0 = vadd.f32 %v10591_v17, %v2549_v2 }
 0x21b   : > { %v3299_v62 = vpack.c.bf16 %v3270_v37, %v3269_v21  ;;  %v3197_v35 = vadd.f32 %v8537_v15, %v2872_v19  ;;  %3885 = vmatpush1.bf16.msra.mxu1 %v3300_v6  ;;  %v3237_v20 = vadd.f32 %v10545_v54, %v3194_v63  ;;  %v3275_v8 = vmax.f32 %v3239_v1, 0.0  ;;  %v8511_v21 = vpop.f32.mrf.mxu1  ;;  %v12003_v37 = vld [vmem:[#allocation35_spill] sm:$0xff]  ;;  %v12005_v1 = vld [vmem:[#allocation13_spill] sm:$0xff] }
 0x21c   : > { %v3102_v46 = vpop.f32.mrf.mxu0  ;;  %3886 = vmatprep.subr.bf16.mxu1 %v11996_v29  ;;  %v2228_v11 = vadd.f32 %v12002_v33, %v1903_v42  ;;  %v2879_v63 = vadd.f32 %v10600_v31, %v12003_v37  ;;  %v12007_v31 = vld [vmem:[#allocation4_spill] sm:$0xff]  ;;  %v12014_v33 = vld [vmem:[#allocation15_spill] sm:$0xff] }
 0x21d   : > { %v3240_v27 = vadd.f32 %v10545_v54, %v3197_v35  ;;  %v3195_v57 = vadd.f32 %v3102_v46, %v2870_v22  ;;  %v3273_v43 = vmax.f32 %v3237_v20, 0.0  ;;  %v12015_v37 = vld [vmem:[#allocation40_spill] sm:$0xff] }
 0x21e   : > { %v8540_v10 = vpop.f32.mrf.mxu0  ;;  %v2553_v9 = vadd.f32 %v12006_v7, %v2228_v11 }
 0x21f   : > { %v3276_v39 = vmax.f32 %v3240_v27, 0.0  ;;  %v3238_v61 = vadd.f32 %v10545_v54, %v3195_v57  ;;  %v3200_v60 = vadd.f32 %v8540_v10, %v2875_v51  ;;  %3887 = vmatpush1.bf16.msra.mxu1 %v3299_v62  ;;  %v12004_v62 = vld [vmem:[#allocation12_spill] sm:$0xff]  ;;  %v12008_v57 = vld [vmem:[#allocation5_spill] sm:$0xff]  ;;  %v2825_v10 = vpop.f32.mrf.mxu1 }
 0x220   : > { %v3115_v34 = vpop.f32.mrf.mxu0  ;;  %3888 = vmatprep.subr.bf16.mxu1 %v11996_v29  ;;  %v1582_v35 = vadd.f32 %v12005_v1, %v12004_v62  ;;  %v928_v26 = vadd.f32 %v12008_v57, %v12007_v31  ;;  %v2878_v42 = vadd.f32 %v10639_v47, %v2553_v9 }
 0x221   : > { %v10661_v52 = vpack.c.bf16 %v3276_v39, %v3275_v8  ;;  %v3274_v3 = vmax.f32 %v3238_v61, 0.0  ;;  %v3198_v45 = vadd.f32 %v3115_v34, %v2873_v5  ;;  %v3243_v40 = vadd.f32 %v10545_v54, %v3200_v60  ;;  %v12010_v5 = vld [vmem:[#allocation36_spill] sm:$0xff]  ;;  %v12011_v60 = vld [vmem:[#allocation14_spill] sm:$0xff] }
 0x222   : > { %v8541_v59 = vpop.f32.mrf.mxu0  ;;  %v1907_v56 = vadd.f32 %v12009_v55, %v1582_v35  ;;  %v2880_v2 = vadd.f32 %v10624_v58, %v12010_v5  ;;  %v1261_v23 = vadd.f32 %v12011_v60, %v928_v26  ;;  %v12012_v58 = vld [vmem:[#allocation23_spill] sm:$0xff] }
 0x223   : > { %v10664_v44 = vpack.c.bf16 %v3274_v3, %v3273_v43  ;;  %v3201_v19 = vadd.f32 %v8541_v59, %v2876_v38  ;;  %3889 = vmatpush1.bf16.msra.mxu1 %v10617_v32  ;;  %v3241_v15 = vadd.f32 %v10545_v54, %v3198_v45  ;;  %v2877_v32 = vadd.f32 %v10615_v53, %v10489_v25  ;;  %v8514_v3 = vpop.f32.mrf.mxu1  ;;  %v12013_v59 = vld [vmem:[#allocation38_spill] sm:$0xff]  ;;  %v12017_v35 = vld [vmem:[#allocation39_spill] sm:$0xff] }
 0x224   : > { %v3118_v6 = vpop.f32.mrf.mxu0  ;;  %3890 = vmatprep.subr.bf16.mxu1 %v11996_v29  ;;  %v3279_v48 = vmax.f32 %v3243_v40, 0.0  ;;  %v2232_v43 = vadd.f32 %v12012_v58, %v1907_v56  ;;  %v1586_v11 = vadd.f32 %v12014_v33, %v1261_v23  ;;  %v2887_v56 = vadd.f32 %v8514_v3, %v10516_v18 }
 0x225   : > { %v3244_v17 = vadd.f32 %v10545_v54, %v3201_v19  ;;  %v3199_v22 = vadd.f32 %v3118_v6, %v2874_v0  ;;  %v3277_v53 = vmax.f32 %v3241_v15, 0.0  ;;  %v2883_v0 = vadd.f32 %v10644_v28, %v12013_v59  ;;  %v12016_v28 = vld [vmem:[#allocation24_spill] sm:$0xff]  ;;  %v2838_v7 = vpop.f32.mrf.mxu1 }
 0x226   : > { %v8544_v46 = vpop.f32.mrf.mxu0  ;;  %v2881_v6 = vadd.f32 %v2822_v13, %v10504_v41  ;;  %v1911_v1 = vadd.f32 %v12016_v28, %v1586_v11  ;;  %v9206_v28 = vld [vmem:[%s11928_s3 + $0xc8] ss:$12 sps:$4 sm:$0xff]  }
 0x227   : > { %v3280_v51 = vmax.f32 %v3244_v17, 0.0  ;;  %v3242_v20 = vadd.f32 %v10545_v54, %v3199_v22  ;;  %v3204_v27 = vadd.f32 %v8544_v46, %v2879_v63  ;;  %3891 = vmatpush1.bf16.msra.mxu1 %v10620_v16  ;;  %v8515_v55 = vpop.f32.mrf.mxu1 }
 0x228   : > { %v3131_v25 = vpop.f32.mrf.mxu0  ;;  %3892 = vmatprep.subr.bf16.mxu1 %v11996_v29 }
 0x229   : > { %v10687_v8 = vpack.c.bf16 %v3280_v51, %v3279_v48  ;;  %v3278_v39 = vmax.f32 %v3242_v20, 0.0  ;;  %v3202_v61 = vadd.f32 %v3131_v25, %v2877_v32  ;;  %v3247_v38 = vadd.f32 %v10545_v54, %v3204_v27  ;;  %v2841_v18 = vpop.f32.mrf.mxu1 }
 0x22a   : > { %v8545_v16 = vpop.f32.mrf.mxu0  ;;  %v2884_v32 = vadd.f32 %v8511_v21, %v12017_v35  ;;  %v9189_v35 = vld [vmem:[%s11928_s3 + $0x4c] ss:$12 sps:$4 sm:$0xff]  }
 0x22b   : > { %v10691_v24 = vpack.c.bf16 %v3278_v39, %v3277_v53  ;;  %v3205_v34 = vadd.f32 %v8545_v16, %v2880_v2  ;;  %3893 = vmatpush1.bf16.msra.mxu1 %v10593_v30  ;;  %v3245_v40 = vadd.f32 %v10545_v54, %v3202_v61  ;;  %v2557_v30 = vadd.f32 %v12015_v37, %v2232_v43 }
 0x22c   : > { %v3134_v45 = vpop.f32.mrf.mxu0  ;;  %3894 = vmatprep.subr.bf16.mxu1 %v11996_v29  ;;  %v3283_v15 = vmax.f32 %v3247_v38, 0.0  ;;  %v2888_v16 = vadd.f32 %v8515_v55, %v10525_v14  ;;  %v9200_v55 = vld [vmem:[%s11928_s3 + $0x90] ss:$12 sps:$4 sm:$0xff]  }
 0x22d   : > { %v3248_v47 = vadd.f32 %v10545_v54, %v3205_v34  ;;  %v3203_v19 = vadd.f32 %v3134_v45, %v2878_v42  ;;  %v3281_v46 = vmax.f32 %v3245_v40, 0.0  ;;  %v2882_v20 = vadd.f32 %v2825_v10, %v2557_v30 }
 0x22e   : > { %v8548_v63 = vpop.f32.mrf.mxu0  ;;  %v2885_v10 = vadd.f32 %v2838_v7, %v10522_v4  ;;  %v9214_v7 = vld [vmem:[%s11928_s3 + $0xf8] ss:$12 sps:$4 sm:$0xff]  }
 0x22f   : > { %v3284_v17 = vmax.f32 %v3248_v47, 0.0  ;;  %v3246_v22 = vadd.f32 %v10545_v54, %v3203_v19  ;;  %v3208_v62 = vadd.f32 %v8548_v63, %v2883_v0  ;;  %3895 = vmatpush1.bf16.msra.mxu1 %v10596_v50  ;;  %v12018_v50 = vld [vmem:[#allocation25_spill] sm:$0xff]  ;;  %v9175_v63 = vld [vmem:[%s11928_s3 + $0x20] ss:$12 sps:$4 sm:$0xff]  }
 0x230   : > { %v3147_v9 = vpop.f32.mrf.mxu0  ;;  %3896 = vmatprep.subr.bf16.mxu1 %v11996_v29  ;;  %v2236_v26 = vadd.f32 %v12018_v50, %v1911_v1  ;;  %v9184_v1 = vld [vmem:[%s11928_s3 + $0x30] ss:$12 sps:$4 sm:$0xff]  }
 0x231   : > { %v3306_v41 = vpack.c.bf16 %v3284_v17, %v3283_v15  ;;  %v3282_v13 = vmax.f32 %v3246_v22, 0.0  ;;  %v3206_v48 = vadd.f32 %v3147_v9, %v2881_v6  ;;  %v3251_v31 = vadd.f32 %v10545_v54, %v3208_v62  ;;  %v9183_v15 = vld [vmem:[%s11928_s3 + $0x50] ss:$12 sps:$4 sm:$0xff]   ;;  %v9190_v17 = vld [vmem:[%s11928_s3 + $0x68] ss:$12 sps:$4 sm:$0xff]  }
 0x232   : > { %v8549_v51 = vpop.f32.mrf.mxu0  ;;  %v2561_v53 = vadd.f32 %v10529_v36, %v2236_v26  ;;  %v9186_v22 = vld [vmem:[%s11928_s3 + $0x34] ss:$12 sps:$4 sm:$0xff]   ;;  %v9199_v62 = vld [vmem:[%s11928_s3 + $0xb0] ss:$12 sps:$4 sm:$0xff]  }
 0x233   : > { %v3305_v27 = vpack.c.bf16 %v3282_v13, %v3281_v46  ;;  %v3209_v57 = vadd.f32 %v8549_v51, %v2884_v32  ;;  %3897 = vmatpush1.bf16.msra.mxu1 %v10569_v49  ;;  %v3249_v5 = vadd.f32 %v10545_v54, %v3206_v48  ;;  %v3287_v61 = vmax.f32 %v3251_v31, 0.0  ;;  %v9207_v32 = vld [vmem:[%s11928_s3 + $0xe0] ss:$12 sps:$4 sm:$0xff]   ;;  %v9187_v9 = vld [vmem:[%s11928_s3 + $0x48] ss:$12 sps:$4 sm:$0xff]  }
 0x234   : > { %v3150_v21 = vpop.f32.mrf.mxu0  ;;  %3898 = vmatprep.subr.bf16.mxu1 %v11996_v29  ;;  %v2886_v36 = vadd.f32 %v2841_v18, %v2561_v53  ;;  %v9194_v46 = vld [vmem:[%s11928_s3 + $0x64] ss:$12 sps:$4 sm:$0xff]   ;;  %v9222_v13 = vld [vmem:[%s11928_s3 + $0x128] ss:$12 sps:$4 sm:$0xff]   ;;  %v9192_v48 = vld [vmem:[%s11928_s3 + $0x60] ss:$12 sps:$4 sm:$0xff]  }
 0x235   : > { %v3252_v2 = vadd.f32 %v10545_v54, %v3209_v57  ;;  %v3207_v25 = vadd.f32 %v3150_v21, %v2882_v20  ;;  %v3285_v38 = vmax.f32 %v3249_v5, 0.0  ;;  %v9197_v51 = vld [vmem:[%s11928_s3 + $0x7c] ss:$12 sps:$4 sm:$0xff]   ;;  %v9223_v20 = vld [vmem:[%s11928_s3 + $0x140] ss:$12 sps:$4 sm:$0xff]  }
 0x236   : > { %v8552_v39 = vpop.f32.mrf.mxu0  ;;  %v9195_v31 = vld [vmem:[%s11928_s3 + $0x78] ss:$12 sps:$4 sm:$0xff]   ;;  %v9202_v57 = vld [vmem:[%s11928_s3 + $0x94] ss:$12 sps:$4 sm:$0xff]   ;;  %v9231_v50 = vld [vmem:[%s11928_s3 + $0x170] ss:$12 sps:$4 sm:$0xff]  }
 0x237   : > { %v3288_v49 = vmax.f32 %v3252_v2, 0.0  ;;  %v3250_v60 = vadd.f32 %v10545_v54, %v3207_v25  ;;  %v3212_v23 = vadd.f32 %v8552_v39, %v2887_v56  ;;  %3899 = vmatpush1.bf16.msra.mxu1 %v10572_v12  ;;  %v9238_v26 = vld [vmem:[%s11928_s3 + $0x188] ss:$12 sps:$4 sm:$0xff]   ;;  %v9205_v21 = vld [vmem:[%s11928_s3 + $0xac] ss:$12 sps:$4 sm:$0xff]  }
 0x238   : > { %v3163_v42 = vpop.f32.mrf.mxu0  ;;  %3900 = vmatprep.subr.bf16.mxu1 %v11996_v29  ;;  %v9239_v56 = vld [vmem:[%s11928_s3 + $0x1a0] ss:$12 sps:$4 sm:$0xff]   ;;  %v9246_v5 = vld [vmem:[%s11928_s3 + $0x1b8] ss:$12 sps:$4 sm:$0xff]   ;;  %v9203_v2 = vld [vmem:[%s11928_s3 + $0xa8] ss:$12 sps:$4 sm:$0xff]  }
 0x239   : > { %v3308_v34 = vpack.c.bf16 %v3288_v49, %v3287_v61  ;;  %v3286_v58 = vmax.f32 %v3250_v60, 0.0  ;;  %v3210_v4 = vadd.f32 %v3163_v42, %v2885_v10  ;;  %v3255_v45 = vadd.f32 %v10545_v54, %v3212_v23  ;;  %v9210_v25 = vld [vmem:[%s11928_s3 + $0xc4] ss:$12 sps:$4 sm:$0xff]   ;;  %v9254_v53 = vld [vmem:[%s11928_s3 + $0x1e8] ss:$12 sps:$4 sm:$0xff]  }
 0x23a   : > { %v8553_v43 = vpop.f32.mrf.mxu0  ;;  %v9247_v10 = vld [vmem:[%s11928_s3 + $0x1d0] ss:$12 sps:$4 sm:$0xff]   ;;  %v9208_v39 = vld [vmem:[%s11928_s3 + $0xc0] ss:$12 sps:$4 sm:$0xff]   ;;  %v9262_v60 = vld [vmem:[%s11928_s3 + $0x218] ss:$12 sps:$4 sm:$0xff]  }
 0x23b   : > { %v3307_v3 = vpack.c.bf16 %v3286_v58, %v3285_v38  ;;  %v3213_v59 = vadd.f32 %v8553_v43, %v2888_v16  ;;  %3901 = vmatpush2.bf16.msra.mxu1 %v3308_v34  ;;  %v3253_v14 = vadd.f32 %v10545_v54, %v3210_v4  ;;  %v3291_v47 = vmax.f32 %v3255_v45, 0.0  ;;  %v9213_v61 = vld [vmem:[%s11928_s3 + $0xdc] ss:$12 sps:$4 sm:$0xff]   ;;  %v9255_v49 = vld [vmem:[%s11928_s3 + $0x200] ss:$12 sps:$4 sm:$0xff]  }
 0x23c   : > { %v3166_v0 = vpop.f32.mrf.mxu0  ;;  %3902 = vmatprep.subr.bf16.mxu1 %v11996_v29  ;;  %v9211_v23 = vld [vmem:[%s11928_s3 + $0xd8] ss:$12 sps:$4 sm:$0xff]   ;;  %v9218_v16 = vld [vmem:[%s11928_s3 + $0xf4] ss:$12 sps:$4 sm:$0xff]   ;;  %v9263_v18 = vld [vmem:[%s11928_s3 + $0x230] ss:$12 sps:$4 sm:$0xff]  }
 0x23d   : > { %v3256_v12 = vadd.f32 %v10545_v54, %v3213_v59  ;;  %v3211_v40 = vadd.f32 %v3166_v0, %v2886_v36  ;;  %v3289_v11 = vmax.f32 %v3253_v14, 0.0  ;;  %v9270_v42 = vld [vmem:[%s11928_s3 + $0x248] ss:$12 sps:$4 sm:$0xff]   ;;  %v9216_v38 = vld [vmem:[%s11928_s3 + $0xf0] ss:$12 sps:$4 sm:$0xff]   ;;  %v11938_v45 = vmov 0.0  }
 0x23e   : > { %v9221_v34 = vld [vmem:[%s11928_s3 + $0x10c] ss:$12 sps:$4 sm:$0xff]   ;;  %v9219_v4 = vld [vmem:[%s11928_s3 + $0x108] ss:$12 sps:$4 sm:$0xff]   ;;  %v9226_v43 = vld [vmem:[%s11928_s3 + $0x124] ss:$12 sps:$4 sm:$0xff]  }
 0x23f   : > { %v3292_v19 = vmax.f32 %v3256_v12, 0.0  ;;  %v3254_v33 = vadd.f32 %v10545_v54, %v3211_v40  ;;  %3903 = vmatpush2.bf16.msra.mxu1 %v3307_v3  ;;  %v9182_v54 = vld [vmem:[%s11928_s3 + $0x38] ss:$12 sps:$4 sm:$0xff]   ;;  %v9271_v58 = vld [vmem:[%s11928_s3 + $0x260] ss:$12 sps:$4 sm:$0xff]  }
 0x240   : > { %3904 = vmatprep.subr.bf16.mxu1 %v11996_v29  ;;  %v9224_v36 = vld [vmem:[%s11928_s3 + $0x120] ss:$12 sps:$4 sm:$0xff]   ;;  %v9229_v3 = vld [vmem:[%s11928_s3 + $0x13c] ss:$12 sps:$4 sm:$0xff]   ;;  %v9227_v0 = vld [vmem:[%s11928_s3 + $0x138] ss:$12 sps:$4 sm:$0xff]  }
 0x241   : > { %v3290_v6 = vmax.f32 %v3254_v33, 0.0  ;;  %v3310_v37 = vpack.c.bf16 %v3292_v19, %v3291_v47  ;;  %v9278_v59 = vld [vmem:[%s11929_s4 + $0x38] sm:$0xff]   ;;  %v9234_v14 = vld [vmem:[%s11928_s3 + $0x154] ss:$12 sps:$4 sm:$0xff]   ;;  %v9242_v19 = vld [vmem:[%s11928_s3 + $0x184] ss:$12 sps:$4 sm:$0xff]  }
 0x242   : > { %v9232_v12 = vld [vmem:[%s11928_s3 + $0x150] ss:$12 sps:$4 sm:$0xff]   ;;  %v9237_v40 = vld [vmem:[%s11928_s3 + $0x16c] ss:$12 sps:$4 sm:$0xff]   ;;  %v9235_v47 = vld [vmem:[%s11928_s3 + $0x168] ss:$12 sps:$4 sm:$0xff]  }
 0x243   : > { %3905 = vmatpush2.bf16.msra.mxu1 %v3306_v41  ;;  %8554 = vmatprep.subr.bf16.mxu0 %v3310_v37  ;;  %v3309_v30 = vpack.c.bf16 %v3290_v6, %v3289_v11  ;;  %v9215_v41 = vld [vmem:[%s11928_s3 + $0x110] ss:$12 sps:$4 sm:$0xff]   ;;  %v9240_v11 = vld [vmem:[%s11928_s3 + $0x180] ss:$12 sps:$4 sm:$0xff]  }
 0x244   : > { %8555 = vmatpush3.bf16.msra.mxu0 %v3310_v37  ;;  %3906 = vmatprep.subr.bf16.mxu1 %v11996_v29  ;;  %v9279_v33 = vld [vmem:[%s11929_s4 + $0x30] sm:$0xff]   ;;  %v9245_v6 = vld [vmem:[%s11928_s3 + $0x19c] ss:$12 sps:$4 sm:$0xff]   ;;  %v9243_v37 = vld [vmem:[%s11928_s3 + $0x198] ss:$12 sps:$4 sm:$0xff]  }
 0x245   : > { %8556 = vmatprep.subr.bf16.mxu0 %v3309_v30 }
 0x247   : > { %3907 = vmatpush2.bf16.msra.mxu1 %v3305_v27  ;;  %v9230_v27 = vld [vmem:[%s11928_s3 + $0x158] ss:$12 sps:$4 sm:$0xff]  }
 0x248   : > { %8557 = vmatpush3.bf16.msra.mxu0 %v3309_v30  ;;  %3908 = vmatprep.subr.bf16.mxu1 %v11996_v29  ;;  %v9250_v30 = vld [vmem:[%s11928_s3 + $0x1b4] ss:$12 sps:$4 sm:$0xff]  }
 0x249   : > { %8610 = vmatprep.subr.bf16.mxu0 %v11938_v45 }
 0x24b   : > { %3909 = vmatpush2.bf16.msra.mxu1 %v10687_v8  ;;  %8559 = vmatmul.mubr.msk.bf16.vlgmr.msra.gmra.mxu0 %vm3805_vm2, %v9175_v63  ;;  %v9176_v8 = vld [vmem:[%s11928_s3] ss:$12 sps:$4 sm:$0xff]   ;;  %v9248_v63 = vld [vmem:[%s11928_s3 + $0x1b0] ss:$12 sps:$4 sm:$0xff]  }
 0x24c   : > { %3910 = vmatprep.subr.bf16.mxu1 %v11996_v29  ;;  %8562 = vmatprep.mubr.msk.bf16.mxu0 %vm3805_vm2, %v9182_v54  ;;  %v9253_v54 = vld [vmem:[%s11928_s3 + $0x1cc] ss:$12 sps:$4 sm:$0xff]  }
 0x24f   : > { %3911 = vmatpush2.bf16.msra.mxu1 %v10691_v24  ;;  %v9181_v24 = vld [vmem:[%s11928_s3 + $0x1c] ss:$12 sps:$4 sm:$0xff]  }
 0x250   : > { %3912 = vmatprep.subr.bf16.mxu1 %v11996_v29 }
 0x253   : > { %3913 = vmatpush2.bf16.msra.mxu1 %v10661_v52  ;;  %8563 = vmatmul.mubr.msk.bf16.gmra.mxu0 %vm3805_vm2, %v9183_v15  ;;  %v9191_v52 = vld [vmem:[%s11928_s3 + $0x80] ss:$12 sps:$4 sm:$0xff]  }
 0x254   : > { %3914 = vmatprep.subr.bf16.mxu1 %v11996_v29  ;;  %8566 = vmatprep.mubr.msk.bf16.mxu0 %vm3805_vm2, %v9190_v17  ;;  %v9198_v29 = vld [vmem:[%s11928_s3 + $0x98] ss:$12 sps:$4 sm:$0xff]   ;;  %v9280_v15 = vld [vmem:[%s11929_s4 + $0x28] sm:$0xff]  }
 0x255   : > { %v9251_v17 = vld [vmem:[%s11928_s3 + $0x1c8] ss:$12 sps:$4 sm:$0xff]  }
 0x257   : > { %3915 = vmatpush2.bf16.msra.mxu1 %v10664_v44  ;;  %v9179_v44 = vld [vmem:[%s11928_s3 + $0x18] ss:$12 sps:$4 sm:$0xff]  }
 0x258   : > { %8646 = vmatprep.subr.bf16.mxu1 %v11938_v45 }
 0x25a   : > { %3917 = vmatmul.mubr.bf16.vlgmr.msra.gmra.mxu1 %v9176_v8  ;;  %v9258_v8 = vld [vmem:[%s11928_s3 + $0x1e4] ss:$12 sps:$4 sm:$0xff]  }
 0x25b   : > { %3924 = vmatprep.mubr.bf16.mxu1 %v9181_v24  ;;  %8567 = vmatmul.mubr.msk.bf16.gmra.mxu0 %vm3805_vm2, %v9191_v52  ;;  %v9256_v24 = vld [vmem:[%s11928_s3 + $0x1e0] ss:$12 sps:$4 sm:$0xff]   ;;  %v9261_v52 = vld [vmem:[%s11928_s3 + $0x1fc] ss:$12 sps:$4 sm:$0xff]  }
 0x25c   : > { %8570 = vmatprep.mubr.msk.bf16.mxu0 %vm3805_vm2, %v9198_v29  ;;  %8647 = vmatpush3.bf16.msra.mxu1 %v9278_v59  ;;  %v9281_v29 = vld [vmem:[%s11929_s4 + $0x78] sm:$0xff]   ;;  %v9288_v59 = vld [vmem:[%s11929_s4 + $0x10] sm:$0xff]  }
 0x25d   : > { %8648 = vmatprep.subr.bf16.mxu1 %v11938_v45  ;;  %8611 = vmatpush3.bf16.msra.mxu0 %v9281_v29 }
 0x25e   : > { %8612 = vmatprep.subr.bf16.mxu0 %v11938_v45 }
 0x260   : > { %8649 = vmatpush3.bf16.msra.mxu1 %v9279_v33 }
 0x261   : > { %8650 = vmatprep.subr.bf16.mxu1 %v11938_v45 }
 0x262   : > { %3925 = vmatmul.mubr.bf16.gmra.mxu1 %v9179_v44  ;;  %v9259_v44 = vld [vmem:[%s11928_s3 + $0x1f8] ss:$12 sps:$4 sm:$0xff]  }
 0x263   : > { %3932 = vmatprep.mubr.bf16.mxu1 %v9186_v22  ;;  %8571 = vmatmul.mubr.msk.bf16.gmra.mxu0 %vm3805_vm2, %v9199_v62  ;;  %v9266_v22 = vld [vmem:[%s11928_s3 + $0x214] ss:$12 sps:$4 sm:$0xff]   ;;  %v9264_v62 = vld [vmem:[%s11928_s3 + $0x210] ss:$12 sps:$4 sm:$0xff]  }
 0x264   : > { %8574 = vmatprep.mubr.msk.bf16.mxu0 %vm3805_vm2, %v9206_v28  ;;  %8651 = vmatpush3.bf16.msra.mxu1 %v9280_v15  ;;  %v9269_v28 = vld [vmem:[%s11928_s3 + $0x22c] ss:$12 sps:$4 sm:$0xff]  }
 0x265   : > { %8652 = vmatprep.subr.bf16.mxu1 %v11938_v45 }
 0x26a   : > { %3933 = vmatmul.mubr.bf16.gmra.mxu1 %v9184_v1  ;;  %v9282_v1 = vld [vmem:[%s11929_s4 + $0x20] sm:$0xff]  }
 0x26b   : > { %3940 = vmatprep.mubr.bf16.mxu1 %v9189_v35  ;;  %8575 = vmatmul.mubr.msk.bf16.gmra.mxu0 %vm3805_vm2, %v9207_v32  ;;  %v9283_v35 = vld [vmem:[%s11929_s4 + $0x70] sm:$0xff]  }
 0x26c   : > { %8578 = vmatprep.mubr.msk.bf16.mxu0 %vm3805_vm2, %v9214_v7  ;;  %8653 = vmatpush3.bf16.msra.mxu1 %v9282_v1  ;;  %v9267_v32 = vld [vmem:[%s11928_s3 + $0x228] ss:$12 sps:$4 sm:$0xff]   ;;  %v9274_v7 = vld [vmem:[%s11928_s3 + $0x244] ss:$12 sps:$4 sm:$0xff]  }
 0x26d   : > { %8613 = vmatpush3.bf16.msra.mxu0 %v9283_v35  ;;  %8654 = vmatprep.subr.bf16.mxu1 %v11938_v45  ;;  %v9293_v35 = vld [vmem:[%s11929_s4 + $0x40] sm:$0xff]  }
 0x26e   : > { %8614 = vmatprep.subr.bf16.mxu0 %v11938_v45 }
 0x272   : > { %3941 = vmatmul.mubr.bf16.gmra.mxu1 %v9187_v9 }
 0x273   : > { %3948 = vmatprep.mubr.bf16.mxu1 %v9194_v46  ;;  %8579 = vmatmul.mubr.msk.bf16.gmra.mxu0 %vm3805_vm2, %v9215_v41  ;;  %v9284_v46 = vld [vmem:[%s11929_s4 + $0x68] sm:$0xff]  }
 0x274   : > { %8582 = vmatprep.mubr.msk.bf16.mxu0 %vm3805_vm2, %v9222_v13  ;;  %v9272_v41 = vld [vmem:[%s11928_s3 + $0x240] ss:$12 sps:$4 sm:$0xff]   ;;  %v9277_v13 = vld [vmem:[%s11928_s3 + $0x25c] ss:$12 sps:$4 sm:$0xff]   ;;  %8615 = vmatpush3.bf16.msra.mxu0 %v9284_v46 }
 0x275   : > { %8616 = vmatprep.subr.bf16.mxu0 %v11938_v45 }
 0x27a   : > { %3949 = vmatmul.mubr.bf16.gmra.mxu1 %v9192_v48 }
 0x27b   : > { %3956 = vmatprep.mubr.bf16.mxu1 %v9197_v51  ;;  %8583 = vmatmul.mubr.msk.bf16.gmra.mxu0 %vm3805_vm2, %v9223_v20 }
 0x27c   : > { %8586 = vmatprep.mubr.msk.bf16.mxu0 %vm3805_vm2, %v9230_v27 }
 0x282   : > { %3957 = vmatmul.mubr.bf16.gmra.mxu1 %v9195_v31 }
 0x283   : > { %3964 = vmatprep.mubr.bf16.mxu1 %v9202_v57  ;;  %8587 = vmatmul.mubr.msk.bf16.gmra.mxu0 %vm3805_vm2, %v9231_v50  ;;  %v9275_v50 = vld [vmem:[%s11928_s3 + $0x258] ss:$12 sps:$4 sm:$0xff]  }
 0x284   : > { %8590 = vmatprep.mubr.msk.bf16.mxu0 %vm3805_vm2, %v9238_v26 }
 0x28a   : > { %3965 = vmatmul.mubr.bf16.gmra.mxu1 %v9200_v55  ;;  %v9285_v55 = vld [vmem:[%s11929_s4 + $0x18] sm:$0xff]  }
 0x28b   : > { %3972 = vmatprep.mubr.bf16.mxu1 %v9205_v21  ;;  %8591 = vmatmul.mubr.msk.bf16.gmra.mxu0 %vm3805_vm2, %v9239_v56  ;;  %v9286_v21 = vld [vmem:[%s11929_s4 + $0x60] sm:$0xff]  }
 0x28c   : > { %8594 = vmatprep.mubr.msk.bf16.mxu0 %vm3805_vm2, %v9246_v5  ;;  %8655 = vmatpush3.bf16.msra.mxu1 %v9285_v55 }
 0x28d   : > { %8617 = vmatpush3.bf16.msra.mxu0 %v9286_v21  ;;  %8656 = vmatprep.subr.bf16.mxu1 %v11938_v45 }
 0x28e   : > { %8618 = vmatprep.subr.bf16.mxu0 %v11938_v45 }
 0x290   : > { %8657 = vmatpush3.bf16.msra.mxu1 %v9288_v59 }
 0x291   : > { %8658 = vmatprep.subr.bf16.mxu1 %v11938_v45 }
 0x292   : > { %3973 = vmatmul.mubr.bf16.gmra.mxu1 %v9203_v2 }
 0x293   : > { %3980 = vmatprep.mubr.bf16.mxu1 %v9210_v25  ;;  %8595 = vmatmul.mubr.msk.bf16.gmra.mxu0 %vm3805_vm2, %v9247_v10 }
 0x294   : > { %8598 = vmatprep.mubr.msk.bf16.mxu0 %vm3805_vm2, %v9254_v53 }
 0x29a   : > { %3981 = vmatmul.mubr.bf16.gmra.mxu1 %v9208_v39 }
 0x29b   : > { %3988 = vmatprep.mubr.bf16.mxu1 %v9213_v61  ;;  %8599 = vmatmul.mubr.msk.bf16.gmra.mxu0 %vm3805_vm2, %v9255_v49 }
 0x29c   : > { %8602 = vmatprep.mubr.msk.bf16.mxu0 %vm3805_vm2, %v9262_v60 }
 0x2a2   : > { %3989 = vmatmul.mubr.bf16.gmra.mxu1 %v9211_v23 }
 0x2a3   : > { %3996 = vmatprep.mubr.bf16.mxu1 %v9218_v16  ;;  %8603 = vmatmul.mubr.msk.bf16.gmra.mxu0 %vm3805_vm2, %v9263_v18 }
 0x2a4   : > { %8606 = vmatprep.mubr.msk.bf16.mxu0 %vm3805_vm2, %v9270_v42 }
 0x2aa   : > { %3997 = vmatmul.mubr.bf16.gmra.mxu1 %v9216_v38 }
 0x2ab   : > { %4004 = vmatprep.mubr.bf16.mxu1 %v9221_v34  ;;  %8607 = vmatmul.mubr.msk.bf16.gmra.mxu0 %vm3805_vm2, %v9271_v58  ;;  %v9287_v58 = vld [vmem:[%s11929_s4 + $0x58] sm:$0xff]  }
 0x2ac   : > { %8619 = vmatpush3.bf16.msra.mxu0 %v9287_v58  ;;  %8626 = vmatprep.mubr.msk.bf16.mxu0 %vm9444_vm3, %v11938_v45 }
 0x2ad   : > { %8620 = vmatprep.subr.bf16.mxu0 %v11938_v45 }
 0x2b2   : > { %4005 = vmatmul.mubr.bf16.gmra.mxu1 %v9219_v4 }
 0x2b3   : > { %4012 = vmatprep.mubr.bf16.mxu1 %v9226_v43 }
 0x2ba   : > { %4013 = vmatmul.mubr.bf16.gmra.mxu1 %v9224_v36 }
 0x2bb   : > { %4020 = vmatprep.mubr.bf16.mxu1 %v9229_v3 }
 0x2c2   : > { %4021 = vmatmul.mubr.bf16.gmra.mxu1 %v9227_v0 }
 0x2c3   : > { %4028 = vmatprep.mubr.bf16.mxu1 %v9234_v14 }
 0x2ca   : > { %4029 = vmatmul.mubr.bf16.gmra.mxu1 %v9232_v12 }
 0x2cb   : > { %4036 = vmatprep.mubr.bf16.mxu1 %v9237_v40 }
 0x2d2   : > { %4037 = vmatmul.mubr.bf16.gmra.mxu1 %v9235_v47  ;;  %v9290_v47 = vld [vmem:[%s11929_s4 + $0x8] sm:$0xff]  }
 0x2d3   : > { %4044 = vmatprep.mubr.bf16.mxu1 %v9242_v19  ;;  %8659 = vmatpush3.bf16.msra.mxu1 %v9290_v47 }
 0x2d4   : > { %8660 = vmatprep.subr.bf16.mxu1 %v11938_v45 }
 0x2da   : > { %4045 = vmatmul.mubr.bf16.gmra.mxu1 %v9240_v11 }
 0x2db   : > { %4052 = vmatprep.mubr.bf16.mxu1 %v9245_v6 }
 0x2e2   : > { %4053 = vmatmul.mubr.bf16.gmra.mxu1 %v9243_v37  ;;  %v9292_v37 = vld [vmem:[%s11929_s4] sm:$0xff]  }
 0x2e3   : > { %4060 = vmatprep.mubr.bf16.mxu1 %v9250_v30  ;;  %8661 = vmatpush3.bf16.msra.mxu1 %v9292_v37 }
 0x2e4   : > { %8718 = vmatprep.subr.bf16.mxu1 %v11938_v45 }
 0x2ea   : > { %4061 = vmatmul.mubr.bf16.gmra.mxu1 %v9248_v63 }
 0x2eb   : > { %4068 = vmatprep.mubr.bf16.mxu1 %v9253_v54  ;;  %v9289_v54 = vld [vmem:[%s11929_s4 + $0x50] sm:$0xff]  }
 0x2ec   : > { %8621 = vmatpush3.bf16.msra.mxu0 %v9289_v54 }
 0x2ed   : > { %8622 = vmatprep.subr.bf16.mxu0 %v11938_v45 }
 0x2f2   : > { %4069 = vmatmul.mubr.bf16.gmra.mxu1 %v9251_v17 }
 0x2f3   : > { %4076 = vmatprep.mubr.bf16.mxu1 %v9258_v8 }
 0x2fa   : > { %4077 = vmatmul.mubr.bf16.gmra.mxu1 %v9256_v24 }
 0x2fb   : > { %4084 = vmatprep.mubr.bf16.mxu1 %v9261_v52 }
 0x302   : > { %4085 = vmatmul.mubr.bf16.gmra.mxu1 %v9259_v44  ;;  %v9291_v44 = vld [vmem:[%s11929_s4 + $0x48] sm:$0xff]  }
 0x303   : > { %4092 = vmatprep.mubr.bf16.mxu1 %v9266_v22  ;;  %8623 = vmatpush3.bf16.msra.mxu0 %v9291_v44 }
 0x304   : > { %8624 = vmatprep.subr.bf16.mxu0 %v11938_v45 }
 0x307   : > { %8625 = vmatpush3.bf16.msra.mxu0 %v9293_v35 }
 0x308   : > { %8682 = vmatprep.subr.bf16.mxu0 %v11938_v45 }
 0x30a   : > { %4093 = vmatmul.mubr.bf16.gmra.mxu1 %v9264_v62 }
 0x30b   : > { %4100 = vmatprep.mubr.bf16.mxu1 %v9269_v28  ;;  %v8560_v9 = vpop.f32.mrf.mxu0 }
 0x30d   : > { %v4159_v48 = vpop.f32.mrf.mxu0 }
 0x30f   : > { %v8561_v31 = vpop.f32.mrf.mxu0 }
 0x311   : > { %v11030_v56 = vpop.f32.mrf.mxu0 }
 0x312   : > { %4101 = vmatmul.mubr.bf16.gmra.mxu1 %v9267_v32 }
 0x313   : > { %4108 = vmatprep.mubr.bf16.mxu1 %v9274_v7  ;;  %v8564_v10 = vpop.f32.mrf.mxu0 }
 0x315   : > { %v4175_v49 = vpop.f32.mrf.mxu0 }
 0x317   : > { %v8565_v18 = vpop.f32.mrf.mxu0 }
 0x319   : > { %v11042_v38 = vpop.f32.mrf.mxu0 }
 0x31a   : > { %v3918_v51 = vpop.f32.mrf.mxu1  ;;  %4109 = vmatmul.mubr.bf16.gmra.mxu1 %v9272_v41 }
 0x31b   : > { %v11017_v20 = vadd.f32 %v4159_v48, %v3918_v51  ;;  %4116 = vmatprep.mubr.bf16.mxu1 %v9277_v13  ;;  %v8568_v43 = vpop.f32.mrf.mxu0 }
 0x31c   : > { %v3920_v27 = vpop.f32.mrf.mxu1 }
 0x31d   : > { %v4191_v14 = vpop.f32.mrf.mxu0 }
 0x31e   : > { %v11019_v57 = vpop.f32.mrf.mxu1 }
 0x31f   : > { %v8569_v33 = vpop.f32.mrf.mxu0 }
 0x320   : > { %v3923_v26 = vpop.f32.mrf.mxu1 }
 0x321   : > { %v11067_v63 = vpop.f32.mrf.mxu0 }
 0x322   : > { %v3926_v5 = vpop.f32.mrf.mxu1  ;;  %4117 = vmatmul.mubr.bf16.gmra.mxu1 %v9275_v50  ;;  %v11098_v50 = vadd.f32 %v11030_v56, %v11019_v57 }
 0x323   : > { %v11032_v2 = vadd.f32 %v8560_v9, %v3926_v5  ;;  %v8572_v17 = vpop.f32.mrf.mxu0  ;;  %8662 = vmatprep.mubr.msk.bf16.mxu1 %vm9444_vm3, %v11938_v45 }
 0x324   : > { %v3928_v25 = vpop.f32.mrf.mxu1 }
 0x325   : > { %v4207_v29 = vpop.f32.mrf.mxu0 }
 0x326   : > { %v3929_v53 = vpop.f32.mrf.mxu1 }
 0x327   : > { %v11036_v39 = vadd.f32 %v8561_v31, %v3929_v53  ;;  %v8573_v1 = vpop.f32.mrf.mxu0 }
 0x328   : > { %v3931_v61 = vpop.f32.mrf.mxu1 }
 0x329   : > { %v4210_v46 = vpop.f32.mrf.mxu0 }
 0x32a   : > { %v3934_v60 = vpop.f32.mrf.mxu1 }
 0x32b   : > { %v11038_v23 = vadd.f32 %v4175_v49, %v3934_v60  ;;  %v8576_v51 = vpop.f32.mrf.mxu0 }
 0x32c   : > { %v3936_v16 = vpop.f32.mrf.mxu1 }
 0x32d   : > { %v4223_v21 = vpop.f32.mrf.mxu0 }
 0x32e   : > { %v11040_v42 = vpop.f32.mrf.mxu1 }
 0x32f   : > { %v8577_v61 = vpop.f32.mrf.mxu0 }
 0x330   : > { %v3939_v34 = vpop.f32.mrf.mxu1 }
 0x331   : > { %v4226_v56 = vpop.f32.mrf.mxu0 }
 0x332   : > { %v3942_v4 = vpop.f32.mrf.mxu1 }
 0x333   : > { %v11047_v36 = vadd.f32 %v8564_v10, %v3942_v4 }
 0x334   : > { %v3944_v3 = vpop.f32.mrf.mxu1 }
 0x336   : > { %v3945_v0 = vpop.f32.mrf.mxu1 }
 0x337   : > { %v11053_v12 = vadd.f32 %v8565_v18, %v3945_v0  ;;  %v11118_v0 = vadd.f32 %v11042_v38, %v11040_v42 }
 0x338   : > { %v3947_v40 = vpop.f32.mrf.mxu1 }
 0x33a   : > { %v3950_v19 = vpop.f32.mrf.mxu1 }
 0x33b   : > { %v11059_v11 = vadd.f32 %v4191_v14, %v3950_v19 }
 0x33c   : > { %v3952_v6 = vpop.f32.mrf.mxu1 }
 0x33e   : > { %v11065_v30 = vpop.f32.mrf.mxu1 }
 0x340   : > { %v3955_v15 = vpop.f32.mrf.mxu1 }
 0x342   : > { %v3958_v8 = vpop.f32.mrf.mxu1 }
 0x343   : > { %v11078_v24 = vadd.f32 %v8568_v43, %v3958_v8  ;;  %v8580_v43 = vpop.f32.mrf.mxu0 }
 0x344   : > { %v3960_v52 = vpop.f32.mrf.mxu1 }
 0x345   : > { %v4239_v47 = vpop.f32.mrf.mxu0 }
 0x346   : > { %v3961_v22 = vpop.f32.mrf.mxu1 }
 0x347   : > { %v11083_v62 = vadd.f32 %v8569_v33, %v3961_v22  ;;  %v8581_v54 = vpop.f32.mrf.mxu0 }
 0x348   : > { %v3963_v28 = vpop.f32.mrf.mxu1 }
 0x349   : > { %12019 = vst [vmem:[#allocation26_spill] sm:$0xff] %v11083_v62  ;;  %v4242_v38 = vpop.f32.mrf.mxu0 }
 0x34a   : > { %v3966_v32 = vpop.f32.mrf.mxu1 }
 0x34b   : > { %v11089_v7 = vadd.f32 %v4207_v29, %v3966_v32  ;;  %v8584_v28 = vpop.f32.mrf.mxu0  ;;  %v11138_v32 = vadd.f32 %v11067_v63, %v11065_v30 }
 0x34c   : > { %v3968_v9 = vpop.f32.mrf.mxu1 }
 0x34d   : > { %12020 = vst [vmem:[#allocation6_spill] sm:$0xff] %v11089_v7 }
 0x34e   : > { %v3969_v41 = vpop.f32.mrf.mxu1 }
 0x34f   : > { %v11092_v13 = vadd.f32 %v4210_v46, %v3969_v41  ;;  %v4255_v41 = vpop.f32.mrf.mxu0 }
 0x350   : > { %v3971_v48 = vpop.f32.mrf.mxu1 }
 0x351   : > { %v4366_v27 = vmax.f32 %v11017_v20, %v11092_v13  ;;  %v9294_v20 = vld [vmem:[%s11929_s4 + $0xf8] sm:$0xff]  }
 0x352   : > { %v3974_v31 = vpop.f32.mrf.mxu1 }
 0x353   : > { %v11100_v26 = vadd.f32 %v8572_v17, %v3974_v31 }
 0x354   : > { %v3976_v55 = vpop.f32.mrf.mxu1 }
 0x356   : > { %v3977_v25 = vpop.f32.mrf.mxu1 }
 0x357   : > { %v11104_v10 = vadd.f32 %v8573_v1, %v3977_v25 }
 0x358   : > { %v3979_v53 = vpop.f32.mrf.mxu1 }
 0x35a   : > { %v3982_v60 = vpop.f32.mrf.mxu1 }
 0x35b   : > { %v11108_v16 = vadd.f32 %v4223_v21, %v3982_v60  ;;  %v8585_v21 = vpop.f32.mrf.mxu0 }
 0x35c   : > { %v3984_v57 = vpop.f32.mrf.mxu1 }
 0x35d   : > { %v4258_v63 = vpop.f32.mrf.mxu0 }
 0x35e   : > { %v3985_v34 = vpop.f32.mrf.mxu1 }
 0x35f   : > { %v11112_v58 = vadd.f32 %v4226_v56, %v3985_v34 }
 0x360   : > { %v3987_v4 = vpop.f32.mrf.mxu1 }
 0x362   : > { %v3990_v59 = vpop.f32.mrf.mxu1 }
 0x363   : > { %v11120_v14 = vadd.f32 %v8576_v51, %v3990_v59 }
 0x364   : > { %v3992_v40 = vpop.f32.mrf.mxu1 }
 0x366   : > { %v3993_v33 = vpop.f32.mrf.mxu1 }
 0x367   : > { %v11124_v6 = vadd.f32 %v8577_v61, %v3993_v33  ;;  %v11156_v33 = vpop.f32.mrf.mxu0 }
 0x368   : > { %v3995_v37 = vpop.f32.mrf.mxu1 }
 0x36a   : > { %v3998_v17 = vpop.f32.mrf.mxu1 }
 0x36b   : > { %v11128_v8 = vadd.f32 %v4239_v47, %v3998_v17 }
 0x36c   : > { %v4000_v42 = vpop.f32.mrf.mxu1 }
 0x36e   : > { %v4001_v29 = vpop.f32.mrf.mxu1 }
 0x36f   : > { %v11132_v44 = vadd.f32 %v4242_v38, %v4001_v29 }
 0x370   : > { %v4003_v22 = vpop.f32.mrf.mxu1 }
 0x372   : > { %v4006_v35 = vpop.f32.mrf.mxu1 }
 0x373   : > { %v11140_v9 = vadd.f32 %v8580_v43, %v4006_v35 }
 0x374   : > { %v4008_v46 = vpop.f32.mrf.mxu1 }
 0x376   : > { %v4009_v51 = vpop.f32.mrf.mxu1 }
 0x377   : > { %v11144_v31 = vadd.f32 %v8581_v54, %v4009_v51  ;;  %v4271_v54 = vpop.f32.mrf.mxu0 }
 0x378   : > { %v4011_v55 = vpop.f32.mrf.mxu1 }
 0x379   : > { %v11158_v38 = vpop.f32.mrf.mxu0 }
 0x37a   : > { %v4014_v53 = vpop.f32.mrf.mxu1 }
 0x37b   : > { %v11148_v61 = vadd.f32 %v4255_v41, %v4014_v53  ;;  %v4274_v35 = vpop.f32.mrf.mxu0 }
 0x37c   : > { %v4016_v30 = vpop.f32.mrf.mxu1 }
 0x37d   : > { %12021 = vst [vmem:[#allocation7_spill] sm:$0xff] %v11148_v61  ;;  %v11162_v51 = vpop.f32.mrf.mxu0 }
 0x37e   : > { %v4017_v57 = vpop.f32.mrf.mxu1 }
 0x37f   : > { %v11152_v56 = vadd.f32 %v4258_v63, %v4017_v57  ;;  %v11166_v30 = vpop.f32.mrf.mxu0 }
 0x380   : > { %v4019_v34 = vpop.f32.mrf.mxu1 }
 0x381   : > { %12022 = vst [vmem:[#allocation28_spill] sm:$0xff] %v11152_v56  ;;  %v11168_v57 = vpop.f32.mrf.mxu0 }
 0x382   : > { %v4022_v43 = vpop.f32.mrf.mxu1 }
 0x384   : > { %v4024_v59 = vpop.f32.mrf.mxu1 }
 0x386   : > { %v4025_v40 = vpop.f32.mrf.mxu1 }
 0x387   : > { %v4267_v49 = vadd.f32 %v8585_v21, %v4025_v40  ;;  %v12028_v21 = vmov 0.0  }
 0x388   : > { %v4027_v47 = vpop.f32.mrf.mxu1 }
 0x389   : > { %v11172_v47 = vpop.f32.mrf.mxu0 }
 0x38a   : > { %v4030_v37 = vpop.f32.mrf.mxu1 }
 0x38c   : > { %v4032_v17 = vpop.f32.mrf.mxu1 }
 0x38e   : > { %v4033_v42 = vpop.f32.mrf.mxu1 }
 0x390   : > { %v4035_v29 = vpop.f32.mrf.mxu1 }
 0x392   : > { %v4038_v22 = vpop.f32.mrf.mxu1 }
 0x394   : > { %v4040_v46 = vpop.f32.mrf.mxu1 }
 0x395   : > { %v11176_v46 = vpop.f32.mrf.mxu0 }
 0x396   : > { %v11160_v41 = vpop.f32.mrf.mxu1  ;;  %12023 = vst [vmem:[#allocation16_spill] sm:$0xff] %v11176_v46 }
 0x397   : > { %v11180_v60 = vpop.f32.mrf.mxu0 }
 0x398   : > { %v4043_v55 = vpop.f32.mrf.mxu1 }
 0x399   : > { %v8597_v48 = vpop.f32.mrf.mxu0 }
 0x39a   : > { %v11164_v53 = vpop.f32.mrf.mxu1 }
 0x39b   : > { %v11186_v52 = vpop.f32.mrf.mxu0 }
 0x39c   : > { %v4048_v63 = vpop.f32.mrf.mxu1  ;;  %12024 = vst [vmem:[#allocation27_spill] sm:$0xff] %v11186_v52 }
 0x39d   : > { %v8600_v19 = vpop.f32.mrf.mxu0 }
 0x39e   : > { %v11170_v34 = vpop.f32.mrf.mxu1 }
 0x39f   : > { %v4319_v18 = vpop.f32.mrf.mxu0 }
 0x3a0   : > { %v4051_v59 = vpop.f32.mrf.mxu1 }
 0x3a1   : > { %v8601_v7 = vpop.f32.mrf.mxu0 }
 0x3a2   : > { %v11174_v17 = vpop.f32.mrf.mxu1 }
 0x3a3   : > { %v4322_v62 = vpop.f32.mrf.mxu0 }
 0x3a4   : > { %v4056_v29 = vpop.f32.mrf.mxu1 }
 0x3a5   : > { %v4264_v29 = vadd.f32 %v8584_v28, %v4022_v43 }
 0x3a6   : > { %v11178_v4 = vpop.f32.mrf.mxu1 }
 0x3a8   : > { %v4059_v55 = vpop.f32.mrf.mxu1 }
 0x3a9   : > { %v4367_v55 = vmax.f32 %v4366_v27, %v4264_v29  ;;  %v4275_v27 = vadd.f32 %v4274_v35, %v4033_v42  ;;  %v12030_v42 = vmax.f32 %v11038_v23, %v11112_v58  ;;  %v9295_v23 = vld [vmem:[%s11929_s4 + $0xb8] sm:$0xff]  }
 0x3aa   : > { %v11182_v25 = vpop.f32.mrf.mxu1 }
 0x3ac   : > { %v4064_v63 = vpop.f32.mrf.mxu1 }
 0x3ae   : > { %v11184_v1 = vpop.f32.mrf.mxu1 }
 0x3b0   : > { %v4067_v59 = vpop.f32.mrf.mxu1 }
 0x3b1   : > { %v12026_v59 = vmax.f32 %v11098_v50, %v11100_v26 }
 0x3b2   : > { %v11188_v15 = vpop.f32.mrf.mxu1 }
 0x3b3   : > { %12025 = vst [vmem:[#allocation17_spill] sm:$0xff] %v11188_v15  ;;  %v4370_v61 = vmax.f32 %v12026_v59, %v4267_v49  ;;  %v4272_v15 = vadd.f32 %v4271_v54, %v4030_v37  ;;  %v9298_v54 = vld [vmem:[%s11929_s4 + $0xe8] sm:$0xff]  }
 0x3b4   : > { %v4072_v3 = vpop.f32.mrf.mxu1 }
 0x3b6   : > { %v4073_v45 = vpop.f32.mrf.mxu1 }
 0x3b7   : > { %v4315_v5 = vadd.f32 %v8597_v48, %v4073_v45  ;;  %v12027_v45 = vmax.f32 %v11032_v2, %v11104_v10  ;;  %v11202_v48 = vpop.f32.mrf.mxu0  ;;  %v12029_v2 = vmax.f32 %v11036_v39, %v11108_v16  ;;  %v4283_v16 = vadd.f32 %v11158_v38, %v11160_v41 }
 0x3b8   : > { %v4075_v63 = vpop.f32.mrf.mxu1 }
 0x3b9   : > { %v4368_v56 = vmax.f32 %v4367_v55, %v4315_v5  ;;  %v4373_v13 = vmax.f32 %v12027_v45, %v4272_v15  ;;  %v4376_v10 = vmax.f32 %v12029_v2, %v4275_v27  ;;  %v4335_v40 = vpop.f32.mrf.mxu0 }
 0x3ba   : > { %v4078_v46 = vpop.f32.mrf.mxu1 }
 0x3bb   : > { %4405 = vst [vmem:[#allocation2] sm:$0xff] %v4368_v56  ;;  %v4320_v28 = vadd.f32 %v4319_v18, %v4078_v46  ;;  %v4288_v46 = vadd.f32 %v11166_v30, %v11164_v53  ;;  %v8605_v29 = vpop.f32.mrf.mxu0  ;;  %v9300_v53 = vld [vmem:[%s11929_s4 + $0xe0] sm:$0xff]  }
 0x3bc   : > { %v4080_v3 = vpop.f32.mrf.mxu1 }
 0x3bd   : > { %v4371_v43 = vmax.f32 %v4370_v61, %v4320_v28  ;;  %v9296_v61 = vld [vmem:[%s11929_s4 + $0xf0] sm:$0xff]   ;;  %v12032_v3 = vmax.f32 %v11047_v36, %v11124_v6  ;;  %v9302_v36 = vld [vmem:[%s11929_s4 + $0xd8] sm:$0xff]  }
 0x3be   : > { %v4081_v52 = vpop.f32.mrf.mxu1 }
 0x3bf   : > { %4406 = vst [vmem:[#allocation2 + $0x8] sm:$0xff] %v4371_v43  ;;  %v4323_v5 = vadd.f32 %v4322_v62, %v4081_v52  ;;  %v4428_v50 = vpack.c.bf16 %v4371_v43, %v4368_v56  ;;  %v4280_v62 = vadd.f32 %v11156_v33, %v4038_v22  ;;  %v4385_v43 = vmax.f32 %v12032_v3, %v4288_v46  ;;  %v9307_v3 = vld [vmem:[%s11929_s4 + $0x88] sm:$0xff]  }
 0x3c0   : > { %v4083_v26 = vpop.f32.mrf.mxu1 }
 0x3c1   : > { %v4374_v49 = vmax.f32 %v4373_v13, %v4323_v5  ;;  %8663 = vmatmul.mubr.bf16.vlgmr.msra.gmra.mxu1 %v4428_v50  ;;  %v4379_v39 = vmax.f32 %v12030_v42, %v4280_v62  ;;  %v4296_v50 = vadd.f32 %v11162_v51, %v11174_v17 }
 0x3c2   : > { %v4086_v18 = vpop.f32.mrf.mxu1  ;;  %8666 = vmatprep.mubr.msk.bf16.mxu1 %vm9444_vm3, %v12028_v21  ;;  %8719 = vmatpush3.bf16.msra.mxu1 %v9294_v20  ;;  %v4338_v20 = vpop.f32.mrf.mxu0 }
 0x3c3   : > { %4407 = vst [vmem:[#allocation2 + $0x10] sm:$0xff] %v4374_v49  ;;  %v4328_v15 = vadd.f32 %v8600_v19, %v4086_v18  ;;  %8720 = vmatprep.subr.bf16.mxu1 %v12028_v21  ;;  %v9299_v18 = vld [vmem:[%s11929_s4 + $0xa8] sm:$0xff]  }
 0x3c4   : > { %v4088_v52 = vpop.f32.mrf.mxu1 }
 0x3c5   : > { %v4377_v56 = vmax.f32 %v4376_v10, %v4328_v15  ;;  %v9304_v10 = vld [vmem:[%s11929_s4 + $0xd0] sm:$0xff]  }
 0x3c6   : > { %v4089_v37 = vpop.f32.mrf.mxu1  ;;  %8721 = vmatpush3.bf16.msra.mxu1 %v9296_v61  ;;  %v4449_v63 = vld [vmem:[#allocation2 + $0x1] sm:$0xff]  ;;  %v12033_v61 = vmax.f32 %v11053_v12, %v11128_v8  ;;  %v12034_v12 = vmax.f32 %v11059_v11, %v11132_v44 }
 0x3c7   : > { %4408 = vst [vmem:[#allocation2 + $0x18] sm:$0xff] %v4377_v56  ;;  %v4331_v19 = vadd.f32 %v8601_v7, %v4089_v37  ;;  %v4429_v33 = vpack.c.bf16 %v4377_v56, %v4374_v49  ;;  %8722 = vmatprep.subr.bf16.mxu1 %v12028_v21  ;;  %v12031_v7 = vmax.f32 %v11118_v0, %v11120_v14  ;;  %v9297_v0 = vld [vmem:[%s11929_s4 + $0xb0] sm:$0xff]   ;;  %v9306_v11 = vld [vmem:[%s11929_s4 + $0xc8] sm:$0xff]  }
 0x3c8   : > { %v4091_v22 = vpop.f32.mrf.mxu1  ;;  %v4291_v14 = vadd.f32 %v11172_v47, %v11170_v34  ;;  %v11254_v34 = vpop.f32.mrf.mxu0  ;;  %v4391_v8 = vmax.f32 %v12034_v12, %v4296_v50 }
 0x3c9   : > { %v4380_v35 = vmax.f32 %v4379_v39, %v4331_v19  ;;  %8667 = vmatmul.mubr.bf16.gmra.mxu1 %v4429_v33  ;;  %v4382_v58 = vmax.f32 %v12031_v7, %v4283_v16  ;;  %v4304_v39 = vadd.f32 %v11180_v60, %v11182_v25  ;;  %v9303_v33 = vld [vmem:[%s11929_s4 + $0x98] sm:$0xff]   ;;  %v12035_v22 = vmax.f32 %v11138_v32, %v11140_v9  ;;  %v9308_v25 = vld [vmem:[%s11929_s4 + $0xc0] sm:$0xff]   ;;  %v12037_v7 = vld [vmem:[#allocation27_spill] sm:$0xff] }
 0x3ca   : > { %v4094_v55 = vpop.f32.mrf.mxu1  ;;  %v4450_v59 = vld [vmem:[#allocation2 + $0x9] sm:$0xff]  ;;  %8670 = vmatprep.mubr.msk.bf16.mxu1 %vm9444_vm3, %v12028_v21  ;;  %8723 = vmatpush3.bf16.msra.mxu1 %v9298_v54  ;;  %v4388_v2 = vmax.f32 %v12033_v61, %v4291_v14  ;;  %v4351_v52 = vpop.f32.mrf.mxu0 }
 0x3cb   : > { %4409 = vst [vmem:[#allocation2 + $0x20] sm:$0xff] %v4380_v35  ;;  %v4336_v38 = vadd.f32 %v4335_v40, %v4094_v55  ;;  %v4459_v41 = vpack.c.bf16 %v4450_v59, %v4449_v63  ;;  %8724 = vmatprep.subr.bf16.mxu1 %v12028_v21  ;;  %v4299_v40 = vadd.f32 %v11168_v57, %v11178_v4  ;;  %v12042_v14 = vld [vmem:[#allocation16_spill] sm:$0xff] }
 0x3cc   : > { %v4096_v30 = vpop.f32.mrf.mxu1  ;;  %v8609_v16 = vpop.f32.mrf.mxu0  ;;  %v12036_v63 = vmax.f32 %v11078_v24, %v11144_v31 }
 0x3cd   : > { %v4383_v28 = vmax.f32 %v4382_v58, %v4336_v38  ;;  %8627 = vmatmul.mubr.bf16.vlgmr.msra.gmra.mxu0 %v4459_v41  ;;  %v4307_v58 = vadd.f32 %v12037_v7, %v11184_v1  ;;  %v12038_v1 = vld [vmem:[#allocation26_spill] sm:$0xff] }
 0x3ce   : > { %v4097_v45 = vpop.f32.mrf.mxu1  ;;  %8630 = vmatprep.mubr.msk.bf16.mxu0 %vm9444_vm3, %v12028_v21  ;;  %8683 = vmatpush3.bf16.msra.mxu0 %v9295_v23  ;;  %v4451_v47 = vld [vmem:[#allocation2 + $0x11] sm:$0xff]  ;;  %v4397_v32 = vmax.f32 %v12036_v63, %v4304_v39  ;;  %v4354_v9 = vpop.f32.mrf.mxu0  ;;  %v9316_v39 = vld [vmem:[%s11929_s4 + $0x160] sm:$0xff]   ;;  %v9322_v63 = vld [vmem:[%s11929_s4 + $0x148] sm:$0xff]  }
 0x3cf   : > { %4410 = vst [vmem:[#allocation2 + $0x28] sm:$0xff] %v4383_v28  ;;  %v4339_v13 = vadd.f32 %v4338_v20, %v4097_v45  ;;  %v4430_v27 = vpack.c.bf16 %v4383_v28, %v4380_v35  ;;  %8684 = vmatprep.subr.bf16.mxu0 %v12028_v21  ;;  %8725 = vmatpush3.bf16.msra.mxu1 %v9300_v53  ;;  %v9305_v23 = vld [vmem:[%s11929_s4 + $0x90] sm:$0xff]  }
 0x3d0   : > { %v4099_v6 = vpop.f32.mrf.mxu1  ;;  %8726 = vmatprep.subr.bf16.mxu1 %v12028_v21  ;;  %v4394_v35 = vmax.f32 %v12035_v22, %v4299_v40  ;;  %v9315_v22 = vld [vmem:[%s11929_s4 + $0x128] sm:$0xff]  }
 0x3d1   : > { %v4386_v5 = vmax.f32 %v4385_v43, %v4339_v13  ;;  %8671 = vmatmul.mubr.bf16.gmra.mxu1 %v4430_v27  ;;  %v12039_v43 = vld [vmem:[#allocation7_spill] sm:$0xff] }
 0x3d2   : > { %v4102_v26 = vpop.f32.mrf.mxu1  ;;  %v4452_v49 = vld [vmem:[#allocation2 + $0x19] sm:$0xff]  ;;  %8685 = vmatpush3.bf16.msra.mxu0 %v9297_v0  ;;  %8674 = vmatprep.mubr.msk.bf16.mxu1 %vm9444_vm3, %v12028_v21  ;;  %v12040_v20 = vmax.f32 %v12038_v1, %v12039_v43  ;;  %v9328_v43 = vld [vmem:[%s11929_s4 + $0x1f0] sm:$0xff]  }
 0x3d3   : > { %4411 = vst [vmem:[#allocation2 + $0x30] sm:$0xff] %v4386_v5  ;;  %v4344_v51 = vadd.f32 %v11202_v48, %v4102_v26  ;;  %v4460_v17 = vpack.c.bf16 %v4452_v49, %v4451_v47  ;;  %8686 = vmatprep.subr.bf16.mxu0 %v12028_v21  ;;  %8727 = vmatpush3.bf16.msra.mxu1 %v9302_v36  ;;  %v9301_v48 = vld [vmem:[%s11929_s4 + $0xa0] sm:$0xff]   ;;  %v12041_v0 = vld [vmem:[#allocation17_spill] sm:$0xff]  ;;  %v4884_v47 = vld [vmem:[#allocation2 + $0xa] sm:$0xff] }
 0x3d4   : > { %v4104_v62 = vpop.f32.mrf.mxu1  ;;  %8728 = vmatprep.subr.bf16.mxu1 %v12028_v21  ;;  %v4400_v45 = vmax.f32 %v12040_v20, %v4307_v58  ;;  %v4312_v13 = vadd.f32 %v12042_v14, %v12041_v0  ;;  %v9309_v49 = vld [vmem:[%s11929_s4 + $0x80] sm:$0xff]   ;;  %v9321_v58 = vld [vmem:[%s11929_s4 + $0x110] sm:$0xff]   ;;  %v9330_v14 = vld [vmem:[%s11929_s4 + $0x1e8] sm:$0xff]  }
 0x3d5   : > { %v4389_v15 = vmax.f32 %v4388_v2, %v4344_v51  ;;  %8631 = vmatmul.mubr.bf16.gmra.mxu0 %v4460_v17  ;;  %v4886_v40 = vld [vmem:[#allocation2 + $0x1a] sm:$0xff] }
 0x3d6   : > { %v4105_v56 = vpop.f32.mrf.mxu1  ;;  %8634 = vmatprep.mubr.msk.bf16.mxu0 %vm9444_vm3, %v12028_v21  ;;  %8687 = vmatpush3.bf16.msra.mxu0 %v9299_v18  ;;  %v4453_v57 = vld [vmem:[#allocation2 + $0x21] sm:$0xff] }
 0x3d7   : > { %4412 = vst [vmem:[#allocation2 + $0x38] sm:$0xff] %v4389_v15  ;;  %v4347_v37 = vadd.f32 %v8605_v29, %v4105_v56  ;;  %v4431_v54 = vpack.c.bf16 %v4389_v15, %v4386_v5  ;;  %8688 = vmatprep.subr.bf16.mxu0 %v12028_v21  ;;  %8729 = vmatpush3.bf16.msra.mxu1 %v9304_v10  ;;  %v11324_v5 = vld [vmem:[#allocation2 + $0x12] sm:$0xff]  ;;  %v12043_v18 = vld [vmem:[#allocation6_spill] sm:$0xff] }
 0x3d8   : > { %v4107_v44 = vpop.f32.mrf.mxu1  ;;  %8730 = vmatprep.subr.bf16.mxu1 %v12028_v21  ;;  %v4894_v17 = vpack.c.bf16 %v11324_v5, %v4884_v47  ;;  %v9310_v10 = vld [vmem:[%s11929_s4 + $0x178] sm:$0xff]   ;;  %v9312_v56 = vld [vmem:[%s11929_s4 + $0x170] sm:$0xff]   ;;  %v11433_v20 = vld [vmem:[#allocation2 + $0x24] sm:$0xff] }
 0x3d9   : > { %v4392_v42 = vmax.f32 %v4391_v8, %v4347_v37  ;;  %8675 = vmatmul.mubr.bf16.gmra.mxu1 %v4431_v54  ;;  %v9314_v54 = vld [vmem:[%s11929_s4 + $0x168] sm:$0xff]   ;;  %v9311_v44 = vld [vmem:[%s11929_s4 + $0x138] sm:$0xff]  }
 0x3da   : > { %v4110_v4 = vpop.f32.mrf.mxu1  ;;  %v4454_v19 = vld [vmem:[#allocation2 + $0x29] sm:$0xff]  ;;  %8689 = vmatpush3.bf16.msra.mxu0 %v9301_v48  ;;  %8678 = vmatprep.mubr.msk.bf16.mxu1 %vm9444_vm3, %v12028_v21 }
 0x3db   : > { %4413 = vst [vmem:[#allocation2 + $0x40] sm:$0xff] %v4392_v42  ;;  %v4352_v46 = vadd.f32 %v4351_v52, %v4110_v4  ;;  %v4461_v29 = vpack.c.bf16 %v4454_v19, %v4453_v57  ;;  %8690 = vmatprep.subr.bf16.mxu0 %v12028_v21  ;;  %8731 = vmatpush3.bf16.msra.mxu1 %v9306_v11  ;;  %v4887_v48 = vld [vmem:[#allocation2 + $0x22] sm:$0xff]  ;;  %v4888_v4 = vld [vmem:[#allocation2 + $0x2a] sm:$0xff] }
 0x3dc   : > { %v4112_v60 = vpop.f32.mrf.mxu1  ;;  %8732 = vmatprep.subr.bf16.mxu1 %v12028_v21  ;;  %v4895_v37 = vpack.c.bf16 %v4887_v48, %v4886_v40  ;;  %v4722_v11 = vld [vmem:[#allocation2 + $0x2] sm:$0xff]  ;;  %v9313_v57 = vld [vmem:[%s11929_s4 + $0x130] sm:$0xff]  }
 0x3dd   : > { %v4395_v55 = vmax.f32 %v4394_v35, %v4352_v46  ;;  %8635 = vmatmul.mubr.bf16.gmra.mxu0 %v4461_v29  ;;  %v4733_v35 = vpack.c.bf16 %v4886_v40, %v11324_v5  ;;  %v9320_v46 = vld [vmem:[%s11929_s4 + $0x150] sm:$0xff]   ;;  %v9317_v60 = vld [vmem:[%s11929_s4 + $0x120] sm:$0xff]  }
 0x3de   : > { %v4113_v59 = vpop.f32.mrf.mxu1  ;;  %8638 = vmatprep.mubr.msk.bf16.mxu0 %vm9444_vm3, %v12028_v21  ;;  %8691 = vmatpush3.bf16.msra.mxu0 %v9303_v33  ;;  %v4455_v30 = vld [vmem:[#allocation2 + $0x31] sm:$0xff]  ;;  %v9332_v5 = vld [vmem:[%s11929_s4 + $0x1e0] sm:$0xff]  }
 0x3df   : > { %4414 = vst [vmem:[#allocation2 + $0x48] sm:$0xff] %v4395_v55  ;;  %v4355_v38 = vadd.f32 %v4354_v9, %v4113_v59  ;;  %v4432_v41 = vpack.c.bf16 %v4395_v55, %v4392_v42  ;;  %8692 = vmatprep.subr.bf16.mxu0 %v12028_v21  ;;  %8733 = vmatpush3.bf16.msra.mxu1 %v9308_v25  ;;  %v9318_v33 = vld [vmem:[%s11929_s4 + $0x158] sm:$0xff]   ;;  %v9324_v59 = vld [vmem:[%s11929_s4 + $0x140] sm:$0xff]  }
 0x3e0   : > { %v4115_v24 = vpop.f32.mrf.mxu1  ;;  %8790 = vmatprep.subr.bf16.mxu1 %v12028_v21  ;;  %v4732_v42 = vpack.c.bf16 %v4884_v47, %v4722_v11  ;;  %v4734_v9 = vpack.c.bf16 %v4888_v4, %v4887_v48  ;;  %v9329_v47 = vld [vmem:[%s11929_s4 + $0x1b0] sm:$0xff]   ;;  %v9335_v48 = vld [vmem:[%s11929_s4 + $0x198] sm:$0xff]  }
 0x3e1   : > { %v4398_v31 = vmax.f32 %v4397_v32, %v4355_v38  ;;  %8679 = vmatmul.mubr.bf16.gmra.mxu1 %v4432_v41  ;;  %v9319_v32 = vld [vmem:[%s11929_s4 + $0x118] sm:$0xff]   ;;  %v9323_v41 = vld [vmem:[%s11929_s4 + $0x108] sm:$0xff]  }
 0x3e2   : > { %v4118_v53 = vpop.f32.mrf.mxu1  ;;  %v4456_v28 = vld [vmem:[#allocation2 + $0x39] sm:$0xff]  ;;  %8693 = vmatpush3.bf16.msra.mxu0 %v9305_v23  ;;  %8734 = vmatprep.mubr.msk.bf16.mxu1 %vm9444_vm3, %v12028_v21 }
 0x3e3   : > { %4415 = vst [vmem:[#allocation2 + $0x50] sm:$0xff] %v4398_v31  ;;  %v4360_v27 = vadd.f32 %v11254_v34, %v4118_v53  ;;  %v4462_v36 = vpack.c.bf16 %v4456_v28, %v4455_v30  ;;  %8694 = vmatprep.subr.bf16.mxu0 %v12028_v21  ;;  %v12044_v34 = vld [vmem:[#allocation28_spill] sm:$0xff]  ;;  %v4890_v25 = vld [vmem:[#allocation2 + $0x3a] sm:$0xff] }
 0x3e4   : > { %v4120_v6 = vpop.f32.mrf.mxu1  ;;  %v12045_v61 = vmax.f32 %v12043_v18, %v12044_v34  ;;  %v11415_v31 = vld [vmem:[#allocation2 + $0x14] sm:$0xff]  ;;  %v5208_v53 = vld [vmem:[#allocation2 + $0xc] sm:$0xff]  ;;  %v9325_v30 = vld [vmem:[%s11929_s4 + $0x100] sm:$0xff]  }
 0x3e5   : > { %v4401_v50 = vmax.f32 %v4400_v45, %v4360_v27  ;;  %8639 = vmatmul.mubr.bf16.gmra.mxu0 %v4462_v36  ;;  %v5218_v28 = vpack.c.bf16 %v11415_v31, %v5208_v53  ;;  %v11438_v45 = vld [vmem:[#allocation2 + $0x1c] sm:$0xff]  ;;  %v5046_v27 = vld [vmem:[#allocation2 + $0xb] sm:$0xff] }
 0x3e6   : > { %v4121_v26 = vpop.f32.mrf.mxu1  ;;  %8642 = vmatprep.mubr.msk.bf16.mxu0 %vm9444_vm3, %v12028_v21  ;;  %8695 = vmatpush3.bf16.msra.mxu0 %v9307_v3  ;;  %v4403_v2 = vmax.f32 %v12045_v61, %v4312_v13  ;;  %v4457_v12 = vld [vmem:[#allocation2 + $0x41] sm:$0xff]  ;;  %v9326_v3 = vld [vmem:[%s11929_s4 + $0x1f8] sm:$0xff]   ;;  %v5219_v0 = vpack.c.bf16 %v11433_v20, %v11438_v45 }
 0x3e7   : > { %4416 = vst [vmem:[#allocation2 + $0x58] sm:$0xff] %v4401_v50  ;;  %v4363_v51 = vadd.f32 %v8609_v16, %v4121_v26  ;;  %8696 = vmatprep.subr.bf16.mxu0 %v12028_v21  ;;  %v4889_v16 = vld [vmem:[#allocation2 + $0x32] sm:$0xff]  ;;  %v4891_v29 = vld [vmem:[#allocation2 + $0x42] sm:$0xff] }
 0x3e8   : > { %v4123_v62 = vpop.f32.mrf.mxu1  ;;  %v4896_v19 = vpack.c.bf16 %v4889_v16, %v4888_v4  ;;  %v4897_v55 = vpack.c.bf16 %v4891_v29, %v4890_v25  ;;  %v4735_v24 = vpack.c.bf16 %v4890_v25, %v4889_v16  ;;  %v5047_v13 = vld [vmem:[#allocation2 + $0x13] sm:$0xff]  ;;  %v5049_v34 = vld [vmem:[#allocation2 + $0x23] sm:$0xff]  ;;  %v5048_v61 = vld [vmem:[#allocation2 + $0x1b] sm:$0xff] }
 0x3e9   : > { %v4404_v15 = vmax.f32 %v4403_v2, %v4363_v51  ;;  %8735 = vmatmul.mubr.bf16.vlgmr.msra.gmra.mxu1 %v4894_v17  ;;  %v9327_v36 = vld [vmem:[%s11929_s4 + $0x1b8] sm:$0xff]   ;;  %v5056_v6 = vpack.c.bf16 %v5047_v13, %v5046_v27  ;;  %v11459_v26 = vld [vmem:[#allocation2 + $0x2c] sm:$0xff]  ;;  %v5057_v51 = vpack.c.bf16 %v5049_v34, %v5048_v61  ;;  %v9345_v53 = vld [vmem:[%s11929_s4 + $0x220] sm:$0xff]  }
 0x3ea   : > { %v4458_v8 = vld [vmem:[#allocation2 + $0x49] sm:$0xff]  ;;  %8697 = vmatpush3.bf16.msra.mxu0 %v9309_v49  ;;  %8738 = vmatprep.mubr.msk.bf16.mxu1 %vm9444_vm3, %v12028_v21  ;;  %v11454_v50 = vld [vmem:[#allocation2 + $0x34] sm:$0xff]  ;;  %v11485_v62 = vld [vmem:[#allocation2 + $0x3c] sm:$0xff] }
 0x3eb   : > { %4417 = vst [vmem:[#allocation2 + $0x60] sm:$0xff] %v4404_v15  ;;  %v4463_v52 = vpack.c.bf16 %v4458_v8, %v4457_v12  ;;  %8791 = vmatpush3.bf16.msra.mxu1 %v9310_v10  ;;  %8754 = vmatprep.subr.bf16.mxu0 %v12028_v21  ;;  %v4892_v7 = vld [vmem:[#allocation2 + $0x4a] sm:$0xff]  ;;  %v5220_v49 = vpack.c.bf16 %v11454_v50, %v11459_v26  ;;  %v9334_v18 = vld [vmem:[%s11929_s4 + $0x1d8] sm:$0xff]   ;;  %v9333_v15 = vld [vmem:[%s11929_s4 + $0x1a0] sm:$0xff]  }
 0x3ec   : > { %8792 = vmatprep.subr.bf16.mxu1 %v12028_v21  ;;  %v4736_v1 = vpack.c.bf16 %v4892_v7, %v4891_v29  ;;  %v9331_v2 = vld [vmem:[%s11929_s4 + $0x1a8] sm:$0xff]   ;;  %v9336_v17 = vld [vmem:[%s11929_s4 + $0x1d0] sm:$0xff]   ;;  %v5052_v16 = vld [vmem:[#allocation2 + $0x3b] sm:$0xff] }
 0x3ed   : > { %8643 = vmatmul.mubr.bf16.gmra.mxu0 %v4463_v52  ;;  %v11480_v10 = vld [vmem:[#allocation2 + $0x44] sm:$0xff]  ;;  %v5051_v52 = vld [vmem:[#allocation2 + $0x33] sm:$0xff] }
 0x3ee   : > { %8698 = vmatprep.mubr.msk.bf16.mxu0 %vm9444_vm3, %v12028_v21  ;;  %v4893_v23 = vld [vmem:[#allocation2 + $0x52] sm:$0xff]  ;;  %v5221_v12 = vpack.c.bf16 %v11480_v10, %v11485_v62  ;;  %v9338_v8 = vld [vmem:[%s11929_s4 + $0x1c8] sm:$0xff]   ;;  %v9349_v13 = vld [vmem:[%s11929_s4 + $0x200] sm:$0xff]  }
 0x3ef   : > { %8793 = vmatpush3.bf16.msra.mxu1 %v9312_v56  ;;  %v4898_v38 = vpack.c.bf16 %v4893_v23, %v4892_v7  ;;  %v5050_v56 = vld [vmem:[#allocation2 + $0x2b] sm:$0xff]  ;;  %v5536_v23 = vld [vmem:[#allocation2 + $0x35] sm:$0xff] }
 0x3f0   : > { %8794 = vmatprep.subr.bf16.mxu1 %v12028_v21  ;;  %v5058_v40 = vpack.c.bf16 %v5051_v52, %v5050_v56  ;;  %v11511_v11 = vld [vmem:[#allocation2 + $0x4c] sm:$0xff]  ;;  %v5698_v34 = vld [vmem:[#allocation2 + $0x36] sm:$0xff] }
 0x3f1   : > { %8739 = vmatmul.mubr.bf16.gmra.mxu1 %v4895_v37  ;;  %v9340_v37 = vld [vmem:[%s11929_s4 + $0x1c0] sm:$0xff]   ;;  %v9339_v4 = vld [vmem:[%s11929_s4 + $0x188] sm:$0xff]   ;;  %v9343_v7 = vld [vmem:[%s11929_s4 + $0x230] sm:$0xff]  }
 0x3f2   : > { %8742 = vmatprep.mubr.msk.bf16.mxu1 %vm9444_vm3, %v12028_v21  ;;  %v5054_v29 = vld [vmem:[#allocation2 + $0x4b] sm:$0xff]  ;;  %v5379_v27 = vld [vmem:[#allocation2 + $0x5c] sm:$0xff] }
 0x3f3   : > { %8795 = vmatpush3.bf16.msra.mxu1 %v9314_v54  ;;  %v11506_v54 = vld [vmem:[#allocation2 + $0x54] sm:$0xff] }
 0x3f4   : > { %8796 = vmatprep.subr.bf16.mxu1 %v12028_v21  ;;  %v5702_v56 = vld [vmem:[#allocation2 + $0x56] sm:$0xff] }
 0x3f5   : > { %8699 = vmatmul.mubr.bf16.vlgmr.msra.gmra.mxu0 %v4732_v42  ;;  %v5222_v42 = vpack.c.bf16 %v11506_v54, %v11511_v11 }
 0x3f6   : > { %8702 = vmatprep.mubr.msk.bf16.mxu0 %vm9444_vm3, %v12028_v21  ;;  %8755 = vmatpush3.bf16.msra.mxu0 %v9311_v44  ;;  %v9337_v44 = vld [vmem:[%s11929_s4 + $0x190] sm:$0xff]  }
 0x3f7   : > { %8756 = vmatprep.subr.bf16.mxu0 %v12028_v21  ;;  %8797 = vmatpush3.bf16.msra.mxu1 %v9316_v39  ;;  %v5053_v39 = vld [vmem:[#allocation2 + $0x43] sm:$0xff] }
 0x3f8   : > { %8798 = vmatprep.subr.bf16.mxu1 %v12028_v21 }
 0x3f9   : > { %8743 = vmatmul.mubr.bf16.gmra.mxu1 %v4896_v19  ;;  %v5533_v19 = vld [vmem:[#allocation2 + $0x1d] sm:$0xff] }
 0x3fa   : > { %8757 = vmatpush3.bf16.msra.mxu0 %v9313_v57  ;;  %8746 = vmatprep.mubr.msk.bf16.mxu1 %vm9444_vm3, %v12028_v21  ;;  %v5059_v57 = vpack.c.bf16 %v5053_v39, %v5052_v16 }
 0x3fb   : > { %8758 = vmatprep.subr.bf16.mxu0 %v12028_v21  ;;  %8799 = vmatpush3.bf16.msra.mxu1 %v9318_v33  ;;  %v5532_v33 = vld [vmem:[#allocation2 + $0x15] sm:$0xff] }
 0x3fc   : > { %8800 = vmatprep.subr.bf16.mxu1 %v12028_v21 }
 0x3fd   : > { %8703 = vmatmul.mubr.bf16.gmra.mxu0 %v4733_v35  ;;  %v5542_v35 = vpack.c.bf16 %v5533_v19, %v5532_v33 }
 0x3fe   : > { %8706 = vmatprep.mubr.msk.bf16.mxu0 %vm9444_vm3, %v12028_v21  ;;  %8759 = vmatpush3.bf16.msra.mxu0 %v9315_v22  ;;  %v9341_v22 = vld [vmem:[%s11929_s4 + $0x180] sm:$0xff]  }
 0x3ff   : > { %8760 = vmatprep.subr.bf16.mxu0 %v12028_v21  ;;  %8801 = vmatpush3.bf16.msra.mxu1 %v9320_v46  ;;  %v5055_v46 = vld [vmem:[#allocation2 + $0x53] sm:$0xff] }
 0x400   : > { %8802 = vmatprep.subr.bf16.mxu1 %v12028_v21  ;;  %v5060_v25 = vpack.c.bf16 %v5055_v46, %v5054_v29 }
 0x401   : > { %8747 = vmatmul.mubr.bf16.gmra.mxu1 %v4897_v55  ;;  %v5534_v55 = vld [vmem:[#allocation2 + $0x25] sm:$0xff] }
 0x402   : > { %8761 = vmatpush3.bf16.msra.mxu0 %v9317_v60  ;;  %8750 = vmatprep.mubr.msk.bf16.mxu1 %vm9444_vm3, %v12028_v21  ;;  %v5535_v60 = vld [vmem:[#allocation2 + $0x2d] sm:$0xff] }
 0x403   : > { %8762 = vmatprep.subr.bf16.mxu0 %v12028_v21  ;;  %8803 = vmatpush3.bf16.msra.mxu1 %v9322_v63  ;;  %v5543_v63 = vpack.c.bf16 %v5535_v60, %v5534_v55 }
 0x404   : > { %8804 = vmatprep.subr.bf16.mxu1 %v12028_v21 }
 0x405   : > { %8707 = vmatmul.mubr.bf16.gmra.mxu0 %v4734_v9  ;;  %v5380_v9 = vpack.c.bf16 %v11438_v45, %v11415_v31  ;;  %v5538_v31 = vld [vmem:[#allocation2 + $0x45] sm:$0xff] }
 0x406   : > { %8710 = vmatprep.mubr.msk.bf16.mxu0 %vm9444_vm3, %v12028_v21  ;;  %8763 = vmatpush3.bf16.msra.mxu0 %v9319_v32  ;;  %v9342_v32 = vld [vmem:[%s11929_s4 + $0x238] sm:$0xff]  }
 0x407   : > { %8764 = vmatprep.subr.bf16.mxu0 %v12028_v21  ;;  %8805 = vmatpush3.bf16.msra.mxu1 %v9324_v59  ;;  %v5537_v59 = vld [vmem:[#allocation2 + $0x3d] sm:$0xff] }
 0x408   : > { %8862 = vmatprep.subr.bf16.mxu1 %v12028_v21 }
 0x409   : > { %8751 = vmatmul.mubr.bf16.gmra.mxu1 %v4898_v38  ;;  %v9344_v38 = vld [vmem:[%s11929_s4 + $0x228] sm:$0xff]  }
 0x40a   : > { %8765 = vmatpush3.bf16.msra.mxu0 %v9321_v58  ;;  %8806 = vmatprep.mubr.msk.bf16.mxu1 %vm9444_vm3, %v12028_v21  ;;  %v5544_v58 = vpack.c.bf16 %v5537_v59, %v5536_v23 }
 0x40b   : > { %8766 = vmatprep.subr.bf16.mxu0 %v12028_v21 }
 0x40d   : > { %8711 = vmatmul.mubr.bf16.gmra.mxu0 %v4735_v24  ;;  %v5539_v24 = vld [vmem:[#allocation2 + $0x4d] sm:$0xff] }
 0x40e   : > { %8714 = vmatprep.mubr.msk.bf16.mxu0 %vm9444_vm3, %v12028_v21  ;;  %8767 = vmatpush3.bf16.msra.mxu0 %v9323_v41  ;;  %v5381_v41 = vpack.c.bf16 %v11459_v26, %v11433_v20  ;;  %v9347_v20 = vld [vmem:[%s11929_s4 + $0x210] sm:$0xff]  }
 0x40f   : > { %8768 = vmatprep.subr.bf16.mxu0 %v12028_v21  ;;  %v5697_v26 = vld [vmem:[#allocation2 + $0x2e] sm:$0xff] }
 0x411   : > { %8807 = vmatmul.mubr.bf16.vlgmr.msra.gmra.mxu1 %v5218_v28  ;;  %v9346_v28 = vld [vmem:[%s11929_s4 + $0x218] sm:$0xff]  }
 0x412   : > { %8769 = vmatpush3.bf16.msra.mxu0 %v9325_v30  ;;  %8810 = vmatprep.mubr.msk.bf16.mxu1 %vm9444_vm3, %v12028_v21  ;;  %v5545_v30 = vpack.c.bf16 %v5539_v24, %v5538_v31 }
 0x413   : > { %8863 = vmatpush3.bf16.msra.mxu1 %v9326_v3  ;;  %8826 = vmatprep.subr.bf16.mxu0 %v12028_v21  ;;  %v5382_v3 = vpack.c.bf16 %v11485_v62, %v11454_v50 }
 0x414   : > { %8864 = vmatprep.subr.bf16.mxu1 %v12028_v21 }
 0x415   : > { %8715 = vmatmul.mubr.bf16.gmra.mxu0 %v4736_v1  ;;  %v5541_v1 = vld [vmem:[#allocation2 + $0x5d] sm:$0xff] }
 0x416   : > { %8770 = vmatprep.mubr.msk.bf16.mxu0 %vm9444_vm3, %v12028_v21 }
 0x417   : > { %8865 = vmatpush3.bf16.msra.mxu1 %v9328_v43  ;;  %v5540_v43 = vld [vmem:[#allocation2 + $0x55] sm:$0xff] }
 0x418   : > { %8866 = vmatprep.subr.bf16.mxu1 %v12028_v21  ;;  %v5546_v45 = vpack.c.bf16 %v5541_v1, %v5540_v43 }
 0x419   : > { %8811 = vmatmul.mubr.bf16.gmra.mxu1 %v5219_v0  ;;  %v9348_v0 = vld [vmem:[%s11929_s4 + $0x208] sm:$0xff]  }
 0x41a   : > { %8814 = vmatprep.mubr.msk.bf16.mxu1 %vm9444_vm3, %v12028_v21 }
 0x41b   : > { %8867 = vmatpush3.bf16.msra.mxu1 %v9330_v14  ;;  %v5383_v14 = vpack.c.bf16 %v11511_v11, %v11480_v10 }
 0x41c   : > { %8868 = vmatprep.subr.bf16.mxu1 %v12028_v21 }
 0x41d   : > { %8771 = vmatmul.mubr.bf16.vlgmr.msra.gmra.mxu0 %v5056_v6  ;;  %v5695_v6 = vld [vmem:[#allocation2 + $0x1e] sm:$0xff] }
 0x41e   : > { %8774 = vmatprep.mubr.msk.bf16.mxu0 %vm9444_vm3, %v12028_v21  ;;  %8827 = vmatpush3.bf16.msra.mxu0 %v9327_v36  ;;  %v5384_v36 = vpack.c.bf16 %v5379_v27, %v11506_v54 }
 0x41f   : > { %8828 = vmatprep.subr.bf16.mxu0 %v12028_v21  ;;  %8869 = vmatpush3.bf16.msra.mxu1 %v9332_v5  ;;  %v5694_v5 = vld [vmem:[#allocation2 + $0x16] sm:$0xff] }
 0x420   : > { %8870 = vmatprep.subr.bf16.mxu1 %v12028_v21  ;;  %v5704_v50 = vpack.c.bf16 %v5695_v6, %v5694_v5 }
 0x421   : > { %8815 = vmatmul.mubr.bf16.gmra.mxu1 %v5220_v49 }
 0x422   : > { %8829 = vmatpush3.bf16.msra.mxu0 %v9329_v47  ;;  %8818 = vmatprep.mubr.msk.bf16.mxu1 %vm9444_vm3, %v12028_v21  ;;  %v5696_v47 = vld [vmem:[#allocation2 + $0x26] sm:$0xff] }
 0x423   : > { %8830 = vmatprep.subr.bf16.mxu0 %v12028_v21  ;;  %8871 = vmatpush3.bf16.msra.mxu1 %v9334_v18  ;;  %v5705_v49 = vpack.c.bf16 %v5697_v26, %v5696_v47  ;;  %v5699_v18 = vld [vmem:[#allocation2 + $0x3e] sm:$0xff] }
 0x424   : > { %8872 = vmatprep.subr.bf16.mxu1 %v12028_v21  ;;  %v5706_v61 = vpack.c.bf16 %v5699_v18, %v5698_v34 }
 0x425   : > { %8775 = vmatmul.mubr.bf16.gmra.mxu0 %v5057_v51 }
 0x426   : > { %8778 = vmatprep.mubr.msk.bf16.mxu0 %vm9444_vm3, %v12028_v21  ;;  %8831 = vmatpush3.bf16.msra.mxu0 %v9331_v2  ;;  %v5701_v2 = vld [vmem:[#allocation2 + $0x4e] sm:$0xff] }
 0x427   : > { %8832 = vmatprep.subr.bf16.mxu0 %v12028_v21  ;;  %8873 = vmatpush3.bf16.msra.mxu1 %v9336_v17  ;;  %v5700_v17 = vld [vmem:[#allocation2 + $0x46] sm:$0xff] }
 0x428   : > { %8874 = vmatprep.subr.bf16.mxu1 %v12028_v21  ;;  %v5707_v10 = vpack.c.bf16 %v5701_v2, %v5700_v17 }
 0x429   : > { %8819 = vmatmul.mubr.bf16.gmra.mxu1 %v5221_v12 }
 0x42a   : > { %8833 = vmatpush3.bf16.msra.mxu0 %v9333_v15  ;;  %8822 = vmatprep.mubr.msk.bf16.mxu1 %vm9444_vm3, %v12028_v21 }
 0x42b   : > { %8834 = vmatprep.subr.bf16.mxu0 %v12028_v21  ;;  %8875 = vmatpush3.bf16.msra.mxu1 %v9338_v8  ;;  %v5703_v8 = vld [vmem:[#allocation2 + $0x5e] sm:$0xff] }
 0x42c   : > { %8876 = vmatprep.subr.bf16.mxu1 %v12028_v21 }
 0x42d   : > { %8779 = vmatmul.mubr.bf16.gmra.mxu0 %v5058_v40 }
 0x42e   : > { %8782 = vmatprep.mubr.msk.bf16.mxu0 %vm9444_vm3, %v12028_v21  ;;  %8835 = vmatpush3.bf16.msra.mxu0 %v9335_v48  ;;  %v5708_v48 = vpack.c.bf16 %v5703_v8, %v5702_v56 }
 0x42f   : > { %8836 = vmatprep.subr.bf16.mxu0 %v12028_v21  ;;  %8877 = vmatpush3.bf16.msra.mxu1 %v9340_v37 }
 0x431   : > { %8823 = vmatmul.mubr.bf16.gmra.mxu1 %v5222_v42 }
 0x432   : > { %8837 = vmatpush3.bf16.msra.mxu0 %v9337_v44  ;;  %8878 = vmatprep.mubr.msk.bf16.mxu1 %vm9444_vm3, %v12028_v21 }
 0x433   : > { %8838 = vmatprep.subr.bf16.mxu0 %v12028_v21 }
 0x435   : > { %8783 = vmatmul.mubr.bf16.gmra.mxu0 %v5059_v57 }
 0x436   : > { %8786 = vmatprep.mubr.msk.bf16.mxu0 %vm9444_vm3, %v12028_v21  ;;  %8839 = vmatpush3.bf16.msra.mxu0 %v9339_v4 }
 0x437   : > { %8840 = vmatprep.subr.bf16.mxu0 %v12028_v21 }
 0x439   : > { %8879 = vmatmul.mubr.bf16.vlgmr.msra.gmra.mxu1 %v5542_v35 }
 0x43a   : > { %8841 = vmatpush3.bf16.msra.mxu0 %v9341_v22  ;;  %8882 = vmatprep.mubr.msk.bf16.mxu1 %vm9444_vm3, %v12028_v21 }
 0x43b   : > { %8898 = vmatprep.subr.bf16.mxu0 %v12028_v21 }
 0x43d   : > { %8787 = vmatmul.mubr.bf16.gmra.mxu0 %v5060_v25 }
 0x43e   : > { %8842 = vmatprep.mubr.msk.bf16.mxu0 %vm9444_vm3, %v12028_v21 }
 0x441   : > { %8883 = vmatmul.mubr.bf16.gmra.mxu1 %v5543_v63 }
 0x442   : > { %8886 = vmatprep.mubr.msk.bf16.mxu1 %vm9444_vm3, %v12028_v21 }
 0x445   : > { %8843 = vmatmul.mubr.bf16.vlgmr.msra.gmra.mxu0 %v5380_v9 }
 0x446   : > { %8846 = vmatprep.mubr.msk.bf16.mxu0 %vm9444_vm3, %v12028_v21  ;;  %8899 = vmatpush3.bf16.msra.mxu0 %v9342_v32 }
 0x447   : > { %8900 = vmatprep.subr.bf16.mxu0 %v12028_v21 }
 0x449   : > { %8887 = vmatmul.mubr.bf16.gmra.mxu1 %v5544_v58 }
 0x44a   : > { %8901 = vmatpush3.bf16.msra.mxu0 %v9343_v7  ;;  %8890 = vmatprep.mubr.msk.bf16.mxu1 %vm9444_vm3, %v12028_v21 }
 0x44b   : > { %8902 = vmatprep.subr.bf16.mxu0 %v12028_v21 }
 0x44d   : > { %8847 = vmatmul.mubr.bf16.gmra.mxu0 %v5381_v41 }
 0x44e   : > { %8850 = vmatprep.mubr.msk.bf16.mxu0 %vm9444_vm3, %v12028_v21  ;;  %8903 = vmatpush3.bf16.msra.mxu0 %v9344_v38 }
 0x44f   : > { %8904 = vmatprep.subr.bf16.mxu0 %v12028_v21 }
 0x451   : > { %8891 = vmatmul.mubr.bf16.gmra.mxu1 %v5545_v30 }
 0x452   : > { %8905 = vmatpush3.bf16.msra.mxu0 %v9345_v53  ;;  %8894 = vmatprep.mubr.msk.bf16.mxu1 %vm9444_vm3, %v12028_v21 }
 0x453   : > { %8906 = vmatprep.subr.bf16.mxu0 %v12028_v21 }
 0x455   : > { %8851 = vmatmul.mubr.bf16.gmra.mxu0 %v5382_v3 }
 0x456   : > { %8854 = vmatprep.mubr.msk.bf16.mxu0 %vm9444_vm3, %v12028_v21  ;;  %8907 = vmatpush3.bf16.msra.mxu0 %v9346_v28 }
 0x457   : > { %8908 = vmatprep.subr.bf16.mxu0 %v12028_v21 }
 0x459   : > { %8895 = vmatmul.mubr.bf16.gmra.mxu1 %v5546_v45 }
 0x45a   : > { %8909 = vmatpush3.bf16.msra.mxu0 %v9347_v20 }
 0x45b   : > { %8910 = vmatprep.subr.bf16.mxu0 %v12028_v21 }
 0x45d   : > { %8855 = vmatmul.mubr.bf16.gmra.mxu0 %v5383_v14 }
 0x45e   : > { %8858 = vmatprep.mubr.msk.bf16.mxu0 %vm9444_vm3, %v12028_v21  ;;  %8911 = vmatpush3.bf16.msra.mxu0 %v9348_v0 }
 0x45f   : > { %8912 = vmatprep.subr.bf16.mxu0 %v12028_v21 }
 0x462   : > { %8913 = vmatpush3.bf16.msra.mxu0 %v9349_v13 }
 0x465   : > { %8859 = vmatmul.mubr.bf16.gmra.mxu0 %v5384_v36 }
 0x466   : > { %8914 = vmatprep.mubr.msk.bf16.mxu0 %vm9444_vm3, %v12028_v21 }
 0x46d   : > { %8915 = vmatmul.mubr.bf16.vlgmr.msra.gmra.mxu0 %v5704_v50 }
 0x46e   : > { %8918 = vmatprep.mubr.msk.bf16.mxu0 %vm9444_vm3, %v12028_v21 }
 0x475   : > { %8919 = vmatmul.mubr.bf16.gmra.mxu0 %v5705_v49 }
 0x476   : > { %8922 = vmatprep.mubr.msk.bf16.mxu0 %vm9444_vm3, %v12028_v21 }
 0x47d   : > { %8923 = vmatmul.mubr.bf16.gmra.mxu0 %v5706_v61 }
 0x47e   : > { %8926 = vmatprep.mubr.msk.bf16.mxu0 %vm9444_vm3, %v12028_v21 }
 0x481   : > { %v4683_v51 = vpop.f32.mrf.mxu1 }
 0x483   : > { %v8664_v62 = vpop.f32.mrf.mxu1 }
 0x485   : > { %8927 = vmatmul.mubr.bf16.gmra.mxu0 %v5707_v10  ;;  %v4686_v15 = vpop.f32.mrf.mxu1 }
 0x486   : > { %8930 = vmatprep.mubr.msk.bf16.mxu0 %vm9444_vm3, %v12028_v21 }
 0x487   : > { %v8665_v12 = vpop.f32.mrf.mxu1 }
 0x489   : > { %v4691_v52 = vpop.f32.mrf.mxu1 }
 0x48b   : > { %v8668_v40 = vpop.f32.mrf.mxu1 }
 0x48d   : > { %v4562_v37 = vpop.f32.mrf.mxu0  ;;  %8931 = vmatmul.mubr.bf16.gmra.mxu0 %v5708_v48  ;;  %v4694_v54 = vpop.f32.mrf.mxu1 }
 0x48e   : > { %v4684_v11 = vadd.f32 %v4683_v51, %v4562_v37 }
 0x48f   : > { %v8628_v44 = vpop.f32.mrf.mxu0  ;;  %v8669_v42 = vpop.f32.mrf.mxu1 }
 0x491   : > { %v4565_v39 = vpop.f32.mrf.mxu0  ;;  %v4699_v16 = vpop.f32.mrf.mxu1 }
 0x492   : > { %v4687_v4 = vadd.f32 %v4686_v15, %v4565_v39 }
 0x493   : > { %v8629_v57 = vpop.f32.mrf.mxu0  ;;  %v8672_v19 = vpop.f32.mrf.mxu1 }
 0x495   : > { %v4570_v33 = vpop.f32.mrf.mxu0  ;;  %v4702_v22 = vpop.f32.mrf.mxu1 }
 0x496   : > { %v4692_v21 = vadd.f32 %v4691_v52, %v4570_v33 }
 0x497   : > { %v8632_v35 = vpop.f32.mrf.mxu0  ;;  %v8673_v46 = vpop.f32.mrf.mxu1 }
 0x499   : > { %v4573_v29 = vpop.f32.mrf.mxu0  ;;  %v4707_v25 = vpop.f32.mrf.mxu1 }
 0x49a   : > { %v4695_v60 = vadd.f32 %v4694_v54, %v4573_v29 }
 0x49b   : > { %v8633_v55 = vpop.f32.mrf.mxu0  ;;  %v8676_v63 = vpop.f32.mrf.mxu1 }
 0x49d   : > { %v4578_v32 = vpop.f32.mrf.mxu0  ;;  %v4710_v9 = vpop.f32.mrf.mxu1 }
 0x49e   : > { %v4700_v59 = vadd.f32 %v4699_v16, %v4578_v32 }
 0x49f   : > { %v8636_v23 = vpop.f32.mrf.mxu0  ;;  %v8677_v7 = vpop.f32.mrf.mxu1 }
 0x4a1   : > { %v4581_v58 = vpop.f32.mrf.mxu0  ;;  %v4715_v38 = vpop.f32.mrf.mxu1 }
 0x4a2   : > { %v4703_v41 = vadd.f32 %v4702_v22, %v4581_v58 }
 0x4a3   : > { %v8637_v24 = vpop.f32.mrf.mxu0  ;;  %v8680_v31 = vpop.f32.mrf.mxu1 }
 0x4a5   : > { %v4586_v53 = vpop.f32.mrf.mxu0  ;;  %v4718_v30 = vpop.f32.mrf.mxu1 }
 0x4a6   : > { %v4708_v28 = vadd.f32 %v4707_v25, %v4586_v53 }
 0x4a7   : > { %v8640_v3 = vpop.f32.mrf.mxu0  ;;  %v8681_v1 = vpop.f32.mrf.mxu1 }
 0x4a9   : > { %v4589_v43 = vpop.f32.mrf.mxu0  ;;  %v4997_v20 = vpop.f32.mrf.mxu1 }
 0x4aa   : > { %v4711_v45 = vadd.f32 %v4710_v9, %v4589_v43 }
 0x4ab   : > { %v8641_v0 = vpop.f32.mrf.mxu0  ;;  %v8736_v14 = vpop.f32.mrf.mxu1 }
 0x4ad   : > { %v4594_v13 = vpop.f32.mrf.mxu0  ;;  %v5000_v27 = vpop.f32.mrf.mxu1 }
 0x4ae   : > { %v4716_v36 = vadd.f32 %v4715_v38, %v4594_v13 }
 0x4af   : > { %v8644_v6 = vpop.f32.mrf.mxu0  ;;  %v8737_v5 = vpop.f32.mrf.mxu1 }
 0x4b1   : > { %v4597_v50 = vpop.f32.mrf.mxu0  ;;  %v5005_v26 = vpop.f32.mrf.mxu1 }
 0x4b2   : > { %v4719_v47 = vadd.f32 %v4718_v30, %v4597_v50 }
 0x4b3   : > { %v8645_v49 = vpop.f32.mrf.mxu0  ;;  %v8740_v18 = vpop.f32.mrf.mxu1 }
 0x4b5   : > { %v4835_v34 = vpop.f32.mrf.mxu0  ;;  %v5008_v61 = vpop.f32.mrf.mxu1 }
 0x4b6   : > { %v4874_v2 = vadd.f32 %v4835_v34, %v4684_v11 }
 0x4b7   : > { %v8700_v51 = vpop.f32.mrf.mxu0  ;;  %v8741_v17 = vpop.f32.mrf.mxu1 }
 0x4b8   : > { %v5036_v10 = vadd.f32 %v4997_v20, %v4874_v2 }
 0x4b9   : > { %v4838_v62 = vpop.f32.mrf.mxu0  ;;  %v5013_v15 = vpop.f32.mrf.mxu1 }
 0x4ba   : > { %v4875_v12 = vadd.f32 %v4838_v62, %v4687_v4 }
 0x4bb   : > { %v8701_v8 = vpop.f32.mrf.mxu0  ;;  %v8744_v52 = vpop.f32.mrf.mxu1 }
 0x4bc   : > { %v5037_v56 = vadd.f32 %v5000_v27, %v4875_v12 }
 0x4bd   : > { %v4843_v48 = vpop.f32.mrf.mxu0  ;;  %v5016_v40 = vpop.f32.mrf.mxu1 }
 0x4be   : > { %v4876_v37 = vadd.f32 %v4843_v48, %v4692_v21 }
 0x4bf   : > { %v8704_v54 = vpop.f32.mrf.mxu0  ;;  %v8745_v44 = vpop.f32.mrf.mxu1 }
 0x4c0   : > { %v5038_v42 = vadd.f32 %v5005_v26, %v4876_v37 }
 0x4c1   : > { %v4846_v39 = vpop.f32.mrf.mxu0  ;;  %v5021_v16 = vpop.f32.mrf.mxu1 }
 0x4c2   : > { %v4877_v57 = vadd.f32 %v4846_v39, %v4695_v60 }
 0x4c3   : > { %v8705_v19 = vpop.f32.mrf.mxu0  ;;  %v8748_v11 = vpop.f32.mrf.mxu1 }
 0x4c4   : > { %v5039_v33 = vadd.f32 %v5008_v61, %v4877_v57  ;;  %v9350_v19 = vld [vmem:[%s11931_s6] sm:$0xff]  }
 0x4c5   : > { %v4851_v22 = vpop.f32.mrf.mxu0  ;;  %v5024_v35 = vpop.f32.mrf.mxu1  ;;  %8944 = vmatprep.mubr.msk.bf16.mxu1 %vm5958_vm4, %v9350_v19 }
 0x4c6   : > { %v4878_v46 = vadd.f32 %v4851_v22, %v4700_v59 }
 0x4c7   : > { %v8708_v29 = vpop.f32.mrf.mxu0  ;;  %v8749_v4 = vpop.f32.mrf.mxu1 }
 0x4c8   : > { %v5040_v25 = vadd.f32 %v5013_v15, %v4878_v46 }
 0x4c9   : > { %v4854_v55 = vpop.f32.mrf.mxu0  ;;  %v5029_v63 = vpop.f32.mrf.mxu1 }
 0x4ca   : > { %v4879_v32 = vadd.f32 %v4854_v55, %v4703_v41 }
 0x4cb   : > { %v8709_v9 = vpop.f32.mrf.mxu0  ;;  %v8752_v21 = vpop.f32.mrf.mxu1 }
 0x4cc   : > { %v5041_v23 = vadd.f32 %v5016_v40, %v4879_v32 }
 0x4cd   : > { %v4859_v7 = vpop.f32.mrf.mxu0  ;;  %v5032_v58 = vpop.f32.mrf.mxu1 }
 0x4ce   : > { %v4880_v38 = vadd.f32 %v4859_v7, %v4708_v28 }
 0x4cf   : > { %v8712_v24 = vpop.f32.mrf.mxu0  ;;  %v8753_v60 = vpop.f32.mrf.mxu1 }
 0x4d0   : > { %v5042_v31 = vadd.f32 %v5021_v16, %v4880_v38 }
 0x4d1   : > { %v4862_v53 = vpop.f32.mrf.mxu0  ;;  %v5321_v30 = vpop.f32.mrf.mxu1 }
 0x4d2   : > { %v4881_v3 = vadd.f32 %v4862_v53, %v4711_v45 }
 0x4d3   : > { %v8713_v1 = vpop.f32.mrf.mxu0  ;;  %v8808_v59 = vpop.f32.mrf.mxu1 }
 0x4d4   : > { %v5043_v43 = vadd.f32 %v5024_v35, %v4881_v3 }
 0x4d5   : > { %v4867_v20 = vpop.f32.mrf.mxu0  ;;  %v5324_v0 = vpop.f32.mrf.mxu1 }
 0x4d6   : > { %v4882_v14 = vadd.f32 %v4867_v20, %v4716_v36 }
 0x4d7   : > { %v8716_v13 = vpop.f32.mrf.mxu0  ;;  %v8809_v41 = vpop.f32.mrf.mxu1 }
 0x4d8   : > { %v5044_v27 = vadd.f32 %v5029_v63, %v4882_v14 }
 0x4d9   : > { %v4870_v6 = vpop.f32.mrf.mxu0  ;;  %v5329_v5 = vpop.f32.mrf.mxu1 }
 0x4da   : > { %v4883_v50 = vadd.f32 %v4870_v6, %v4719_v47 }
 0x4db   : > { %v8717_v26 = vpop.f32.mrf.mxu0  ;;  %v8812_v28 = vpop.f32.mrf.mxu1 }
 0x4dc   : > { %v5045_v49 = vadd.f32 %v5032_v58, %v4883_v50 }
 0x4dd   : > { %v5159_v18 = vpop.f32.mrf.mxu0  ;;  %v5332_v34 = vpop.f32.mrf.mxu1 }
 0x4de   : > { %v5198_v61 = vadd.f32 %v5159_v18, %v5036_v10 }
 0x4df   : > { %v8772_v2 = vpop.f32.mrf.mxu0  ;;  %v8813_v45 = vpop.f32.mrf.mxu1 }
 0x4e0   : > { %v5360_v51 = vadd.f32 %v5321_v30, %v5198_v61 }
 0x4e1   : > { %v5162_v17 = vpop.f32.mrf.mxu0  ;;  %v5337_v62 = vpop.f32.mrf.mxu1 }
 0x4e2   : > { %v5199_v15 = vadd.f32 %v5162_v17, %v5037_v56 }
 0x4e3   : > { %v8773_v12 = vpop.f32.mrf.mxu0  ;;  %v8816_v36 = vpop.f32.mrf.mxu1 }
 0x4e4   : > { %v5361_v8 = vadd.f32 %v5324_v0, %v5199_v15 }
 0x4e5   : > { %v5167_v52 = vpop.f32.mrf.mxu0  ;;  %v5340_v48 = vpop.f32.mrf.mxu1 }
 0x4e6   : > { %v5200_v40 = vadd.f32 %v5167_v52, %v5038_v42 }
 0x4e7   : > { %v8776_v37 = vpop.f32.mrf.mxu0  ;;  %v8817_v47 = vpop.f32.mrf.mxu1 }
 0x4e8   : > { %v5362_v54 = vadd.f32 %v5329_v5, %v5200_v40 }
 0x4e9   : > { %v5170_v44 = vpop.f32.mrf.mxu0  ;;  %v5345_v39 = vpop.f32.mrf.mxu1 }
 0x4ea   : > { %v5201_v16 = vadd.f32 %v5170_v44, %v5039_v33 }
 0x4eb   : > { %v8777_v57 = vpop.f32.mrf.mxu0  ;;  %v8820_v10 = vpop.f32.mrf.mxu1 }
 0x4ec   : > { %v5363_v56 = vadd.f32 %v5332_v34, %v5201_v16 }
 0x4ed   : > { %v5175_v11 = vpop.f32.mrf.mxu0  ;;  %v5348_v22 = vpop.f32.mrf.mxu1 }
 0x4ee   : > { %v5202_v35 = vadd.f32 %v5175_v11, %v5040_v25 }
 0x4ef   : > { %v8780_v42 = vpop.f32.mrf.mxu0  ;;  %v8821_v46 = vpop.f32.mrf.mxu1 }
 0x4f0   : > { %v5364_v29 = vadd.f32 %v5337_v62, %v5202_v35 }
 0x4f1   : > { %v5178_v4 = vpop.f32.mrf.mxu0  ;;  %v5353_v55 = vpop.f32.mrf.mxu1 }
 0x4f2   : > { %v5203_v63 = vadd.f32 %v5178_v4, %v5041_v23 }
 0x4f3   : > { %v8781_v33 = vpop.f32.mrf.mxu0  ;;  %v8824_v32 = vpop.f32.mrf.mxu1 }
 0x4f4   : > { %v5365_v9 = vadd.f32 %v5340_v48, %v5203_v63 }
 0x4f5   : > { %v5183_v21 = vpop.f32.mrf.mxu0  ;;  %v5356_v7 = vpop.f32.mrf.mxu1 }
 0x4f6   : > { %v5204_v58 = vadd.f32 %v5183_v21, %v5042_v31 }
 0x4f7   : > { %v8784_v38 = vpop.f32.mrf.mxu0  ;;  %v8825_v24 = vpop.f32.mrf.mxu1 }
 0x4f8   : > { %v5366_v60 = vadd.f32 %v5345_v39, %v5204_v58 }
 0x4f9   : > { %v5186_v53 = vpop.f32.mrf.mxu0  ;;  %v5645_v30 = vpop.f32.mrf.mxu1 }
 0x4fa   : > { %v5205_v3 = vadd.f32 %v5186_v53, %v5043_v43 }
 0x4fb   : > { %v8785_v1 = vpop.f32.mrf.mxu0  ;;  %v8880_v25 = vpop.f32.mrf.mxu1 }
 0x4fc   : > { %v11604_v59 = vadd.f32 %v5348_v22, %v5205_v3 }
 0x4fd   : > { %v5191_v20 = vpop.f32.mrf.mxu0  ;;  %v5648_v0 = vpop.f32.mrf.mxu1 }
 0x4fe   : > { %v5206_v14 = vadd.f32 %v5191_v20, %v5044_v27 }
 0x4ff   : > { %v8788_v23 = vpop.f32.mrf.mxu0  ;;  %v8881_v13 = vpop.f32.mrf.mxu1 }
 0x500   : > { %v11606_v41 = vadd.f32 %v5353_v55, %v5206_v14 }
 0x501   : > { %v5194_v6 = vpop.f32.mrf.mxu0  ;;  %v5653_v5 = vpop.f32.mrf.mxu1 }
 0x502   : > { %v5207_v31 = vadd.f32 %v5194_v6, %v5045_v49 }
 0x503   : > { %v8789_v50 = vpop.f32.mrf.mxu0  ;;  %v8884_v26 = vpop.f32.mrf.mxu1 }
 0x504   : > { %v11608_v28 = vadd.f32 %v5356_v7, %v5207_v31 }
 0x505   : > { %v5483_v18 = vpop.f32.mrf.mxu0  ;;  %v5656_v43 = vpop.f32.mrf.mxu1 }
 0x506   : > { %v5522_v34 = vadd.f32 %v5483_v18, %v5360_v51 }
 0x507   : > { %v8844_v61 = vpop.f32.mrf.mxu0  ;;  %v8885_v2 = vpop.f32.mrf.mxu1 }
 0x508   : > { %v5684_v45 = vadd.f32 %v5645_v30, %v5522_v34 }
 0x509   : > { %v5486_v17 = vpop.f32.mrf.mxu0  ;;  %v5661_v62 = vpop.f32.mrf.mxu1 }
 0x50a   : > { %v5523_v27 = vadd.f32 %v5486_v17, %v5361_v8 }
 0x50b   : > { %v8845_v15 = vpop.f32.mrf.mxu0  ;;  %v8888_v12 = vpop.f32.mrf.mxu1 }
 0x50c   : > { %v5685_v36 = vadd.f32 %v5648_v0, %v5523_v27 }
 0x50d   : > { %v5491_v52 = vpop.f32.mrf.mxu0  ;;  %v5664_v48 = vpop.f32.mrf.mxu1 }
 0x50e   : > { %v5524_v40 = vadd.f32 %v5491_v52, %v5362_v54 }
 0x50f   : > { %v8848_v49 = vpop.f32.mrf.mxu0  ;;  %v8889_v37 = vpop.f32.mrf.mxu1 }
 0x510   : > { %v5686_v47 = vadd.f32 %v5653_v5, %v5524_v40 }
 0x511   : > { %v5494_v44 = vpop.f32.mrf.mxu0  ;;  %v5669_v39 = vpop.f32.mrf.mxu1 }
 0x512   : > { %v5525_v16 = vadd.f32 %v5494_v44, %v5363_v56 }
 0x513   : > { %v8849_v57 = vpop.f32.mrf.mxu0  ;;  %v8892_v51 = vpop.f32.mrf.mxu1 }
 0x514   : > { %v5687_v10 = vadd.f32 %v5656_v43, %v5525_v16 }
 0x515   : > { %v5499_v19 = vpop.f32.mrf.mxu0  ;;  %v5672_v11 = vpop.f32.mrf.mxu1 }
 0x516   : > { %v5526_v22 = vadd.f32 %v5499_v19, %v5364_v29 }
 0x517   : > { %v8852_v35 = vpop.f32.mrf.mxu0  ;;  %v8893_v8 = vpop.f32.mrf.mxu1 }
 0x518   : > { %v5688_v42 = vadd.f32 %v5661_v62, %v5526_v22 }
 0x519   : > { %v5502_v46 = vpop.f32.mrf.mxu0  ;;  %v11610_v4 = vpop.f32.mrf.mxu1 }
 0x51a   : > { %v5527_v55 = vadd.f32 %v5502_v46, %v5365_v9  ;;  %v7687_v9 = vld [vmem:[%s11930_s5] ss:$0 sm:$0xff] }
 0x51b   : > { %v8853_v54 = vpop.f32.mrf.mxu0  ;;  %v8896_v63 = vpop.f32.mrf.mxu1 }
 0x51c   : > { %v5689_v33 = vadd.f32 %v5664_v48, %v5527_v55 }
 0x51d   : > { %v5507_v32 = vpop.f32.mrf.mxu0  ;;  %v11612_v21 = vpop.f32.mrf.mxu1 }
 0x51e   : > { %v5528_v56 = vadd.f32 %v5507_v32, %v5366_v60 }
 0x51f   : > { %v8856_v7 = vpop.f32.mrf.mxu0  ;;  %v8897_v58 = vpop.f32.mrf.mxu1 }
 0x520   : > { %v5690_v38 = vadd.f32 %v5669_v39, %v5528_v56 }
 0x521   : > { %v5510_v24 = vpop.f32.mrf.mxu0 }
 0x522   : > { %v5529_v44 = vadd.f32 %v5510_v24, %v11604_v59 }
 0x523   : > { %v8857_v53 = vpop.f32.mrf.mxu0 }
 0x524   : > { %v5691_v22 = vadd.f32 %v5672_v11, %v5529_v44 }
 0x525   : > { %v5515_v29 = vpop.f32.mrf.mxu0 }
 0x526   : > { %v5530_v19 = vadd.f32 %v5515_v29, %v11606_v41 }
 0x527   : > { %v8860_v30 = vpop.f32.mrf.mxu0 }
 0x529   : > { %v5518_v3 = vpop.f32.mrf.mxu0 }
 0x52a   : > { %v5531_v54 = vadd.f32 %v5518_v3, %v11608_v28  ;;  %v9351_v28 = vld [vmem:[%s11931_s6 + $0x8] sm:$0xff]   ;;  %v9354_v3 = vld [vmem:[%s11931_s6 + $0x20] sm:$0xff]  }
 0x52b   : > { %v8861_v1 = vpop.f32.mrf.mxu0 }
 0x52d   : > { %v5807_v25 = vpop.f32.mrf.mxu0 }
 0x52e   : > { %v5846_v20 = vadd.f32 %v5807_v25, %v5684_v45 }
 0x52f   : > { %v8916_v0 = vpop.f32.mrf.mxu0 }
 0x530   : > { %v5863_v23 = vadd.f32 %v7687_v9, %v5846_v20  ;;  %v9356_v0 = vld [vmem:[%s11931_s6 + $0x30] sm:$0xff]  }
 0x531   : > { %v5810_v14 = vpop.f32.mrf.mxu0 }
 0x532   : > { %v5847_v13 = vadd.f32 %v5810_v14, %v5685_v36  ;;  %v5873_v31 = vmax.f32 %v5863_v23, 0.0  ;;  %v9357_v14 = vld [vmem:[%s11931_s6 + $0x38] sm:$0xff]   ;;  %v9358_v23 = vld [vmem:[%s11931_s6 + $0x40] sm:$0xff]  }
 0x533   : > { %v8917_v60 = vpop.f32.mrf.mxu0 }
 0x534   : > { %v5864_v6 = vadd.f32 %v7687_v9, %v5847_v13  ;;  %v9359_v13 = vld [vmem:[%s11931_s6 + $0x48] sm:$0xff]   ;;  %v9360_v60 = vld [vmem:[%s11932_s7 + $0x78] sm:$0xff]  }
 0x535   : > { %v5815_v5 = vpop.f32.mrf.mxu0  ;;  %8964 = vmatprep.subr.bf16.mxu0 %v9360_v60 }
 0x536   : > { %v5874_v50 = vmax.f32 %v5864_v6, 0.0  ;;  %v5848_v26 = vadd.f32 %v5815_v5, %v5686_v47  ;;  %v9361_v6 = vld [vmem:[%s11932_s7 + $0xb8] sm:$0xff]   ;;  %8965 = vmatpush3.bf16.msra.mxu0 %v9360_v60  ;;  %v9362_v5 = vld [vmem:[%s11932_s7 + $0x70] sm:$0xff]  }
 0x537   : > { %v8920_v18 = vpop.f32.mrf.mxu0  ;;  %8966 = vmatprep.subr.bf16.mxu0 %v9362_v5 }
 0x538   : > { %v5883_v43 = vpack.c.bf16 %v5874_v50, %v5873_v31  ;;  %v5865_v61 = vadd.f32 %v7687_v9, %v5848_v26  ;;  %v9363_v31 = vld [vmem:[%s11932_s7 + $0xb0] sm:$0xff]   ;;  %v9364_v50 = vld [vmem:[%s11932_s7 + $0x68] sm:$0xff]   ;;  %v9366_v18 = vld [vmem:[%s11932_s7 + $0x60] sm:$0xff]  }
 0x539   : > { %v5818_v34 = vpop.f32.mrf.mxu0  ;;  %v9365_v26 = vld [vmem:[%s11932_s7 + $0xa8] sm:$0xff]  }
 0x53a   : > { %v5849_v2 = vadd.f32 %v5818_v34, %v5687_v10  ;;  %v5875_v27 = vmax.f32 %v5865_v61, 0.0  ;;  %8967 = vmatpush3.bf16.msra.mxu0 %v9362_v5  ;;  %v9368_v34 = vld [vmem:[%s11932_s7 + $0x58] sm:$0xff]   ;;  %v9378_v5 = vld [vmem:[%s11932_s7 + $0x30] sm:$0xff]  }
 0x53b   : > { %v8921_v45 = vpop.f32.mrf.mxu0  ;;  %8968 = vmatprep.subr.bf16.mxu0 %v9364_v50  ;;  %v9369_v61 = vld [vmem:[%s11932_s7 + $0x98] sm:$0xff]  }
 0x53c   : > { %v5866_v17 = vadd.f32 %v7687_v9, %v5849_v2  ;;  %v9370_v2 = vld [vmem:[%s11932_s7 + $0x50] sm:$0xff]  }
 0x53d   : > { %v5823_v62 = vpop.f32.mrf.mxu0  ;;  %v9371_v45 = vld [vmem:[%s11932_s7 + $0x90] sm:$0xff]  }
 0x53e   : > { %v5876_v15 = vmax.f32 %v5866_v17, 0.0  ;;  %v5850_v12 = vadd.f32 %v5823_v62, %v5688_v42  ;;  %8969 = vmatpush3.bf16.msra.mxu0 %v9364_v50  ;;  %v9372_v17 = vld [vmem:[%s11932_s7 + $0x48] sm:$0xff]  }
 0x53f   : > { %v8924_v52 = vpop.f32.mrf.mxu0  ;;  %8970 = vmatprep.subr.bf16.mxu0 %v9366_v18  ;;  %v9373_v62 = vld [vmem:[%s11932_s7 + $0x88] sm:$0xff]  }
 0x540   : > { %v5884_v48 = vpack.c.bf16 %v5876_v15, %v5875_v27  ;;  %v5867_v40 = vadd.f32 %v7687_v9, %v5850_v12  ;;  %v9374_v27 = vld [vmem:[%s11932_s7 + $0x40] sm:$0xff]   ;;  %v11709_v12 = vld [vmem:[%s11932_s7 + $0x38] sm:$0xff]  }
 0x541   : > { %v5826_v36 = vpop.f32.mrf.mxu0  ;;  %v9375_v15 = vld [vmem:[%s11932_s7 + $0x80] sm:$0xff]   ;;  %v11714_v52 = vld [vmem:[%s11932_s7 + $0x138] sm:$0xff]  }
 0x542   : > { %v5851_v49 = vadd.f32 %v5826_v36, %v5689_v33  ;;  %v5877_v16 = vmax.f32 %v5867_v40, 0.0  ;;  %v5692_v33 = vadd.f32 %v11610_v4, %v5530_v19  ;;  %v9352_v4 = vld [vmem:[%s11931_s6 + $0x10] sm:$0xff]   ;;  %8971 = vmatpush3.bf16.msra.mxu0 %v9366_v18  ;;  %v9380_v18 = vld [vmem:[%s11932_s7 + $0x28] sm:$0xff]  }
 0x543   : > { %v8925_v37 = vpop.f32.mrf.mxu0  ;;  %8972 = vmatprep.subr.bf16.mxu0 %v9368_v34 }
 0x544   : > { %v5868_v47 = vadd.f32 %v7687_v9, %v5851_v49 }
 0x545   : > { %v5831_v39 = vpop.f32.mrf.mxu0 }
 0x546   : > { %v5878_v57 = vmax.f32 %v5868_v47, 0.0  ;;  %v5852_v51 = vadd.f32 %v5831_v39, %v5690_v38  ;;  %v5693_v38 = vadd.f32 %v11612_v21, %v5531_v54  ;;  %v9353_v21 = vld [vmem:[%s11931_s6 + $0x18] sm:$0xff]   ;;  %8973 = vmatpush3.bf16.msra.mxu0 %v9368_v34  ;;  %v9382_v34 = vld [vmem:[%s11932_s7 + $0x20] sm:$0xff]  }
 0x547   : > { %v8928_v10 = vpop.f32.mrf.mxu0  ;;  %8974 = vmatprep.subr.bf16.mxu0 %v9370_v2 }
 0x548   : > { %v5885_v35 = vpack.c.bf16 %v5878_v57, %v5877_v16  ;;  %v5869_v42 = vadd.f32 %v7687_v9, %v5852_v51 }
 0x549   : > { %v5834_v8 = vpop.f32.mrf.mxu0 }
 0x54a   : > { %v5853_v46 = vadd.f32 %v5834_v8, %v5691_v22  ;;  %v5879_v32 = vmax.f32 %v5869_v42, 0.0  ;;  %8975 = vmatpush3.bf16.msra.mxu0 %v9370_v2  ;;  %v9384_v2 = vld [vmem:[%s11932_s7 + $0x18] sm:$0xff]  }
 0x54b   : > { %v8929_v55 = vpop.f32.mrf.mxu0  ;;  %8976 = vmatprep.subr.bf16.mxu0 %v9372_v17 }
 0x54c   : > { %v5870_v63 = vadd.f32 %v7687_v9, %v5853_v46 }
 0x54d   : > { %v5839_v59 = vpop.f32.mrf.mxu0 }
 0x54e   : > { %v5880_v56 = vmax.f32 %v5870_v63, 0.0  ;;  %v5854_v7 = vadd.f32 %v5839_v59, %v5692_v33  ;;  %8977 = vmatpush3.bf16.msra.mxu0 %v9372_v17  ;;  %v9386_v17 = vld [vmem:[%s11932_s7 + $0x10] sm:$0xff]  }
 0x54f   : > { %v8932_v58 = vpop.f32.mrf.mxu0  ;;  %8978 = vmatprep.subr.bf16.mxu0 %v9374_v27 }
 0x550   : > { %v5886_v24 = vpack.c.bf16 %v5880_v56, %v5879_v32  ;;  %v5871_v11 = vadd.f32 %v7687_v9, %v5854_v7 }
 0x551   : > { %v5842_v41 = vpop.f32.mrf.mxu0 }
 0x552   : > { %v5855_v53 = vadd.f32 %v5842_v41, %v5693_v38  ;;  %v5881_v1 = vmax.f32 %v5871_v11, 0.0  ;;  %8979 = vmatpush3.bf16.msra.mxu0 %v9374_v27  ;;  %v9388_v27 = vld [vmem:[%s11932_s7 + $0x8] sm:$0xff]  }
 0x553   : > { %v8933_v29 = vpop.f32.mrf.mxu0  ;;  %8984 = vmatprep.subr.bf16.mxu0 %v11709_v12 }
 0x554   : > { %v5872_v30 = vadd.f32 %v7687_v9, %v5855_v53  ;;  %v9355_v9 = vld [vmem:[%s11931_s6 + $0x28] sm:$0xff]  }
 0x556   : > { %v5882_v25 = vmax.f32 %v5872_v30, 0.0 }
 0x558   : > { %v5887_v20 = vpack.c.bf16 %v5882_v25, %v5881_v1 }
 0x55a   : > { %8934 = vmatprep.subr.bf16.mxu1 %v5887_v20 }
 0x55b   : > { %8935 = vmatpush3.bf16.msra.mxu1 %v5887_v20 }
 0x55c   : > { %8936 = vmatprep.subr.bf16.mxu1 %v5886_v24 }
 0x55f   : > { %8937 = vmatpush3.bf16.msra.mxu1 %v5886_v24 }
 0x560   : > { %8938 = vmatprep.subr.bf16.mxu1 %v5885_v35 }
 0x563   : > { %8939 = vmatpush3.bf16.msra.mxu1 %v5885_v35 }
 0x564   : > { %8940 = vmatprep.subr.bf16.mxu1 %v5884_v48 }
 0x567   : > { %8941 = vmatpush3.bf16.msra.mxu1 %v5884_v48 }
 0x568   : > { %8942 = vmatprep.subr.bf16.mxu1 %v5883_v43 }
 0x56b   : > { %8943 = vmatpush3.bf16.msra.mxu1 %v5883_v43  ;;  %v9367_v43 = vld [vmem:[%s11932_s7 + $0xa0] sm:$0xff]  }
 0x56c   : > { %9004 = vmatprep.subr.bf16.mxu1 %v9361_v6 }
 0x56e   : > { %8945 = vmatmul.mubr.msk.bf16.vlgmr.msra.gmra.mxu1 %vm5958_vm4, %v9351_v28 }
 0x56f   : > { %8948 = vmatprep.mubr.msk.bf16.mxu1 %vm5958_vm4, %v9352_v4  ;;  %9005 = vmatpush3.bf16.msra.mxu1 %v9361_v6 }
 0x570   : > { %9006 = vmatprep.subr.bf16.mxu1 %v9363_v31 }
 0x573   : > { %9007 = vmatpush3.bf16.msra.mxu1 %v9363_v31  ;;  %v9379_v31 = vld [vmem:[%s11932_s7 + $0x130] sm:$0xff]  }
 0x574   : > { %9008 = vmatprep.subr.bf16.mxu1 %v9365_v26 }
 0x576   : > { %8949 = vmatmul.mubr.msk.bf16.gmra.mxu1 %vm5958_vm4, %v9353_v21 }
 0x577   : > { %8952 = vmatprep.mubr.msk.bf16.mxu1 %vm5958_vm4, %v9354_v3  ;;  %9009 = vmatpush3.bf16.msra.mxu1 %v9365_v26 }
 0x578   : > { %9010 = vmatprep.subr.bf16.mxu1 %v9367_v43 }
 0x57b   : > { %9011 = vmatpush3.bf16.msra.mxu1 %v9367_v43  ;;  %v9381_v43 = vld [vmem:[%s11932_s7 + $0x128] sm:$0xff]  }
 0x57c   : > { %9012 = vmatprep.subr.bf16.mxu1 %v9369_v61 }
 0x57e   : > { %8953 = vmatmul.mubr.msk.bf16.gmra.mxu1 %vm5958_vm4, %v9355_v9 }
 0x57f   : > { %8956 = vmatprep.mubr.msk.bf16.mxu1 %vm5958_vm4, %v9356_v0  ;;  %9013 = vmatpush3.bf16.msra.mxu1 %v9369_v61  ;;  %v9383_v61 = vld [vmem:[%s11932_s7 + $0x120] sm:$0xff]  }
 0x580   : > { %9014 = vmatprep.subr.bf16.mxu1 %v9371_v45 }
 0x583   : > { %9015 = vmatpush3.bf16.msra.mxu1 %v9371_v45  ;;  %v9385_v45 = vld [vmem:[%s11932_s7 + $0x118] sm:$0xff]  }
 0x584   : > { %9016 = vmatprep.subr.bf16.mxu1 %v9373_v62 }
 0x586   : > { %8957 = vmatmul.mubr.msk.bf16.gmra.mxu1 %vm5958_vm4, %v9357_v14 }
 0x587   : > { %8960 = vmatprep.mubr.msk.bf16.mxu1 %vm5958_vm4, %v9358_v23  ;;  %9017 = vmatpush3.bf16.msra.mxu1 %v9373_v62  ;;  %v9387_v62 = vld [vmem:[%s11932_s7 + $0x110] sm:$0xff]  }
 0x588   : > { %9018 = vmatprep.subr.bf16.mxu1 %v9375_v15 }
 0x58b   : > { %9019 = vmatpush3.bf16.msra.mxu1 %v9375_v15  ;;  %v9389_v15 = vld [vmem:[%s11932_s7 + $0x108] sm:$0xff]  }
 0x58c   : > { %9044 = vmatprep.subr.bf16.mxu1 %v11714_v52 }
 0x58e   : > { %8961 = vmatmul.mubr.msk.bf16.gmra.mxu1 %vm5958_vm4, %v9359_v13 }
 0x62e   : > { %v8946_v48 = vpop.f32.mrf.mxu1 }
 0x630   : > { %v6023_v36 = vpop.f32.mrf.mxu1 }
 0x632   : > { %v8947_v40 = vpop.f32.mrf.mxu1 }
 0x634   : > { %v6026_v49 = vpop.f32.mrf.mxu1 }
 0x636   : > { %v8950_v37 = vpop.f32.mrf.mxu1 }
 0x637   : > { %v6105_v63 = vmax.f32 %v6026_v49, %v8950_v37 }
 0x638   : > { %v6039_v44 = vpop.f32.mrf.mxu1 }
 0x63a   : > { %v8951_v47 = vpop.f32.mrf.mxu1 }
 0x63b   : > { %v6108_v38 = vmax.f32 %v8946_v48, %v8951_v47  ;;  %v9392_v48 = vld [vmem:[%s11932_s7 + $0xf8] sm:$0xff]  }
 0x63c   : > { %v6042_v39 = vpop.f32.mrf.mxu1 }
 0x63d   : > { %v6102_v19 = vmax.f32 %v6023_v36, %v6042_v39  ;;  %v9393_v36 = vld [vmem:[%s11932_s7 + $0x1b8] sm:$0xff]  }
 0x63e   : > { %v8954_v16 = vpop.f32.mrf.mxu1 }
 0x63f   : > { %v6103_v8 = vmax.f32 %v6102_v19, %v8954_v16 }
 0x640   : > { %v6055_v57 = vpop.f32.mrf.mxu1 }
 0x641   : > { %v6111_v46 = vmax.f32 %v8947_v40, %v6055_v57 }
 0x642   : > { %v8955_v51 = vpop.f32.mrf.mxu1 }
 0x643   : > { %v6106_v56 = vmax.f32 %v6105_v63, %v8955_v51  ;;  %v9394_v51 = vld [vmem:[%s11932_s7 + $0xf0] sm:$0xff]  }
 0x644   : > { %v6058_v10 = vpop.f32.mrf.mxu1  ;;  %v9403_v63 = vld [vmem:[%s11932_s7 + $0x190] sm:$0xff]  }
 0x645   : > { %v6114_v33 = vmax.f32 %v6039_v44, %v6058_v10  ;;  %v9395_v10 = vld [vmem:[%s11932_s7 + $0x1b0] sm:$0xff]  }
 0x646   : > { %v8958_v22 = vpop.f32.mrf.mxu1 }
 0x647   : > { %v6115_v24 = vmax.f32 %v6114_v33, %v8958_v22  ;;  %v9396_v22 = vld [vmem:[%s11932_s7 + $0xe8] sm:$0xff]  }
 0x648   : > { %v6071_v35 = vpop.f32.mrf.mxu1  ;;  %v9404_v33 = vld [vmem:[%s11932_s7 + $0xc8] sm:$0xff]  }
 0x649   : > { %v6109_v53 = vmax.f32 %v6108_v38, %v6071_v35  ;;  %v9397_v35 = vld [vmem:[%s11932_s7 + $0x1a8] sm:$0xff]  }
 0x64a   : > { %v8959_v42 = vpop.f32.mrf.mxu1 }
 0x64b   : > { %v6104_v55 = vmax.f32 %v6103_v8, %v8959_v42  ;;  %v9398_v8 = vld [vmem:[%s11932_s7 + $0xe0] sm:$0xff]  }
 0x64c   : > { %v6074_v54 = vpop.f32.mrf.mxu1  ;;  %v9399_v42 = vld [vmem:[%s11932_s7 + $0x1a0] sm:$0xff]  }
 0x64d   : > { %6117 = vst [vmem:[#allocation3] sm:$0xff] %v6104_v55  ;;  %v6112_v59 = vmax.f32 %v6111_v46, %v6074_v54  ;;  %v9400_v46 = vld [vmem:[%s11932_s7 + $0xd8] sm:$0xff]   ;;  %v9402_v54 = vld [vmem:[%s11932_s7 + $0xd0] sm:$0xff]  }
 0x64e   : > { %v8962_v32 = vpop.f32.mrf.mxu1 }
 0x64f   : > { %v11718_v7 = vmax.f32 %v6112_v59, %v8962_v32  ;;  %v9405_v59 = vld [vmem:[%s11932_s7 + $0x188] sm:$0xff]   ;;  %v9406_v32 = vld [vmem:[%s11932_s7 + $0xc0] sm:$0xff]  }
 0x650   : > { %v6087_v58 = vpop.f32.mrf.mxu1 }
 0x651   : > { %6120 = vst [vmem:[#allocation3 + $0x18] sm:$0xff] %v11718_v7  ;;  %v11721_v41 = vmax.f32 %v6106_v56, %v6087_v58  ;;  %v9407_v56 = vld [vmem:[%s11932_s7 + $0x180] sm:$0xff]   ;;  %v9408_v58 = vld [vmem:[%s11932_s7 + $0x178] sm:$0xff]  }
 0x652   : > { %v8963_v11 = vpop.f32.mrf.mxu1 }
 0x653   : > { %6118 = vst [vmem:[#allocation3 + $0x8] sm:$0xff] %v11721_v41  ;;  %v6116_v29 = vmax.f32 %v6115_v24, %v8963_v11  ;;  %v6125_v50 = vpack.c.bf16 %v11721_v41, %v6104_v55  ;;  %v9401_v55 = vld [vmem:[%s11932_s7 + $0x198] sm:$0xff]  }
 0x654   : > { %v6090_v30 = vpop.f32.mrf.mxu1  ;;  %v9409_v24 = vld [vmem:[%s11932_s7 + $0x238] sm:$0xff]  }
 0x655   : > { %6121 = vst [vmem:[#allocation3 + $0x20] sm:$0xff] %v6116_v29  ;;  %v11724_v1 = vmax.f32 %v6109_v53, %v6090_v30  ;;  %v9410_v30 = vld [vmem:[%s11932_s7 + $0x170] sm:$0xff]  }
 0x657   : > { %6119 = vst [vmem:[#allocation3 + $0x10] sm:$0xff] %v11724_v1  ;;  %v6719_v25 = vpack.c.bf16 %v11724_v1, %v11721_v41  ;;  %v6126_v47 = vpack.c.bf16 %v11724_v1, %v11724_v1  ;;  %v9414_v41 = vld [vmem:[%s11932_s7 + $0x160] sm:$0xff]  }
 0x658   : > { %v9415_v1 = vld [vmem:[%s11932_s7 + $0x220] sm:$0xff]  }
 0x65a   : > { %v6143_v20 = vld [vmem:[#allocation3 + $0x1] sm:$0xff] }
 0x65b   : > { %v6356_v28 = vld [vmem:[#allocation3 + $0x2] sm:$0xff] }
 0x65c   : > { %v6596_v6 = vld [vmem:[#allocation3 + $0x7] sm:$0xff]  ;;  %v6838_v11 = vld [vmem:[#allocation3 + $0x1c] sm:$0xff] }
 0x65d   : > { %v6476_v16 = vld [vmem:[#allocation3 + $0x6] sm:$0xff]  ;;  %v6840_v29 = vpack.c.bf16 %v6838_v11, %v6838_v11 }
 0x65e   : > { %v6144_v4 = vld [vmem:[#allocation3 + $0x9] sm:$0xff]  ;;  %v6145_v3 = vld [vmem:[#allocation3 + $0x11] sm:$0xff] }
 0x65f   : > { %v6357_v21 = vld [vmem:[#allocation3 + $0xa] sm:$0xff]  ;;  %v6146_v9 = vpack.c.bf16 %v6144_v4, %v6143_v20  ;;  %v6147_v14 = vpack.c.bf16 %v6145_v3, %v6145_v3  ;;  %v6358_v23 = vld [vmem:[#allocation3 + $0x12] sm:$0xff]  ;;  %v9412_v4 = vld [vmem:[%s11932_s7 + $0x168] sm:$0xff]  }
 0x660   : > { %v6359_v0 = vpack.c.bf16 %v6357_v21, %v6356_v28  ;;  %v6597_v13 = vld [vmem:[#allocation3 + $0xf] sm:$0xff]  ;;  %v6360_v60 = vpack.c.bf16 %v6358_v23, %v6358_v23  ;;  %v6598_v40 = vld [vmem:[#allocation3 + $0x17] sm:$0xff]  ;;  %v9413_v21 = vld [vmem:[%s11932_s7 + $0x228] sm:$0xff]  }
 0x661   : > { %8980 = vmatprep.mubr.bf16.mxu0 %v6146_v9  ;;  %v6599_v26 = vpack.c.bf16 %v6597_v13, %v6596_v6  ;;  %v11780_v49 = vld [vmem:[#allocation3 + $0xe] sm:$0xff]  ;;  %v6600_v39 = vpack.c.bf16 %v6598_v40, %v6598_v40  ;;  %v6478_v38 = vld [vmem:[#allocation3 + $0x16] sm:$0xff]  ;;  %v9421_v23 = vld [vmem:[%s11932_s7 + $0x208] sm:$0xff]  }
 0x662   : > { %9020 = vmatprep.mubr.bf16.mxu1 %v6359_v0  ;;  %8981 = vmatmul.mubr.bf16.vlgmr.msra.gmra.mxu0 %v6147_v14  ;;  %v6836_v37 = vld [vmem:[#allocation3 + $0xc] sm:$0xff]  ;;  %v6837_v44 = vld [vmem:[#allocation3 + $0x14] sm:$0xff]  ;;  %v6479_v57 = vpack.c.bf16 %v11780_v49, %v6476_v16  ;;  %v6480_v53 = vpack.c.bf16 %v6478_v38, %v6478_v38  ;;  %v7079_v28 = vpack.c.bf16 %v6478_v38, %v11780_v49  ;;  %v9420_v14 = vld [vmem:[%s11932_s7 + $0x148] sm:$0xff]  }
 0x663   : > { %9021 = vmatmul.mubr.bf16.vlgmr.msra.gmra.mxu1 %v6360_v60  ;;  %8985 = vmatpush3.bf16.msra.mxu0 %v11709_v12  ;;  %v9390_v12 = vld [vmem:[%s11932_s7] sm:$0xff]   ;;  %v6839_v19 = vpack.c.bf16 %v6837_v44, %v6836_v37  ;;  %v9411_v20 = vld [vmem:[%s11932_s7 + $0x230] sm:$0xff]   ;;  %v9417_v3 = vld [vmem:[%s11932_s7 + $0x218] sm:$0xff]  }
 0x664   : > { %9045 = vmatpush3.bf16.msra.mxu1 %v11714_v52  ;;  %9000 = vmatprep.mubr.bf16.mxu0 %v6125_v50  ;;  %v9391_v52 = vld [vmem:[%s11932_s7 + $0x100] sm:$0xff]   ;;  %v9418_v9 = vld [vmem:[%s11932_s7 + $0x150] sm:$0xff]   ;;  %v9424_v6 = vld [vmem:[%s11932_s7 + $0x1f8] sm:$0xff]  }
 0x665   : > { %9060 = vmatprep.mubr.bf16.mxu1 %v6599_v26  ;;  %8986 = vmatprep.subr.bf16.mxu0 %v9378_v5  ;;  %v9419_v0 = vld [vmem:[%s11932_s7 + $0x210] sm:$0xff]   ;;  %v9422_v13 = vld [vmem:[%s11932_s7 + $0x140] sm:$0xff]   ;;  %v6720_v26 = vpack.c.bf16 %v11718_v7, %v11718_v7 }
 0x666   : > { %9046 = vmatprep.subr.bf16.mxu1 %v9379_v31  ;;  %v9423_v60 = vld [vmem:[%s11932_s7 + $0x200] sm:$0xff]  }
 0x667   : > { %8987 = vmatpush3.bf16.msra.mxu0 %v9378_v5  ;;  %v7078_v5 = vld [vmem:[#allocation3 + $0x1e] sm:$0xff]  ;;  %v6957_v50 = vld [vmem:[#allocation3 + $0x15] sm:$0xff] }
 0x668   : > { %9047 = vmatpush3.bf16.msra.mxu1 %v9379_v31  ;;  %8988 = vmatprep.subr.bf16.mxu0 %v9380_v18  ;;  %v6956_v31 = vld [vmem:[#allocation3 + $0xd] sm:$0xff]  ;;  %v9427_v7 = vld [vmem:[%s11932_s7 + $0x1e0] sm:$0xff]  }
 0x669   : > { %9048 = vmatprep.subr.bf16.mxu1 %v9381_v43  ;;  %v9432_v37 = vld [vmem:[%s11934_s9] sm:$0xff]  }
 0x66b   : > { %8989 = vmatpush3.bf16.msra.mxu0 %v9380_v18  ;;  %v9425_v18 = vld [vmem:[%s11932_s7 + $0x1f0] sm:$0xff]  }
 0x66c   : > { %9049 = vmatpush3.bf16.msra.mxu1 %v9381_v43  ;;  %8990 = vmatprep.subr.bf16.mxu0 %v9382_v34  ;;  %v7080_v43 = vpack.c.bf16 %v7078_v5, %v7078_v5 }
 0x66d   : > { %9050 = vmatprep.subr.bf16.mxu1 %v9383_v61 }
 0x66f   : > { %8991 = vmatpush3.bf16.msra.mxu0 %v9382_v34  ;;  %v6959_v34 = vpack.c.bf16 %v6957_v50, %v6956_v31  ;;  %v7780_v50 = vld [vmem:[%s11933_s8] ss:$0 sm:$0xff] }
 0x670   : > { %9051 = vmatpush3.bf16.msra.mxu1 %v9383_v61  ;;  %8992 = vmatprep.subr.bf16.mxu0 %v9384_v2  ;;  %v9426_v61 = vld [vmem:[%s11932_s7 + $0x1e8] sm:$0xff]  }
 0x671   : > { %9052 = vmatprep.subr.bf16.mxu1 %v9385_v45 }
 0x673   : > { %8993 = vmatpush3.bf16.msra.mxu0 %v9384_v2  ;;  %v9428_v2 = vld [vmem:[%s11932_s7 + $0x1d8] sm:$0xff]  }
 0x674   : > { %9053 = vmatpush3.bf16.msra.mxu1 %v9385_v45  ;;  %8994 = vmatprep.subr.bf16.mxu0 %v9386_v17  ;;  %v9429_v45 = vld [vmem:[%s11932_s7 + $0x1d0] sm:$0xff]  }
 0x675   : > { %9054 = vmatprep.subr.bf16.mxu1 %v9387_v62 }
 0x677   : > { %8995 = vmatpush3.bf16.msra.mxu0 %v9386_v17  ;;  %v9430_v17 = vld [vmem:[%s11932_s7 + $0x1c8] sm:$0xff]  }
 0x678   : > { %9055 = vmatpush3.bf16.msra.mxu1 %v9387_v62  ;;  %8996 = vmatprep.subr.bf16.mxu0 %v9388_v27  ;;  %v9431_v62 = vld [vmem:[%s11932_s7 + $0x1c0] sm:$0xff]  }
 0x679   : > { %9056 = vmatprep.subr.bf16.mxu1 %v9389_v15 }
 0x67b   : > { %8997 = vmatpush3.bf16.msra.mxu0 %v9388_v27  ;;  %v6958_v27 = vld [vmem:[#allocation3 + $0x1d] sm:$0xff] }
 0x67c   : > { %9057 = vmatpush3.bf16.msra.mxu1 %v9389_v15  ;;  %8998 = vmatprep.subr.bf16.mxu0 %v9390_v12  ;;  %v6960_v15 = vpack.c.bf16 %v6958_v27, %v6958_v27 }
 0x67d   : > { %9058 = vmatprep.subr.bf16.mxu1 %v9391_v52 }
 0x67f   : > { %8999 = vmatpush3.bf16.msra.mxu0 %v9390_v12 }
 0x680   : > { %9059 = vmatpush3.bf16.msra.mxu1 %v9391_v52  ;;  %9024 = vmatprep.subr.bf16.mxu0 %v9392_v48 }
 0x681   : > { %9084 = vmatprep.subr.bf16.mxu1 %v9393_v36 }
 0x682   : > { %9001 = vmatmul.mubr.bf16.vlgmr.msra.gmra.mxu0 %v6126_v47 }
 0x683   : > { %9061 = vmatmul.mubr.bf16.vlgmr.msra.gmra.mxu1 %v6600_v39  ;;  %9025 = vmatpush3.bf16.msra.mxu0 %v9392_v48 }
 0x684   : > { %9040 = vmatprep.mubr.bf16.mxu0 %v6479_v57  ;;  %9085 = vmatpush3.bf16.msra.mxu1 %v9393_v36 }
 0x685   : > { %9100 = vmatprep.mubr.bf16.mxu1 %v6839_v19  ;;  %9026 = vmatprep.subr.bf16.mxu0 %v9394_v51 }
 0x686   : > { %9086 = vmatprep.subr.bf16.mxu1 %v9395_v10 }
 0x687   : > { %9027 = vmatpush3.bf16.msra.mxu0 %v9394_v51 }
 0x688   : > { %9087 = vmatpush3.bf16.msra.mxu1 %v9395_v10  ;;  %9028 = vmatprep.subr.bf16.mxu0 %v9396_v22 }
 0x689   : > { %9088 = vmatprep.subr.bf16.mxu1 %v9397_v35 }
 0x68b   : > { %9029 = vmatpush3.bf16.msra.mxu0 %v9396_v22 }
 0x68c   : > { %9089 = vmatpush3.bf16.msra.mxu1 %v9397_v35  ;;  %9030 = vmatprep.subr.bf16.mxu0 %v9398_v8 }
 0x68d   : > { %9090 = vmatprep.subr.bf16.mxu1 %v9399_v42 }
 0x68f   : > { %9031 = vmatpush3.bf16.msra.mxu0 %v9398_v8 }
 0x690   : > { %9091 = vmatpush3.bf16.msra.mxu1 %v9399_v42  ;;  %9032 = vmatprep.subr.bf16.mxu0 %v9400_v46 }
 0x691   : > { %9092 = vmatprep.subr.bf16.mxu1 %v9401_v55 }
 0x693   : > { %9033 = vmatpush3.bf16.msra.mxu0 %v9400_v46 }
 0x694   : > { %9093 = vmatpush3.bf16.msra.mxu1 %v9401_v55  ;;  %9034 = vmatprep.subr.bf16.mxu0 %v9402_v54 }
 0x695   : > { %9094 = vmatprep.subr.bf16.mxu1 %v9403_v63 }
 0x697   : > { %9035 = vmatpush3.bf16.msra.mxu0 %v9402_v54 }
 0x698   : > { %9095 = vmatpush3.bf16.msra.mxu1 %v9403_v63  ;;  %9036 = vmatprep.subr.bf16.mxu0 %v9404_v33 }
 0x699   : > { %9096 = vmatprep.subr.bf16.mxu1 %v9405_v59 }
 0x69b   : > { %9037 = vmatpush3.bf16.msra.mxu0 %v9404_v33 }
 0x69c   : > { %9097 = vmatpush3.bf16.msra.mxu1 %v9405_v59  ;;  %9038 = vmatprep.subr.bf16.mxu0 %v9406_v32 }
 0x69d   : > { %9098 = vmatprep.subr.bf16.mxu1 %v9407_v56 }
 0x69f   : > { %9039 = vmatpush3.bf16.msra.mxu0 %v9406_v32 }
 0x6a0   : > { %9099 = vmatpush3.bf16.msra.mxu1 %v9407_v56  ;;  %9064 = vmatprep.subr.bf16.mxu0 %v9408_v58 }
 0x6a1   : > { %9124 = vmatprep.subr.bf16.mxu1 %v9409_v24 }
 0x6a2   : > { %9041 = vmatmul.mubr.bf16.vlgmr.msra.gmra.mxu0 %v6480_v53 }
 0x6a3   : > { %9101 = vmatmul.mubr.bf16.vlgmr.msra.gmra.mxu1 %v6840_v29  ;;  %9065 = vmatpush3.bf16.msra.mxu0 %v9408_v58 }
 0x6a4   : > { %9080 = vmatprep.mubr.bf16.mxu0 %v6719_v25  ;;  %9125 = vmatpush3.bf16.msra.mxu1 %v9409_v24  ;;  %v9416_v25 = vld [vmem:[%s11932_s7 + $0x158] sm:$0xff]  }
 0x6a5   : > { %9140 = vmatprep.mubr.bf16.mxu1 %v7079_v28  ;;  %9066 = vmatprep.subr.bf16.mxu0 %v9410_v30 }
 0x6a6   : > { %9126 = vmatprep.subr.bf16.mxu1 %v9411_v20 }
 0x6a7   : > { %9067 = vmatpush3.bf16.msra.mxu0 %v9410_v30 }
 0x6a8   : > { %9127 = vmatpush3.bf16.msra.mxu1 %v9411_v20  ;;  %9068 = vmatprep.subr.bf16.mxu0 %v9412_v4 }
 0x6a9   : > { %9128 = vmatprep.subr.bf16.mxu1 %v9413_v21 }
 0x6ab   : > { %9069 = vmatpush3.bf16.msra.mxu0 %v9412_v4 }
 0x6ac   : > { %9129 = vmatpush3.bf16.msra.mxu1 %v9413_v21  ;;  %9070 = vmatprep.subr.bf16.mxu0 %v9414_v41 }
 0x6ad   : > { %9130 = vmatprep.subr.bf16.mxu1 %v9415_v1 }
 0x6af   : > { %9071 = vmatpush3.bf16.msra.mxu0 %v9414_v41 }
 0x6b0   : > { %9131 = vmatpush3.bf16.msra.mxu1 %v9415_v1  ;;  %9072 = vmatprep.subr.bf16.mxu0 %v9416_v25 }
 0x6b1   : > { %9132 = vmatprep.subr.bf16.mxu1 %v9417_v3 }
 0x6b3   : > { %9073 = vmatpush3.bf16.msra.mxu0 %v9416_v25 }
 0x6b4   : > { %9133 = vmatpush3.bf16.msra.mxu1 %v9417_v3  ;;  %9074 = vmatprep.subr.bf16.mxu0 %v9418_v9 }
 0x6b5   : > { %9134 = vmatprep.subr.bf16.mxu1 %v9419_v0 }
 0x6b7   : > { %9075 = vmatpush3.bf16.msra.mxu0 %v9418_v9 }
 0x6b8   : > { %9135 = vmatpush3.bf16.msra.mxu1 %v9419_v0  ;;  %9076 = vmatprep.subr.bf16.mxu0 %v9420_v14 }
 0x6b9   : > { %9136 = vmatprep.subr.bf16.mxu1 %v9421_v23 }
 0x6bb   : > { %9077 = vmatpush3.bf16.msra.mxu0 %v9420_v14 }
 0x6bc   : > { %9137 = vmatpush3.bf16.msra.mxu1 %v9421_v23  ;;  %9078 = vmatprep.subr.bf16.mxu0 %v9422_v13 }
 0x6bd   : > { %9138 = vmatprep.subr.bf16.mxu1 %v9423_v60 }
 0x6bf   : > { %9079 = vmatpush3.bf16.msra.mxu0 %v9422_v13 }
 0x6c0   : > { %9139 = vmatpush3.bf16.msra.mxu1 %v9423_v60  ;;  %9104 = vmatprep.subr.bf16.mxu0 %v9424_v6 }
 0x6c2   : > { %9081 = vmatmul.mubr.bf16.vlgmr.msra.gmra.mxu0 %v6720_v26 }
 0x6c3   : > { %9141 = vmatmul.mubr.bf16.vlgmr.msra.gmra.mxu1 %v7080_v43  ;;  %9105 = vmatpush3.bf16.msra.mxu0 %v9424_v6 }
 0x6c4   : > { %9120 = vmatprep.mubr.bf16.mxu0 %v6959_v34  ;;  %9106 = vmatprep.subr.bf16.mxu0 %v9425_v18 }
 0x6c7   : > { %9107 = vmatpush3.bf16.msra.mxu0 %v9425_v18 }
 0x6c8   : > { %9108 = vmatprep.subr.bf16.mxu0 %v9426_v61 }
 0x6cb   : > { %9109 = vmatpush3.bf16.msra.mxu0 %v9426_v61 }
 0x6cc   : > { %9110 = vmatprep.subr.bf16.mxu0 %v9427_v7 }
 0x6cf   : > { %9111 = vmatpush3.bf16.msra.mxu0 %v9427_v7 }
 0x6d0   : > { %9112 = vmatprep.subr.bf16.mxu0 %v9428_v2 }
 0x6d3   : > { %9113 = vmatpush3.bf16.msra.mxu0 %v9428_v2 }
 0x6d4   : > { %9114 = vmatprep.subr.bf16.mxu0 %v9429_v45 }
 0x6d7   : > { %9115 = vmatpush3.bf16.msra.mxu0 %v9429_v45 }
 0x6d8   : > { %9116 = vmatprep.subr.bf16.mxu0 %v9430_v17 }
 0x6db   : > { %9117 = vmatpush3.bf16.msra.mxu0 %v9430_v17 }
 0x6dc   : > { %9118 = vmatprep.subr.bf16.mxu0 %v9431_v62 }
 0x6df   : > { %9119 = vmatpush3.bf16.msra.mxu0 %v9431_v62 }
 0x6e2   : > { %9121 = vmatmul.mubr.bf16.vlgmr.msra.gmra.mxu0 %v6960_v15 }
 0x6e3   : > { %9148 = vmatprep.mubr.msk.bf16.mxu0 %vm7225_vm5, %v9432_v37 }
 0x722   : > { %v8982_v12 = vpop.f32.mrf.mxu0 }
 0x723   : > { %v9022_v52 = vpop.f32.mrf.mxu1 }
 0x724   : > { %v6246_v48 = vpop.f32.mrf.mxu0 }
 0x725   : > { %v6459_v36 = vpop.f32.mrf.mxu1 }
 0x726   : > { %v8983_v40 = vpop.f32.mrf.mxu0 }
 0x727   : > { %v9023_v49 = vpop.f32.mrf.mxu1 }
 0x728   : > { %v6249_v44 = vpop.f32.mrf.mxu0 }
 0x729   : > { %v6462_v47 = vpop.f32.mrf.mxu1 }
 0x742   : > { %v9002_v39 = vpop.f32.mrf.mxu0 }
 0x743   : > { %v9062_v16 = vpop.f32.mrf.mxu1  ;;  %v6351_v57 = vadd.f32 %v9002_v39, %v8982_v12 }
 0x744   : > { %v6342_v51 = vpop.f32.mrf.mxu0 }
 0x745   : > { %v6699_v10 = vpop.f32.mrf.mxu1  ;;  %v6343_v19 = vadd.f32 %v6342_v51, %v6246_v48  ;;  %v6475_v22 = vadd.f32 %v9022_v52, %v6351_v57 }
 0x746   : > { %v9003_v35 = vpop.f32.mrf.mxu0 }
 0x747   : > { %v9063_v8 = vpop.f32.mrf.mxu1  ;;  %v6473_v42 = vadd.f32 %v6459_v36, %v6343_v19 }
 0x748   : > { %v6345_v46 = vpop.f32.mrf.mxu0 }
 0x749   : > { %v6346_v55 = vadd.f32 %v6345_v46, %v6249_v44  ;;  %v6702_v63 = vpop.f32.mrf.mxu1  ;;  %v9433_v44 = vld [vmem:[%s11934_s9 + $0x8] sm:$0xff]  }
 0x74b   : > { %v6474_v54 = vadd.f32 %v6462_v47, %v6346_v55 }
 0x762   : > { %v9042_v33 = vpop.f32.mrf.mxu0 }
 0x763   : > { %v6595_v59 = vadd.f32 %v9042_v33, %v6475_v22  ;;  %v9102_v32 = vpop.f32.mrf.mxu1 }
 0x764   : > { %v6579_v56 = vpop.f32.mrf.mxu0 }
 0x765   : > { %v6593_v58 = vadd.f32 %v6579_v56, %v6473_v42  ;;  %v6939_v38 = vpop.f32.mrf.mxu1  ;;  %v6715_v24 = vadd.f32 %v9062_v16, %v6595_v59 }
 0x766   : > { %v9043_v11 = vpop.f32.mrf.mxu0 }
 0x767   : > { %v9103_v53 = vpop.f32.mrf.mxu1  ;;  %v6713_v29 = vadd.f32 %v6699_v10, %v6593_v58 }
 0x768   : > { %v6582_v30 = vpop.f32.mrf.mxu0 }
 0x769   : > { %v6594_v20 = vadd.f32 %v6582_v30, %v6474_v54  ;;  %v6942_v4 = vpop.f32.mrf.mxu1 }
 0x76b   : > { %v6714_v28 = vadd.f32 %v6702_v63, %v6594_v20 }
 0x782   : > { %v9082_v21 = vpop.f32.mrf.mxu0 }
 0x783   : > { %v9142_v41 = vpop.f32.mrf.mxu1  ;;  %v6835_v23 = vadd.f32 %v9082_v21, %v6715_v24 }
 0x784   : > { %v6819_v1 = vpop.f32.mrf.mxu0 }
 0x785   : > { %v6833_v25 = vadd.f32 %v6819_v1, %v6713_v29  ;;  %v7179_v3 = vpop.f32.mrf.mxu1  ;;  %v6955_v60 = vadd.f32 %v9102_v32, %v6835_v23 }
 0x786   : > { %v9083_v9 = vpop.f32.mrf.mxu0 }
 0x787   : > { %v9143_v0 = vpop.f32.mrf.mxu1  ;;  %v6953_v14 = vadd.f32 %v6939_v38, %v6833_v25 }
 0x788   : > { %v6822_v13 = vpop.f32.mrf.mxu0 }
 0x789   : > { %v6834_v5 = vadd.f32 %v6822_v13, %v6714_v28  ;;  %v7182_v27 = vpop.f32.mrf.mxu1 }
 0x78b   : > { %v6954_v2 = vadd.f32 %v6942_v4, %v6834_v5 }
 0x7a2   : > { %v9122_v6 = vpop.f32.mrf.mxu0 }
 0x7a3   : > { %v7075_v31 = vadd.f32 %v9122_v6, %v6955_v60 }
 0x7a4   : > { %v7059_v26 = vpop.f32.mrf.mxu0 }
 0x7a5   : > { %v7195_v18 = vadd.f32 %v9142_v41, %v7075_v31  ;;  %v7073_v43 = vadd.f32 %v7059_v26, %v6953_v14 }
 0x7a6   : > { %v9123_v34 = vpop.f32.mrf.mxu0 }
 0x7a7   : > { %v7205_v61 = vadd.f32 %v7780_v50, %v7195_v18  ;;  %v7193_v7 = vadd.f32 %v7179_v3, %v7073_v43 }
 0x7a8   : > { %v7062_v45 = vpop.f32.mrf.mxu0 }
 0x7a9   : > { %v7208_v17 = vmax.f32 %v7205_v61, 0.0  ;;  %v7074_v62 = vadd.f32 %v7062_v45, %v6954_v2  ;;  %v7203_v12 = vadd.f32 %v7780_v50, %v7193_v7 }
 0x7ab   : > { %v7210_v15 = vpack.c.bf16 %v7208_v17, %v7208_v17  ;;  %v7194_v52 = vadd.f32 %v7182_v27, %v7074_v62  ;;  %v7206_v40 = vmax.f32 %v7203_v12, 0.0 }
 0x7ad   : > { %v7204_v48 = vadd.f32 %v7780_v50, %v7194_v52  ;;  %9161 = vmatprep.subr.msk.bf16.mxu0 %vm524_vm0, %v7210_v15  ;;  %v7233_v36 = vsel %vm524_vm0, %v7210_v15, 0 }
 0x7ae   : > { %9145 = vmatpush3.bf16.msra.mxu0 %v7233_v36 }
 0x7af   : > { %v7207_v49 = vmax.f32 %v7204_v48, 0.0 }
 0x7b1   : > { %v7209_v37 = vpack.c.bf16 %v7207_v49, %v7206_v40 }
 0x7b3   : > { %9146 = vmatprep.subr.bf16.mxu0 %v7209_v37 }
 0x7b4   : > { %9147 = vmatpush3.bf16.msra.mxu0 %v7209_v37 }
 0x7b7   : > { %9149 = vmatmul.mubr.msk.bf16.vlgmr.msra.gmra.mxu0 %vm7225_vm5, %v9433_v44 }
 0x877   : > { %v9150_v47 = vpop.f32.mrf.mxu0 }
 0x879   : > { %v7269_v39 = vpop.f32.mrf.mxu0 }
 0x87b   : > { %v9151_v16 = vpop.f32.mrf.mxu0 }
 0x87c   : > { %v7285_v51 = vmax.f32 %v9150_v47, %v9151_v16 }
 0x87d   : > { %v7272_v57 = vpop.f32.mrf.mxu0 }
 0x87e   : > { %v7284_v10 = vmax.f32 %v7269_v39, %v7272_v57 }
 0x880   : > { %v7286_v19 = vmax.f32 %v7284_v10, %v7285_v51 }
 0x882   : > { %7287 = vst [vmem:[%s357_s28] sm:$0xff] %v7286_v19 }
 0x883 PF: > { %s20_s13 = sadd.s32 1, %s9440_s13  }
 0x884   : > { %p17_p4 = scmp.ge.s32.totalorder %s20_s13, 4  }
 0x886   :  { %19 = sbr.rel (!%p17_p4) target bundleno = 1 (0x1), region = 90 }

</bundles_post_ra>
